<compile_context>
chip_gen: v7x
topology: tpu7x:2x2x1
jax: 0.10.0
libtpu: 0.0.40
codegen_flags: <defaults>
</compile_context>

<pallas_src>
import functools

import jax
import jax.numpy as jnp
from jax.experimental import pallas as pl
from jax.experimental.pallas import tpu as pltpu


def _f32(a):
    return a if a.dtype == jnp.float32 else a.astype(jnp.float32)


# ----------------------------------------------------------------------------
# Pallas kernel 1: tiled matmul + bias (+ optional ReLU).
# Grid = (M tiles, K tiles); f32 accumulator in VMEM; K axis is the reduction
# ("arbitrary", last), M axis is "parallel" so v7x can shard it across cores.
# ----------------------------------------------------------------------------
def _matmul_bias_kernel(x_ref, w_ref, b_ref, o_ref, acc_ref, *, relu):
    k = pl.program_id(1)

    @pl.when(k == 0)
    def _():
        acc_ref[...] = jnp.zeros_like(acc_ref)

    acc_ref[...] += jnp.dot(x_ref[...], w_ref[...],
                            preferred_element_type=jnp.float32)

    @pl.when(k == pl.num_programs(1) - 1)
    def _():
        out = acc_ref[...] + b_ref[...]
        if relu:
            out = jnp.maximum(out, 0.0)
        o_ref[...] = out.astype(o_ref.dtype)


def _pick_tile_m(m):
    # Prefer >=2 grid blocks (v7x has 2 TensorCores); fall back to a single block.
    if m % 128 == 0 and m >= 256:
        return 128
    return m


def _pick_tile_k(k):
    for tk in (512, 256):
        if k > tk and k % tk == 0:
            return tk
    return k


def matmul_bias(x, w, b, relu=False):
    """x: (M, K), w: (K, N), b: (N,) -> (M, N) float32."""
    M, K = x.shape
    K2, N = w.shape
    assert K == K2 and b.shape == (N,)
    tm = _pick_tile_m(M)
    tk = _pick_tile_k(K)
    grid = (M // tm, K // tk)

    # Explicit VMEM budget (double-buffered inputs + resident acc), padded to
    # (8, 128) tiles; keeps us honest w.r.t. v7x's 64 MiB physical VMEM.
    def rup(v, m):
        return ((v + m - 1) // m) * m
    blk_bytes = 4 * (rup(tm, 8) * rup(tk, 128) + rup(tk, 8) * rup(N, 128)
                     + rup(tm, 8) * rup(N, 128) + 8 * rup(N, 128))
    vmem_limit = int(min(max(4 * blk_bytes, 32 * 1024 * 1024), 48 * 1024 * 1024))

    return pl.pallas_call(
        functools.partial(_matmul_bias_kernel, relu=relu),
        out_shape=jax.ShapeDtypeStruct((M, N), jnp.float32),
        grid_spec=pltpu.PrefetchScalarGridSpec(
            num_scalar_prefetch=0,
            grid=grid,
            in_specs=[
                pl.BlockSpec((tm, tk), lambda i, k: (i, k)),
                pl.BlockSpec((tk, N), lambda i, k: (k, 0)),
                pl.BlockSpec((1, N), lambda i, k: (0, 0)),
            ],
            out_specs=pl.BlockSpec((tm, N), lambda i, k: (i, 0)),
            scratch_shapes=[pltpu.VMEM((tm, N), jnp.float32)],
        ),
        compiler_params=pltpu.CompilerParams(
            dimension_semantics=("parallel", "arbitrary"),
            vmem_limit_bytes=vmem_limit),
    )(_f32(x), _f32(w), _f32(b).reshape(1, N))


# ----------------------------------------------------------------------------
# Pallas kernel 2: LSTM recurrence over time (input projection hoisted).
# gates_x[t] already contains x_t @ W_ih + b; the kernel only adds h @ W_hh,
# applies full-vreg sigmoid/tanh on the (N, 4H=128) gate tile and updates h/c
# carried in VMEM scratch.  PyTorch gate ordering (i, f, g, o).
# ----------------------------------------------------------------------------
def _lstm_kernel(gx_ref, whh_ref, h_out_ref, h_sc, c_sc):
    t = pl.program_id(0)

    @pl.when(t == 0)
    def _():
        h_sc[...] = jnp.zeros_like(h_sc)
        c_sc[...] = jnp.zeros_like(c_sc)

    H = h_sc.shape[-1]
    gates = gx_ref[0] + jnp.dot(h_sc[...], whh_ref[...],
                                preferred_element_type=jnp.float32)  # (N, 4H)
    # Two full-width EUP passes instead of four masked 32-lane transcendentals.
    sig = jax.nn.sigmoid(gates)
    th = jnp.tanh(gates)
    i_g = sig[:, 0 * H:1 * H]
    f_g = sig[:, 1 * H:2 * H]
    g_g = th[:, 2 * H:3 * H]
    o_g = sig[:, 3 * H:4 * H]
    c_new = f_g * c_sc[...] + i_g * g_g
    h_new = o_g * jnp.tanh(c_new)
    c_sc[...] = c_new
    h_sc[...] = h_new
    # Output block index is constant over t -> written back to HBM once at the
    # end; storing unconditionally keeps this robust to grid-order changes.
    h_out_ref[...] = h_new.astype(h_out_ref.dtype)


def lstm_final_hidden(gates_x, w_hh):
    """gates_x: (T, N, 4H) precomputed x@W_ih + b; w_hh: (H, 4H) -> (N, H)."""
    T, N, G = gates_x.shape
    H = w_hh.shape[0]
    assert G == 4 * H and w_hh.shape == (H, G)
    return pl.pallas_call(
        _lstm_kernel,
        out_shape=jax.ShapeDtypeStruct((N, H), jnp.float32),
        grid_spec=pltpu.PrefetchScalarGridSpec(
            num_scalar_prefetch=0,
            grid=(T,),
            in_specs=[
                pl.BlockSpec((1, N, G), lambda t: (t, 0, 0)),
                pl.BlockSpec((H, G), lambda t: (0, 0)),
            ],
            out_specs=pl.BlockSpec((N, H), lambda t: (0, 0)),
            scratch_shapes=[
                pltpu.VMEM((N, H), jnp.float32),   # h
                pltpu.VMEM((N, H), jnp.float32),   # c
            ],
        ),
        compiler_params=pltpu.CompilerParams(
            dimension_semantics=("arbitrary",)),
    )(_f32(gates_x), _f32(w_hh))


# ----------------------------------------------------------------------------
# Pallas kernel 3: fused FC head  out = relu(x @ W1 + b1) @ W2 + b2.
# The (B, 128) intermediate never leaves VMEM.
# ----------------------------------------------------------------------------
def _fc_head_kernel(x_ref, w1_ref, b1_ref, w2_ref, b2_ref, o_ref):
    h = jnp.dot(x_ref[...], w1_ref[...],
                preferred_element_type=jnp.float32) + b1_ref[...]
    h = jnp.maximum(h, 0.0)
    out = jnp.dot(h, w2_ref[...],
                  preferred_element_type=jnp.float32) + b2_ref[...]
    o_ref[...] = out.astype(o_ref.dtype)


def fc_head(x, w1, b1, w2, b2):
    M, K = x.shape
    Hd = w1.shape[1]
    Nout = w2.shape[1]
    tm = _pick_tile_m(M)
    grid = (M // tm,)
    return pl.pallas_call(
        _fc_head_kernel,
        out_shape=jax.ShapeDtypeStruct((M, Nout), jnp.float32),
        grid_spec=pltpu.PrefetchScalarGridSpec(
            num_scalar_prefetch=0,
            grid=grid,
            in_specs=[
                pl.BlockSpec((tm, K), lambda i: (i, 0)),
                pl.BlockSpec((K, Hd), lambda i: (0, 0)),
                pl.BlockSpec((1, Hd), lambda i: (0, 0)),
                pl.BlockSpec((Hd, Nout), lambda i: (0, 0)),
                pl.BlockSpec((1, Nout), lambda i: (0, 0)),
            ],
            out_specs=pl.BlockSpec((tm, Nout), lambda i: (i, 0)),
        ),
        compiler_params=pltpu.CompilerParams(
            dimension_semantics=("parallel",)),
    )(_f32(x), _f32(w1), _f32(b1).reshape(1, Hd),
      _f32(w2), _f32(b2).reshape(1, Nout))


# ----------------------------------------------------------------------------
# Convolution as a single lane-dense "row-GEMM" (NHWC, no im2col round-trip).
#   For each output row i we gather the kh padded input rows (stride applied)
#   -> (B*Ho, kh*Wp*Cin) and multiply by a precomputed row-Toeplitz weight of
#   shape (kh*Wp*Cin, Wo*Cout).  Output reshapes zero-copy to (B, Ho, Wo, Cout).
# ----------------------------------------------------------------------------
def make_row_toeplitz(w_hwio, Wp, Wo, stride):
    """w_hwio: (kh, kw, Cin, Cout) -> (kh*Wp*Cin, Wo*Cout) row-Toeplitz matrix."""
    kh, kw, Cin, Cout = w_hwio.shape
    wt = jnp.zeros((kh, Wp, Cin, Wo, Cout), jnp.float32)
    for j in range(Wo):
        for dj in range(kw):
            wt = wt.at[:, stride * j + dj, :, j, :].set(w_hwio[:, dj, :, :])
    return wt.reshape(kh * Wp * Cin, Wo * Cout)


def conv2d_rowgemm(x_nhwc, w_toep, b_tiled, *, kh=3, kw=3, stride, pad, relu):
    """x: (B, H, W, Cin) NHWC -> (B, Ho, Wo, Cout) NHWC."""
    B, H, W, Cin = x_nhwc.shape
    Ho = (H + 2 * pad - kh) // stride + 1
    Wo = (W + 2 * pad - kw) // stride + 1
    Wp = W + 2 * pad
    cout = w_toep.shape[1] // Wo
    assert w_toep.shape[0] == kh * Wp * Cin
    assert b_tiled.shape == (Wo * cout,)
    xp = jnp.pad(x_nhwc, ((0, 0), (pad, pad), (pad, pad), (0, 0)))
    # Gather the kh padded input rows feeding each output row (plain-JAX glue).
    rows = [xp[:, di:di + stride * (Ho - 1) + 1:stride, :, :] for di in range(kh)]
    xr = jnp.stack(rows, axis=2).reshape(B * Ho, kh * Wp * Cin)
    y = matmul_bias(xr, w_toep, b_tiled, relu=relu)       # (B*Ho, Wo*Cout)
    return y.reshape(B, Ho, Wo, cout)


# ----------------------------------------------------------------------------
# Parameter construction (deterministic, synthetic).
# ----------------------------------------------------------------------------
CONV1_OUT = 16
CONV2_OUT = 16
ENC_CONV_OUT = 8
FC_HIDDEN = 128


def init_params(key, input_shape, n_actions, em_out_shape, hidden_size):
    C, H, W = input_shape
    Cem, Hem, Wem = em_out_shape
    keys = jax.random.split(key, 8)

    def w(k, shape, scale=0.05):
        return scale * jax.random.normal(k, shape, dtype=jnp.float32)

    # Conv geometry (pad=1, k=3):
    Wp1, Wo1 = W + 2, W            # conv1 stride 1 keeps HxW
    Wp2, Ho2, Wo2 = W + 2, H // 2, W // 2   # conv2 stride 2
    Wpe, Hoe, Woe = Wem + 2, Hem // 2, Wem // 2  # enc conv stride 2

    conv1_w = w(keys[0], (3, 3, C, CONV1_OUT))
    conv2_w = w(keys[1], (3, 3, CONV1_OUT, CONV2_OUT))
    enc_w = w(keys[2], (3, 3, Cem, ENC_CONV_OUT))
    conv1_b = jnp.zeros((CONV1_OUT,), jnp.float32)
    conv2_b = jnp.zeros((CONV2_OUT,), jnp.float32)
    enc_b = jnp.zeros((ENC_CONV_OUT,), jnp.float32)

    conv_out_size = CONV2_OUT * Ho2 * Wo2
    enc_conv_size = ENC_CONV_OUT * Hoe * Woe

    # LSTM: input projection weights in NHWC feature order; the reward scalar's
    # W_ih row is kept separate so the hoisted gates_x matmul has K=512.
    w_ih_feat = w(keys[3], (enc_conv_size, 4 * hidden_size))
    w_ih_rew = w(keys[4], (1, 4 * hidden_size))
    w_hh = w(keys[5], (hidden_size, 4 * hidden_size))
    b_lstm = jnp.zeros((4 * hidden_size,), jnp.float32)   # b_ih + b_hh combined

    fc_input = conv_out_size + n_actions * hidden_size
    fc1_w = w(keys[6], (fc_input, FC_HIDDEN))
    fc1_b = jnp.zeros((FC_HIDDEN,), jnp.float32)
    fc2_w = w(keys[7], (FC_HIDDEN, n_actions))
    fc2_b = jnp.zeros((n_actions,), jnp.float32)

    return dict(
        conv1_wt=make_row_toeplitz(conv1_w, Wp1, Wo1, 1),
        conv1_bt=jnp.tile(conv1_b, Wo1),
        conv2_wt=make_row_toeplitz(conv2_w, Wp2, Wo2, 2),
        conv2_bt=jnp.tile(conv2_b, Wo2),
        enc_wt=make_row_toeplitz(enc_w, Wpe, Woe, 2),
        enc_bt=jnp.tile(enc_b, Woe),
        w_ih_feat=w_ih_feat, w_ih_rew=w_ih_rew, w_hh=w_hh, b_lstm=b_lstm,
        fc1_w=fc1_w, fc1_b=fc1_b, fc2_w=fc2_w, fc2_b=fc2_b)


# ----------------------------------------------------------------------------
# Forward pass.
#   x:            (B, C, H, W)                       -- observation, NCHW
#   pred_states:  (T, B*n_actions, Cem, Hem, Wem)    -- rollout frames
#   pred_rewards: (T, B*n_actions, 1)                -- rollout rewards
# Returns: (B, n_actions) policy logits.
# ----------------------------------------------------------------------------
def i2a_forward(params, x, pred_states, pred_rewards):
    B = x.shape[0]

    # ConvNN path (NHWC end-to-end; single tiny transpose on the raw input).
    xh = jnp.transpose(_f32(x), (0, 2, 3, 1))
    h1 = conv2d_rowgemm(xh, params["conv1_wt"], params["conv1_bt"],
                        stride=1, pad=1, relu=True)
    h2 = conv2d_rowgemm(h1, params["conv2_wt"], params["conv2_bt"],
                        stride=2, pad=1, relu=True)
    conv_out = h2.reshape(B, -1)                           # zero-copy flatten

    # RolloutEncoder path.
    T, N = pred_states.shape[0], pred_states.shape[1]
    ps = jnp.transpose(_f32(pred_states), (0, 1, 3, 4, 2))
    ps = ps.reshape((T * N,) + ps.shape[2:])
    he = conv2d_rowgemm(ps, params["enc_wt"], params["enc_bt"],
                        stride=2, pad=1, relu=True)
    he = he.reshape(T * N, -1)                             # (T*N, 512) zero-copy

    # Hoisted LSTM input projection: one parallel matmul for all timesteps,
    # reward scalar folded in as a rank-1 add (keeps K lane-aligned at 512).
    gates_x = matmul_bias(he, params["w_ih_feat"], params["b_lstm"], relu=False)
    gates_x = gates_x + _f32(pred_rewards).reshape(T * N, 1) * params["w_ih_rew"]
    gates_x = gates_x.reshape(T, N, -1)

    h_final = lstm_final_hidden(gates_x, params["w_hh"])   # (N, hidden)
    enc = h_final.reshape(B, -1)                           # (B, n_actions*hidden)

    # Fused FCNN head (fc1 + ReLU + fc2 in one Pallas kernel).
    fc_in = jnp.concatenate([conv_out, enc], axis=1)
    return fc_head(fc_in, params["fc1_w"], params["fc1_b"],
                   params["fc2_w"], params["fc2_b"])


if __name__ == "__main__":
    # Small, module-consistent shapes.
    B, C, H, W = 2, 4, 16, 16
    n_actions = 4
    hidden_size = 32
    em_out_shape = (4, 16, 16)
    T = 8                                   # rollout steps

    key = jax.random.PRNGKey(0)
    k_x, k_s, k_r, k_p = jax.random.split(key, 4)

    x = jax.random.normal(k_x, (B, C, H, W), dtype=jnp.float32)
    pred_states = jax.random.normal(
        k_s, (T, B * n_actions) + em_out_shape, dtype=jnp.float32)
    pred_rewards = jax.random.normal(
        k_r, (T, B * n_actions, 1), dtype=jnp.float32)

    params = init_params(k_p, (C, H, W), n_actions, em_out_shape, hidden_size)

    # TODO(synk): at scaled-up sizes, switch activations/weights to bf16 on
    # v6e/v7x (f32 accumulation already in place); kept f32 here for v5e.
    fwd = jax.jit(i2a_forward)
    out = fwd(params, x, pred_states, pred_rewards)
    out = jax.block_until_ready(out)
    assert out.shape == (B, n_actions), out.shape
    assert bool(jnp.all(jnp.isfinite(out)))
    print("KERNEL_OK")
</pallas_src>

<mosaic_0001>
module attributes {stable_mosaic.version = 11 : i64} {
  func.func @_matmul_bias_kernel(%arg0: i32, %arg1: i32, %arg2: memref<128x216xf32, #tpu.memory_space<vmem>>, %arg3: memref<216x64xf32, #tpu.memory_space<vmem>>, %arg4: memref<1x64xf32, #tpu.memory_space<vmem>>, %arg5: memref<128x64xf32, #tpu.memory_space<vmem>>, %arg6: memref<128x64xf32, #tpu.memory_space<vmem>>) attributes {dimension_semantics = [#tpu.dimension_semantics<parallel>, #tpu.dimension_semantics<arbitrary>], iteration_bounds = array<i64: 4, 1>, scalar_prefetch = 0 : i64, scratch_operands = 1 : i64, tpu.core_type = #tpu.core_type<tc>, window_params = [{transform_indices = @transform_0, window_bounds = array<i64: 128, 216>}, {transform_indices = @transform_1, window_bounds = array<i64: 216, 64>}, {pipeline_mode = #tpu.pipeline_mode<synchronous>, transform_indices = @transform_2, window_bounds = array<i64: 1, 64>}, {transform_indices = @transform_3, window_bounds = array<i64: 128, 64>}]} {
    %c0_i32 = arith.constant 0 : i32
    %0 = arith.cmpi eq, %arg1, %c0_i32 : i32
    %1 = arith.extui %0 : i1 to i32
    %c0_i32_0 = arith.constant 0 : i32
    %2 = arith.cmpi ne, %1, %c0_i32_0 : i32
    scf.if %2 {
      %cst_10 = arith.constant 0.000000e+00 : f32
      %12 = vector.broadcast %cst_10 : f32 to vector<128x64xf32>
      %c0_11 = arith.constant 0 : index
      %c0_12 = arith.constant 0 : index
      %13 = vector.load %arg6[%c0_11, %c0_12] : memref<128x64xf32, #tpu.memory_space<vmem>>, vector<128x64xf32>
      tpu.vector_store %arg6[%c0_11, %c0_12], %12 {strides = array<i32>} : memref<128x64xf32, #tpu.memory_space<vmem>>, vector<128x64xf32>,
    } else {
    }
    %c0 = arith.constant 0 : index
    %c0_1 = arith.constant 0 : index
    %3 = vector.load %arg6[%c0, %c0_1] : memref<128x64xf32, #tpu.memory_space<vmem>>, vector<128x64xf32>
    %c0_2 = arith.constant 0 : index
    %c0_3 = arith.constant 0 : index
    %4 = vector.load %arg2[%c0_2, %c0_3] : memref<128x216xf32, #tpu.memory_space<vmem>>, vector<128x216xf32>
    %c0_4 = arith.constant 0 : index
    %c0_5 = arith.constant 0 : index
    %5 = vector.load %arg3[%c0_4, %c0_5] : memref<216x64xf32, #tpu.memory_space<vmem>>, vector<216x64xf32>
    %cst = arith.constant dense<0.000000e+00> : vector<128x64xf32>
    %6 = tpu.matmul %4, %5, %cst {dimension_numbers = #tpu.dot_dimension_numbers<[1], [0], [0], [1], [0, 0, 1, 1], [], []>} : vector<128x216xf32>, vector<216x64xf32>, vector<128x64xf32> -> vector<128x64xf32>
    %7 = arith.addf %3, %6 : vector<128x64xf32>
    %c0_6 = arith.constant 0 : index
    %c0_7 = arith.constant 0 : index
    %8 = vector.load %arg6[%c0_6, %c0_7] : memref<128x64xf32, #tpu.memory_space<vmem>>, vector<128x64xf32>
    tpu.vector_store %arg6[%c0_6, %c0_7], %7 {strides = array<i32>} : memref<128x64xf32, #tpu.memory_space<vmem>>, vector<128x64xf32>,
    %c0_i32_8 = arith.constant 0 : i32
    %9 = arith.cmpi eq, %arg1, %c0_i32_8 : i32
    %10 = arith.extui %9 : i1 to i32
    %c0_i32_9 = arith.constant 0 : i32
    %11 = arith.cmpi ne, %10, %c0_i32_9 : i32
    scf.if %11 {
      %c0_10 = arith.constant 0 : index
      %c0_11 = arith.constant 0 : index
      %12 = vector.load %arg6[%c0_10, %c0_11] : memref<128x64xf32, #tpu.memory_space<vmem>>, vector<128x64xf32>
      %c0_12 = arith.constant 0 : index
      %c0_13 = arith.constant 0 : index
      %13 = vector.load %arg4[%c0_12, %c0_13] : memref<1x64xf32, #tpu.memory_space<vmem>>, vector<1x64xf32>
      %14 = vector.broadcast %13 : vector<1x64xf32> to vector<128x64xf32>
      %15 = arith.addf %12, %14 : vector<128x64xf32>
      %cst_14 = arith.constant 0.000000e+00 : f32
      %16 = vector.broadcast %cst_14 : f32 to vector<128x64xf32>
      %17 = arith.maximumf %15, %16 : vector<128x64xf32>
      %c0_15 = arith.constant 0 : index
      %c0_16 = arith.constant 0 : index
      %18 = vector.load %arg5[%c0_15, %c0_16] : memref<128x64xf32, #tpu.memory_space<vmem>>, vector<128x64xf32>
      tpu.vector_store %arg5[%c0_15, %c0_16], %17 {strides = array<i32>} : memref<128x64xf32, #tpu.memory_space<vmem>>, vector<128x64xf32>,
    } else {
    }
    return
  }
  func.func @transform_0(%arg0: i32, %arg1: i32) -> (i32, i32) {
    %c0_i32 = arith.constant 0 : i32
    return %arg0, %arg1 : i32, i32
  }
  func.func @transform_1(%arg0: i32, %arg1: i32) -> (i32, i32) {
    %c0_i32 = arith.constant 0 : i32
    %c0_i32_0 = arith.constant 0 : i32
    return %arg1, %c0_i32 : i32, i32
  }
  func.func @transform_2(%arg0: i32, %arg1: i32) -> (i32, i32) {
    %c0_i32 = arith.constant 0 : i32
    %c0_i32_0 = arith.constant 0 : i32
    %c0_i32_1 = arith.constant 0 : i32
    return %c0_i32, %c0_i32_0 : i32, i32
  }
  func.func @transform_3(%arg0: i32, %arg1: i32) -> (i32, i32) {
    %c0_i32 = arith.constant 0 : i32
    %c0_i32_0 = arith.constant 0 : i32
    return %arg0, %c0_i32 : i32, i32
  }
}

module attributes {stable_mosaic.version = 11 : i64} {
  func.func @_matmul_bias_kernel(%arg0: i32, %arg1: i32, %arg2: memref<64x256xf32, #tpu.memory_space<vmem>>, %arg3: memref<256x128xf32, #tpu.memory_space<vmem>>, %arg4: memref<1x128xf32, #tpu.memory_space<vmem>>, %arg5: memref<64x128xf32, #tpu.memory_space<vmem>>, %arg6: memref<64x128xf32, #tpu.memory_space<vmem>>) attributes {dimension_semantics = [#tpu.dimension_semantics<parallel>, #tpu.dimension_semantics<arbitrary>], iteration_bounds = array<i64: 1, 2>, scalar_prefetch = 0 : i64, scratch_operands = 1 : i64, tpu.core_type = #tpu.core_type<tc>, window_params = [{transform_indices = @transform_0, window_bounds = array<i64: 64, 256>}, {transform_indices = @transform_1, window_bounds = array<i64: 256, 128>}, {pipeline_mode = #tpu.pipeline_mode<synchronous>, transform_indices = @transform_2, window_bounds = array<i64: 1, 128>}, {transform_indices = @transform_3, window_bounds = array<i64: 64, 128>}]} {
    %c0_i32 = arith.constant 0 : i32
    %0 = arith.cmpi eq, %arg1, %c0_i32 : i32
    %1 = arith.extui %0 : i1 to i32
    %c0_i32_0 = arith.constant 0 : i32
    %2 = arith.cmpi ne, %1, %c0_i32_0 : i32
    scf.if %2 {
      %cst_9 = arith.constant 0.000000e+00 : f32
      %12 = vector.broadcast %cst_9 : f32 to vector<64x128xf32>
      %c0_10 = arith.constant 0 : index
      %c0_11 = arith.constant 0 : index
      %13 = vector.load %arg6[%c0_10, %c0_11] : memref<64x128xf32, #tpu.memory_space<vmem>>, vector<64x128xf32>
      tpu.vector_store %arg6[%c0_10, %c0_11], %12 {strides = array<i32>} : memref<64x128xf32, #tpu.memory_space<vmem>>, vector<64x128xf32>,
    } else {
    }
    %c0 = arith.constant 0 : index
    %c0_1 = arith.constant 0 : index
    %3 = vector.load %arg6[%c0, %c0_1] : memref<64x128xf32, #tpu.memory_space<vmem>>, vector<64x128xf32>
    %c0_2 = arith.constant 0 : index
    %c0_3 = arith.constant 0 : index
    %4 = vector.load %arg2[%c0_2, %c0_3] : memref<64x256xf32, #tpu.memory_space<vmem>>, vector<64x256xf32>
    %c0_4 = arith.constant 0 : index
    %c0_5 = arith.constant 0 : index
    %5 = vector.load %arg3[%c0_4, %c0_5] : memref<256x128xf32, #tpu.memory_space<vmem>>, vector<256x128xf32>
    %cst = arith.constant dense<0.000000e+00> : vector<64x128xf32>
    %6 = tpu.matmul %4, %5, %cst {dimension_numbers = #tpu.dot_dimension_numbers<[1], [0], [0], [1], [0, 0, 1, 1], [], []>} : vector<64x256xf32>, vector<256x128xf32>, vector<64x128xf32> -> vector<64x128xf32>
    %7 = arith.addf %3, %6 : vector<64x128xf32>
    %c0_6 = arith.constant 0 : index
    %c0_7 = arith.constant 0 : index
    %8 = vector.load %arg6[%c0_6, %c0_7] : memref<64x128xf32, #tpu.memory_space<vmem>>, vector<64x128xf32>
    tpu.vector_store %arg6[%c0_6, %c0_7], %7 {strides = array<i32>} : memref<64x128xf32, #tpu.memory_space<vmem>>, vector<64x128xf32>,
    %c1_i32 = arith.constant 1 : i32
    %9 = arith.cmpi eq, %arg1, %c1_i32 : i32
    %10 = arith.extui %9 : i1 to i32
    %c0_i32_8 = arith.constant 0 : i32
    %11 = arith.cmpi ne, %10, %c0_i32_8 : i32
    scf.if %11 {
      %c0_9 = arith.constant 0 : index
      %c0_10 = arith.constant 0 : index
      %12 = vector.load %arg6[%c0_9, %c0_10] : memref<64x128xf32, #tpu.memory_space<vmem>>, vector<64x128xf32>
      %c0_11 = arith.constant 0 : index
      %c0_12 = arith.constant 0 : index
      %13 = vector.load %arg4[%c0_11, %c0_12] : memref<1x128xf32, #tpu.memory_space<vmem>>, vector<1x128xf32>
      %14 = vector.broadcast %13 : vector<1x128xf32> to vector<64x128xf32>
      %15 = arith.addf %12, %14 : vector<64x128xf32>
      %c0_13 = arith.constant 0 : index
      %c0_14 = arith.constant 0 : index
      %16 = vector.load %arg5[%c0_13, %c0_14] : memref<64x128xf32, #tpu.memory_space<vmem>>, vector<64x128xf32>
      tpu.vector_store %arg5[%c0_13, %c0_14], %15 {strides = array<i32>} : memref<64x128xf32, #tpu.memory_space<vmem>>, vector<64x128xf32>,
    } else {
    }
    return
  }
  func.func @transform_0(%arg0: i32, %arg1: i32) -> (i32, i32) {
    %c0_i32 = arith.constant 0 : i32
    return %arg0, %arg1 : i32, i32
  }
  func.func @transform_1(%arg0: i32, %arg1: i32) -> (i32, i32) {
    %c0_i32 = arith.constant 0 : i32
    %c0_i32_0 = arith.constant 0 : i32
    return %arg1, %c0_i32 : i32, i32
  }
  func.func @transform_2(%arg0: i32, %arg1: i32) -> (i32, i32) {
    %c0_i32 = arith.constant 0 : i32
    %c0_i32_0 = arith.constant 0 : i32
    %c0_i32_1 = arith.constant 0 : i32
    return %c0_i32, %c0_i32_0 : i32, i32
  }
  func.func @transform_3(%arg0: i32, %arg1: i32) -> (i32, i32) {
    %c0_i32 = arith.constant 0 : i32
    %c0_i32_0 = arith.constant 0 : i32
    return %arg0, %c0_i32 : i32, i32
  }
}

module attributes {stable_mosaic.version = 11 : i64} {
  func.func @_lstm_kernel(%arg0: i32, %arg1: memref<1x8x128xf32, #tpu.memory_space<vmem>>, %arg2: memref<32x128xf32, #tpu.memory_space<vmem>>, %arg3: memref<8x32xf32, #tpu.memory_space<vmem>>, %arg4: memref<8x32xf32, #tpu.memory_space<vmem>>, %arg5: memref<8x32xf32, #tpu.memory_space<vmem>>) attributes {dimension_semantics = [#tpu.dimension_semantics<arbitrary>], iteration_bounds = array<i64: 8>, scalar_prefetch = 0 : i64, scratch_operands = 2 : i64, tpu.core_type = #tpu.core_type<tc>, window_params = [{transform_indices = @transform_0, window_bounds = array<i64: 1, 8, 128>}, {pipeline_mode = #tpu.pipeline_mode<synchronous>, transform_indices = @transform_1, window_bounds = array<i64: 32, 128>}, {pipeline_mode = #tpu.pipeline_mode<synchronous>, transform_indices = @transform_2, window_bounds = array<i64: 8, 32>}]} {
    %c0_i32 = arith.constant 0 : i32
    %0 = arith.cmpi eq, %arg0, %c0_i32 : i32
    %1 = arith.extui %0 : i1 to i32
    %c0_i32_0 = arith.constant 0 : i32
    %2 = arith.cmpi ne, %1, %c0_i32_0 : i32
    scf.if %2 {
      %cst_16 = arith.constant 0.000000e+00 : f32
      %28 = vector.broadcast %cst_16 : f32 to vector<8x32xf32>
      %c0_17 = arith.constant 0 : index
      %c0_18 = arith.constant 0 : index
      %29 = vector.load %arg4[%c0_17, %c0_18] : memref<8x32xf32, #tpu.memory_space<vmem>>, vector<8x32xf32>
      tpu.vector_store %arg4[%c0_17, %c0_18], %28 {strides = array<i32>} : memref<8x32xf32, #tpu.memory_space<vmem>>, vector<8x32xf32>,
      %cst_19 = arith.constant 0.000000e+00 : f32
      %30 = vector.broadcast %cst_19 : f32 to vector<8x32xf32>
      %c0_20 = arith.constant 0 : index
      %c0_21 = arith.constant 0 : index
      %31 = vector.load %arg5[%c0_20, %c0_21] : memref<8x32xf32, #tpu.memory_space<vmem>>, vector<8x32xf32>
      tpu.vector_store %arg5[%c0_20, %c0_21], %30 {strides = array<i32>} : memref<8x32xf32, #tpu.memory_space<vmem>>, vector<8x32xf32>,
    } else {
    }
    %c0 = arith.constant 0 : index
    %c0_1 = arith.constant 0 : index
    %c0_2 = arith.constant 0 : index
    %3 = vector.load %arg1[%c0, %c0_1, %c0_2] : memref<1x8x128xf32, #tpu.memory_space<vmem>>, vector<1x8x128xf32>
    %4 = vector.shape_cast %3 : vector<1x8x128xf32> to vector<8x128xf32>
    %c0_3 = arith.constant 0 : index
    %c0_4 = arith.constant 0 : index
    %5 = vector.load %arg4[%c0_3, %c0_4] : memref<8x32xf32, #tpu.memory_space<vmem>>, vector<8x32xf32>
    %c0_5 = arith.constant 0 : index
    %c0_6 = arith.constant 0 : index
    %6 = vector.load %arg2[%c0_5, %c0_6] : memref<32x128xf32, #tpu.memory_space<vmem>>, vector<32x128xf32>
    %cst = arith.constant dense<0.000000e+00> : vector<8x128xf32>
    %7 = tpu.matmul %5, %6, %cst {dimension_numbers = #tpu.dot_dimension_numbers<[1], [0], [0], [1], [0, 0, 1, 1], [], []>} : vector<8x32xf32>, vector<32x128xf32>, vector<8x128xf32> -> vector<8x128xf32>
    %8 = arith.addf %4, %7 : vector<8x128xf32>
    %9 = arith.negf %8 : vector<8x128xf32>
    %10 = math.exp %9 : vector<8x128xf32>
    %cst_7 = arith.constant 1.000000e+00 : f32
    %11 = vector.broadcast %cst_7 : f32 to vector<8x128xf32>
    %12 = arith.addf %11, %10 : vector<8x128xf32>
    %13 = arith.divf %11, %12 : vector<8x128xf32>
    %14 = math.tanh %8 : vector<8x128xf32>
    %15 = vector.extract_strided_slice %13 {offsets = [0, 0], sizes = [8, 32], strides = [1, 1]} : vector<8x128xf32> to vector<8x32xf32>
    %16 = vector.extract_strided_slice %13 {offsets = [0, 32], sizes = [8, 32], strides = [1, 1]} : vector<8x128xf32> to vector<8x32xf32>
    %17 = vector.extract_strided_slice %14 {offsets = [0, 64], sizes = [8, 32], strides = [1, 1]} : vector<8x128xf32> to vector<8x32xf32>
    %18 = vector.extract_strided_slice %13 {offsets = [0, 96], sizes = [8, 32], strides = [1, 1]} : vector<8x128xf32> to vector<8x32xf32>
    %c0_8 = arith.constant 0 : index
    %c0_9 = arith.constant 0 : index
    %19 = vector.load %arg5[%c0_8, %c0_9] : memref<8x32xf32, #tpu.memory_space<vmem>>, vector<8x32xf32>
    %20 = arith.mulf %16, %19 : vector<8x32xf32>
    %21 = arith.mulf %15, %17 : vector<8x32xf32>
    %22 = arith.addf %20, %21 : vector<8x32xf32>
    %23 = math.tanh %22 : vector<8x32xf32>
    %24 = arith.mulf %18, %23 : vector<8x32xf32>
    %c0_10 = arith.constant 0 : index
    %c0_11 = arith.constant 0 : index
    %25 = vector.load %arg5[%c0_10, %c0_11] : memref<8x32xf32, #tpu.memory_space<vmem>>, vector<8x32xf32>
    tpu.vector_store %arg5[%c0_10, %c0_11], %22 {strides = array<i32>} : memref<8x32xf32, #tpu.memory_space<vmem>>, vector<8x32xf32>,
    %c0_12 = arith.constant 0 : index
    %c0_13 = arith.constant 0 : index
    %26 = vector.load %arg4[%c0_12, %c0_13] : memref<8x32xf32, #tpu.memory_space<vmem>>, vector<8x32xf32>
    tpu.vector_store %arg4[%c0_12, %c0_13], %24 {strides = array<i32>} : memref<8x32xf32, #tpu.memory_space<vmem>>, vector<8x32xf32>,
    %c0_14 = arith.constant 0 : index
    %c0_15 = arith.constant 0 : index
    %27 = vector.load %arg3[%c0_14, %c0_15] : memref<8x32xf32, #tpu.memory_space<vmem>>, vector<8x32xf32>
    tpu.vector_store %arg3[%c0_14, %c0_15], %24 {strides = array<i32>} : memref<8x32xf32, #tpu.memory_space<vmem>>, vector<8x32xf32>,
    return
  }
  func.func @transform_0(%arg0: i32) -> (i32, i32, i32) {
    %c0_i32 = arith.constant 0 : i32
    %c0_i32_0 = arith.constant 0 : i32
    %c0_i32_1 = arith.constant 0 : i32
    return %arg0, %c0_i32, %c0_i32_0 : i32, i32, i32
  }
  func.func @transform_1(%arg0: i32) -> (i32, i32) {
    %c0_i32 = arith.constant 0 : i32
    %c0_i32_0 = arith.constant 0 : i32
    %c0_i32_1 = arith.constant 0 : i32
    return %c0_i32, %c0_i32_0 : i32, i32
  }
  func.func @transform_2(%arg0: i32) -> (i32, i32) {
    %c0_i32 = arith.constant 0 : i32
    %c0_i32_0 = arith.constant 0 : i32
    %c0_i32_1 = arith.constant 0 : i32
    return %c0_i32, %c0_i32_0 : i32, i32
  }
}

module attributes {stable_mosaic.version = 11 : i64} {
  func.func @_matmul_bias_kernel(%arg0: i32, %arg1: i32, %arg2: memref<32x216xf32, #tpu.memory_space<vmem>>, %arg3: memref<216x256xf32, #tpu.memory_space<vmem>>, %arg4: memref<1x256xf32, #tpu.memory_space<vmem>>, %arg5: memref<32x256xf32, #tpu.memory_space<vmem>>, %arg6: memref<32x256xf32, #tpu.memory_space<vmem>>) attributes {dimension_semantics = [#tpu.dimension_semantics<parallel>, #tpu.dimension_semantics<arbitrary>], iteration_bounds = array<i64: 1, 1>, scalar_prefetch = 0 : i64, scratch_operands = 1 : i64, tpu.core_type = #tpu.core_type<tc>, window_params = [{transform_indices = @transform_0, window_bounds = array<i64: 32, 216>}, {transform_indices = @transform_1, window_bounds = array<i64: 216, 256>}, {pipeline_mode = #tpu.pipeline_mode<synchronous>, transform_indices = @transform_2, window_bounds = array<i64: 1, 256>}, {transform_indices = @transform_3, window_bounds = array<i64: 32, 256>}]} {
    %c0_i32 = arith.constant 0 : i32
    %0 = arith.cmpi eq, %arg1, %c0_i32 : i32
    %1 = arith.extui %0 : i1 to i32
    %c0_i32_0 = arith.constant 0 : i32
    %2 = arith.cmpi ne, %1, %c0_i32_0 : i32
    scf.if %2 {
      %cst_10 = arith.constant 0.000000e+00 : f32
      %12 = vector.broadcast %cst_10 : f32 to vector<32x256xf32>
      %c0_11 = arith.constant 0 : index
      %c0_12 = arith.constant 0 : index
      %13 = vector.load %arg6[%c0_11, %c0_12] : memref<32x256xf32, #tpu.memory_space<vmem>>, vector<32x256xf32>
      tpu.vector_store %arg6[%c0_11, %c0_12], %12 {strides = array<i32>} : memref<32x256xf32, #tpu.memory_space<vmem>>, vector<32x256xf32>,
    } else {
    }
    %c0 = arith.constant 0 : index
    %c0_1 = arith.constant 0 : index
    %3 = vector.load %arg6[%c0, %c0_1] : memref<32x256xf32, #tpu.memory_space<vmem>>, vector<32x256xf32>
    %c0_2 = arith.constant 0 : index
    %c0_3 = arith.constant 0 : index
    %4 = vector.load %arg2[%c0_2, %c0_3] : memref<32x216xf32, #tpu.memory_space<vmem>>, vector<32x216xf32>
    %c0_4 = arith.constant 0 : index
    %c0_5 = arith.constant 0 : index
    %5 = vector.load %arg3[%c0_4, %c0_5] : memref<216x256xf32, #tpu.memory_space<vmem>>, vector<216x256xf32>
    %cst = arith.constant dense<0.000000e+00> : vector<32x256xf32>
    %6 = tpu.matmul %4, %5, %cst {dimension_numbers = #tpu.dot_dimension_numbers<[1], [0], [0], [1], [0, 0, 1, 1], [], []>} : vector<32x216xf32>, vector<216x256xf32>, vector<32x256xf32> -> vector<32x256xf32>
    %7 = arith.addf %3, %6 : vector<32x256xf32>
    %c0_6 = arith.constant 0 : index
    %c0_7 = arith.constant 0 : index
    %8 = vector.load %arg6[%c0_6, %c0_7] : memref<32x256xf32, #tpu.memory_space<vmem>>, vector<32x256xf32>
    tpu.vector_store %arg6[%c0_6, %c0_7], %7 {strides = array<i32>} : memref<32x256xf32, #tpu.memory_space<vmem>>, vector<32x256xf32>,
    %c0_i32_8 = arith.constant 0 : i32
    %9 = arith.cmpi eq, %arg1, %c0_i32_8 : i32
    %10 = arith.extui %9 : i1 to i32
    %c0_i32_9 = arith.constant 0 : i32
    %11 = arith.cmpi ne, %10, %c0_i32_9 : i32
    scf.if %11 {
      %c0_10 = arith.constant 0 : index
      %c0_11 = arith.constant 0 : index
      %12 = vector.load %arg6[%c0_10, %c0_11] : memref<32x256xf32, #tpu.memory_space<vmem>>, vector<32x256xf32>
      %c0_12 = arith.constant 0 : index
      %c0_13 = arith.constant 0 : index
      %13 = vector.load %arg4[%c0_12, %c0_13] : memref<1x256xf32, #tpu.memory_space<vmem>>, vector<1x256xf32>
      %14 = vector.broadcast %13 : vector<1x256xf32> to vector<32x256xf32>
      %15 = arith.addf %12, %14 : vector<32x256xf32>
      %cst_14 = arith.constant 0.000000e+00 : f32
      %16 = vector.broadcast %cst_14 : f32 to vector<32x256xf32>
      %17 = arith.maximumf %15, %16 : vector<32x256xf32>
      %c0_15 = arith.constant 0 : index
      %c0_16 = arith.constant 0 : index
      %18 = vector.load %arg5[%c0_15, %c0_16] : memref<32x256xf32, #tpu.memory_space<vmem>>, vector<32x256xf32>
      tpu.vector_store %arg5[%c0_15, %c0_16], %17 {strides = array<i32>} : memref<32x256xf32, #tpu.memory_space<vmem>>, vector<32x256xf32>,
    } else {
    }
    return
  }
  func.func @transform_0(%arg0: i32, %arg1: i32) -> (i32, i32) {
    %c0_i32 = arith.constant 0 : i32
    return %arg0, %arg1 : i32, i32
  }
  func.func @transform_1(%arg0: i32, %arg1: i32) -> (i32, i32) {
    %c0_i32 = arith.constant 0 : i32
    %c0_i32_0 = arith.constant 0 : i32
    return %arg1, %c0_i32 : i32, i32
  }
  func.func @transform_2(%arg0: i32, %arg1: i32) -> (i32, i32) {
    %c0_i32 = arith.constant 0 : i32
    %c0_i32_0 = arith.constant 0 : i32
    %c0_i32_1 = arith.constant 0 : i32
    return %c0_i32, %c0_i32_0 : i32, i32
  }
  func.func @transform_3(%arg0: i32, %arg1: i32) -> (i32, i32) {
    %c0_i32 = arith.constant 0 : i32
    %c0_i32_0 = arith.constant 0 : i32
    return %arg0, %c0_i32 : i32, i32
  }
}

module attributes {stable_mosaic.version = 11 : i64} {
  func.func @_matmul_bias_kernel(%arg0: i32, %arg1: i32, %arg2: memref<16x864xf32, #tpu.memory_space<vmem>>, %arg3: memref<864x128xf32, #tpu.memory_space<vmem>>, %arg4: memref<1x128xf32, #tpu.memory_space<vmem>>, %arg5: memref<16x128xf32, #tpu.memory_space<vmem>>, %arg6: memref<16x128xf32, #tpu.memory_space<vmem>>) attributes {dimension_semantics = [#tpu.dimension_semantics<parallel>, #tpu.dimension_semantics<arbitrary>], iteration_bounds = array<i64: 1, 1>, scalar_prefetch = 0 : i64, scratch_operands = 1 : i64, tpu.core_type = #tpu.core_type<tc>, window_params = [{transform_indices = @transform_0, window_bounds = array<i64: 16, 864>}, {transform_indices = @transform_1, window_bounds = array<i64: 864, 128>}, {pipeline_mode = #tpu.pipeline_mode<synchronous>, transform_indices = @transform_2, window_bounds = array<i64: 1, 128>}, {transform_indices = @transform_3, window_bounds = array<i64: 16, 128>}]} {
    %c0_i32 = arith.constant 0 : i32
    %0 = arith.cmpi eq, %arg1, %c0_i32 : i32
    %1 = arith.extui %0 : i1 to i32
    %c0_i32_0 = arith.constant 0 : i32
    %2 = arith.cmpi ne, %1, %c0_i32_0 : i32
    scf.if %2 {
      %cst_10 = arith.constant 0.000000e+00 : f32
      %12 = vector.broadcast %cst_10 : f32 to vector<16x128xf32>
      %c0_11 = arith.constant 0 : index
      %c0_12 = arith.constant 0 : index
      %13 = vector.load %arg6[%c0_11, %c0_12] : memref<16x128xf32, #tpu.memory_space<vmem>>, vector<16x128xf32>
      tpu.vector_store %arg6[%c0_11, %c0_12], %12 {strides = array<i32>} : memref<16x128xf32, #tpu.memory_space<vmem>>, vector<16x128xf32>,
    } else {
    }
    %c0 = arith.constant 0 : index
    %c0_1 = arith.constant 0 : index
    %3 = vector.load %arg6[%c0, %c0_1] : memref<16x128xf32, #tpu.memory_space<vmem>>, vector<16x128xf32>
    %c0_2 = arith.constant 0 : index
    %c0_3 = arith.constant 0 : index
    %4 = vector.load %arg2[%c0_2, %c0_3] : memref<16x864xf32, #tpu.memory_space<vmem>>, vector<16x864xf32>
    %c0_4 = arith.constant 0 : index
    %c0_5 = arith.constant 0 : index
    %5 = vector.load %arg3[%c0_4, %c0_5] : memref<864x128xf32, #tpu.memory_space<vmem>>, vector<864x128xf32>
    %cst = arith.constant dense<0.000000e+00> : vector<16x128xf32>
    %6 = tpu.matmul %4, %5, %cst {dimension_numbers = #tpu.dot_dimension_numbers<[1], [0], [0], [1], [0, 0, 1, 1], [], []>} : vector<16x864xf32>, vector<864x128xf32>, vector<16x128xf32> -> vector<16x128xf32>
    %7 = arith.addf %3, %6 : vector<16x128xf32>
    %c0_6 = arith.constant 0 : index
    %c0_7 = arith.constant 0 : index
    %8 = vector.load %arg6[%c0_6, %c0_7] : memref<16x128xf32, #tpu.memory_space<vmem>>, vector<16x128xf32>
    tpu.vector_store %arg6[%c0_6, %c0_7], %7 {strides = array<i32>} : memref<16x128xf32, #tpu.memory_space<vmem>>, vector<16x128xf32>,
    %c0_i32_8 = arith.constant 0 : i32
    %9 = arith.cmpi eq, %arg1, %c0_i32_8 : i32
    %10 = arith.extui %9 : i1 to i32
    %c0_i32_9 = arith.constant 0 : i32
    %11 = arith.cmpi ne, %10, %c0_i32_9 : i32
    scf.if %11 {
      %c0_10 = arith.constant 0 : index
      %c0_11 = arith.constant 0 : index
      %12 = vector.load %arg6[%c0_10, %c0_11] : memref<16x128xf32, #tpu.memory_space<vmem>>, vector<16x128xf32>
      %c0_12 = arith.constant 0 : index
      %c0_13 = arith.constant 0 : index
      %13 = vector.load %arg4[%c0_12, %c0_13] : memref<1x128xf32, #tpu.memory_space<vmem>>, vector<1x128xf32>
      %14 = vector.broadcast %13 : vector<1x128xf32> to vector<16x128xf32>
      %15 = arith.addf %12, %14 : vector<16x128xf32>
      %cst_14 = arith.constant 0.000000e+00 : f32
      %16 = vector.broadcast %cst_14 : f32 to vector<16x128xf32>
      %17 = arith.maximumf %15, %16 : vector<16x128xf32>
      %c0_15 = arith.constant 0 : index
      %c0_16 = arith.constant 0 : index
      %18 = vector.load %arg5[%c0_15, %c0_16] : memref<16x128xf32, #tpu.memory_space<vmem>>, vector<16x128xf32>
      tpu.vector_store %arg5[%c0_15, %c0_16], %17 {strides = array<i32>} : memref<16x128xf32, #tpu.memory_space<vmem>>, vector<16x128xf32>,
    } else {
    }
    return
  }
  func.func @transform_0(%arg0: i32, %arg1: i32) -> (i32, i32) {
    %c0_i32 = arith.constant 0 : i32
    return %arg0, %arg1 : i32, i32
  }
  func.func @transform_1(%arg0: i32, %arg1: i32) -> (i32, i32) {
    %c0_i32 = arith.constant 0 : i32
    %c0_i32_0 = arith.constant 0 : i32
    return %arg1, %c0_i32 : i32, i32
  }
  func.func @transform_2(%arg0: i32, %arg1: i32) -> (i32, i32) {
    %c0_i32 = arith.constant 0 : i32
    %c0_i32_0 = arith.constant 0 : i32
    %c0_i32_1 = arith.constant 0 : i32
    return %c0_i32, %c0_i32_0 : i32, i32
  }
  func.func @transform_3(%arg0: i32, %arg1: i32) -> (i32, i32) {
    %c0_i32 = arith.constant 0 : i32
    %c0_i32_0 = arith.constant 0 : i32
    return %arg0, %c0_i32 : i32, i32
  }
}

module attributes {stable_mosaic.version = 11 : i64} {
  func.func @_fc_head_kernel(%arg0: i32, %arg1: memref<2x1152xf32, #tpu.memory_space<vmem>>, %arg2: memref<1152x128xf32, #tpu.memory_space<vmem>>, %arg3: memref<1x128xf32, #tpu.memory_space<vmem>>, %arg4: memref<128x4xf32, #tpu.memory_space<vmem>>, %arg5: memref<1x4xf32, #tpu.memory_space<vmem>>, %arg6: memref<2x4xf32, #tpu.memory_space<vmem>>) attributes {dimension_semantics = [#tpu.dimension_semantics<parallel>], iteration_bounds = array<i64: 1>, scalar_prefetch = 0 : i64, scratch_operands = 0 : i64, tpu.core_type = #tpu.core_type<tc>, window_params = [{transform_indices = @transform_0, window_bounds = array<i64: 2, 1152>}, {pipeline_mode = #tpu.pipeline_mode<synchronous>, transform_indices = @transform_1, window_bounds = array<i64: 1152, 128>}, {pipeline_mode = #tpu.pipeline_mode<synchronous>, transform_indices = @transform_2, window_bounds = array<i64: 1, 128>}, {pipeline_mode = #tpu.pipeline_mode<synchronous>, transform_indices = @transform_3, window_bounds = array<i64: 128, 4>}, {pipeline_mode = #tpu.pipeline_mode<synchronous>, transform_indices = @transform_4, window_bounds = array<i64: 1, 4>}, {transform_indices = @transform_5, window_bounds = array<i64: 2, 4>}]} {
    %c0 = arith.constant 0 : index
    %c0_0 = arith.constant 0 : index
    %0 = vector.load %arg1[%c0, %c0_0] : memref<2x1152xf32, #tpu.memory_space<vmem>>, vector<2x1152xf32>
    %c0_1 = arith.constant 0 : index
    %c0_2 = arith.constant 0 : index
    %1 = vector.load %arg2[%c0_1, %c0_2] : memref<1152x128xf32, #tpu.memory_space<vmem>>, vector<1152x128xf32>
    %cst = arith.constant dense<0.000000e+00> : vector<2x128xf32>
    %2 = tpu.matmul %0, %1, %cst {dimension_numbers = #tpu.dot_dimension_numbers<[1], [0], [0], [1], [0, 0, 1, 1], [], []>} : vector<2x1152xf32>, vector<1152x128xf32>, vector<2x128xf32> -> vector<2x128xf32>
    %c0_3 = arith.constant 0 : index
    %c0_4 = arith.constant 0 : index
    %3 = vector.load %arg3[%c0_3, %c0_4] : memref<1x128xf32, #tpu.memory_space<vmem>>, vector<1x128xf32>
    %4 = vector.broadcast %3 : vector<1x128xf32> to vector<2x128xf32>
    %5 = arith.addf %2, %4 : vector<2x128xf32>
    %cst_5 = arith.constant 0.000000e+00 : f32
    %6 = vector.broadcast %cst_5 : f32 to vector<2x128xf32>
    %7 = arith.maximumf %5, %6 : vector<2x128xf32>
    %c0_6 = arith.constant 0 : index
    %c0_7 = arith.constant 0 : index
    %8 = vector.load %arg4[%c0_6, %c0_7] : memref<128x4xf32, #tpu.memory_space<vmem>>, vector<128x4xf32>
    %cst_8 = arith.constant dense<0.000000e+00> : vector<2x4xf32>
    %9 = tpu.matmul %7, %8, %cst_8 {dimension_numbers = #tpu.dot_dimension_numbers<[1], [0], [0], [1], [0, 0, 1, 1], [], []>} : vector<2x128xf32>, vector<128x4xf32>, vector<2x4xf32> -> vector<2x4xf32>
    %c0_9 = arith.constant 0 : index
    %c0_10 = arith.constant 0 : index
    %10 = vector.load %arg5[%c0_9, %c0_10] : memref<1x4xf32, #tpu.memory_space<vmem>>, vector<1x4xf32>
    %11 = vector.broadcast %10 : vector<1x4xf32> to vector<2x4xf32>
    %12 = arith.addf %9, %11 : vector<2x4xf32>
    %c0_11 = arith.constant 0 : index
    %c0_12 = arith.constant 0 : index
    %13 = vector.load %arg6[%c0_11, %c0_12] : memref<2x4xf32, #tpu.memory_space<vmem>>, vector<2x4xf32>
    tpu.vector_store %arg6[%c0_11, %c0_12], %12 {strides = array<i32>} : memref<2x4xf32, #tpu.memory_space<vmem>>, vector<2x4xf32>,
    return
  }
  func.func @transform_0(%arg0: i32) -> (i32, i32) {
    %c0_i32 = arith.constant 0 : i32
    %c0_i32_0 = arith.constant 0 : i32
    return %arg0, %c0_i32 : i32, i32
  }
  func.func @transform_1(%arg0: i32) -> (i32, i32) {
    %c0_i32 = arith.constant 0 : i32
    %c0_i32_0 = arith.constant 0 : i32
    %c0_i32_1 = arith.constant 0 : i32
    return %c0_i32, %c0_i32_0 : i32, i32
  }
  func.func @transform_2(%arg0: i32) -> (i32, i32) {
    %c0_i32 = arith.constant 0 : i32
    %c0_i32_0 = arith.constant 0 : i32
    %c0_i32_1 = arith.constant 0 : i32
    return %c0_i32, %c0_i32_0 : i32, i32
  }
  func.func @transform_3(%arg0: i32) -> (i32, i32) {
    %c0_i32 = arith.constant 0 : i32
    %c0_i32_0 = arith.constant 0 : i32
    %c0_i32_1 = arith.constant 0 : i32
    return %c0_i32, %c0_i32_0 : i32, i32
  }
  func.func @transform_4(%arg0: i32) -> (i32, i32) {
    %c0_i32 = arith.constant 0 : i32
    %c0_i32_0 = arith.constant 0 : i32
    %c0_i32_1 = arith.constant 0 : i32
    return %c0_i32, %c0_i32_0 : i32, i32
  }
  func.func @transform_5(%arg0: i32) -> (i32, i32) {
    %c0_i32 = arith.constant 0 : i32
    %c0_i32_0 = arith.constant 0 : i32
    return %arg0, %c0_i32 : i32, i32
  }
}

</mosaic_0001>

<bundles_post_ra>
// kernel: i2a_forward.8
= control target key start
LH: loop header
LB: loop body
LE: loop exit
PB: predicated region body
PF: predicated region fallthrough
CT: control target
= control target key end

     0   :  { %s880_s12 = smov 0   ;;  %s882_s13 = smov 0   ;;  %s1188_s0 = inlined_call_operand.vmem [shape: f32[512,216], index: 0, kind: input, shape index: {}]   ;;  %s1189_s1 = inlined_call_operand.vmem [shape: f32[216,64], index: 1, kind: input, shape index: {}]   ;;  %s1190_s2 = inlined_call_operand.vmem [shape: f32[1,64], index: 2, kind: input, shape index: {}]   ;;  %s1191_s3 = inlined_call_operand.vmem [shape: f32[512,64], index: 3, kind: output, shape index: {}]  }
   0x1   :  { %s884_s14 = smov 0  }
   0x2 LB: > { %s25_s15 = sadd.s32 1, %s852_s13  ;;  %p715_p0 = scmp.ge.s32.totalorder %s856_s14, 1  ;;  %s856_s14 = sphi %s884_s14, %s13_s14   ;;  %s852_s13 = sphi %s882_s13, %s1194_s13   ;;  %s848_s12 = sphi %s880_s12, %s1193_s12  }
   0x3   : > { %p27_p1 = scmp.ge.s32.totalorder %s25_s15, 4  ;;  %p169_p2 = scmp.lt.s32.totalorder %s856_s14, 5 }
   0x5   : > { %s1196_s15 = smov (%p27_p1, %s25_s15), 0  ;;  %p170_p3 = pnand %p715_p0, %p169_p2 }
   0x6   : > { %v296_v0 = vld [vmem:[%s1189_s1] sm:$0xff] (!%p170_p3)  ;;  %v297_v1 = vld [vmem:[%s1189_s1 + $0x8] sm:$0xff] (!%p170_p3)  ;;  %v298_v2 = vld [vmem:[%s1189_s1 + $0x10] sm:$0xff] (!%p170_p3)  ;;  %s716_s22 = sshll.u32 (!%p170_p3), %s848_s12, 4  ;;  %v858_v3 = vmov (!%p170_p3), 0.0|0.0   ;;  %vm231_vm0 = vcmask (!%p170_p3), 523264  }
   0x7   : > { %173 = sbr.rel (%p170_p3) target bundleno = 318 (0x13e), region = 32  ;;  %741 = vmatprep.subr.bf16.mxu0 (!%p170_p3), %v858_v3  ;;  %780 = vmatprep.subr.bf16.mxu1 (!%p170_p3), %v858_v3  ;;  %v742_v4 = vpack.c.bf16 (!%p170_p3), %v297_v1, %v296_v0  ;;  %v299_v5 = vld [vmem:[%s1189_s1 + $0x18] sm:$0xff] (!%p170_p3)  ;;  %p915_p4 = scmp.lt.s32.totalorder (!%p170_p3), %s716_s22, 63  ;;  %v859_v6 = vmov (!%p170_p3), 0.0   ;;  %v300_v8 = vld [vmem:[%s1189_s1 + $0x20] sm:$0xff] (!%p170_p3)  ;;  %v301_v9 = vld [vmem:[%s1189_s1 + $0x28] sm:$0xff] (!%p170_p3) }
   0x8   : > { %232 = vst.msk [vmem:[#allocation2] sm:$0xff] (!%p170_p3), %vm231_vm0, %v859_v6  ;;  %233 = vst.msk [vmem:[#allocation2 + $0x8] sm:$0xff] (!%p170_p3), %vm231_vm0, %v859_v6  ;;  %v745_v7 = vpack.c.bf16 (!%p170_p3), %v299_v5, %v298_v2  ;;  %v748_v10 = vpack.c.bf16 (!%p170_p3), %v301_v9, %v300_v8  ;;  %vm323_vm1 = vcmask (!%p170_p3), 719872   ;;  %v302_v11 = vld [vmem:[%s1189_s1 + $0x30] sm:$0xff] (!%p170_p3)  ;;  %v303_v12 = vld [vmem:[%s1189_s1 + $0x38] sm:$0xff] (!%p170_p3) }
   0x9   : > { %234 = vst.msk [vmem:[#allocation2 + $0x10] sm:$0xff] (!%p170_p3), %vm231_vm0, %v859_v6  ;;  %235 = vst.msk [vmem:[#allocation2 + $0x18] sm:$0xff] (!%p170_p3), %vm231_vm0, %v859_v6  ;;  %743 = vmatpush1.bf16.msra.mxu0 (!%p170_p3), %v742_v4  ;;  %794 = vmatpush1.bf16.msra.mxu1 (!%p170_p3), %v742_v4  ;;  %v751_v15 = vpack.c.bf16 (!%p170_p3), %v303_v12, %v302_v11  ;;  %v304_v16 = vld [vmem:[%s1189_s1 + $0x40] sm:$0xff] (!%p170_p3)  ;;  %v305_v17 = vld [vmem:[%s1189_s1 + $0x48] sm:$0xff] (!%p170_p3) }
   0xa   : > { %236 = vst.msk [vmem:[#allocation2 + $0x20] sm:$0xff] (!%p170_p3), %vm231_vm0, %v859_v6  ;;  %237 = vst.msk [vmem:[#allocation2 + $0x28] sm:$0xff] (!%p170_p3), %vm231_vm0, %v859_v6  ;;  %744 = vmatprep.subr.bf16.mxu0 (!%p170_p3), %v858_v3  ;;  %781 = vmatprep.subr.bf16.mxu1 (!%p170_p3), %v858_v3  ;;  %v754_v18 = vpack.c.bf16 (!%p170_p3), %v305_v17, %v304_v16  ;;  %v306_v19 = vld [vmem:[%s1189_s1 + $0x50] sm:$0xff] (!%p170_p3)  ;;  %v307_v20 = vld [vmem:[%s1189_s1 + $0x58] sm:$0xff] (!%p170_p3) }
   0xb   : > { %238 = vst.msk [vmem:[#allocation2 + $0x30] sm:$0xff] (!%p170_p3), %vm231_vm0, %v859_v6  ;;  %239 = vst.msk [vmem:[#allocation2 + $0x38] sm:$0xff] (!%p170_p3), %vm231_vm0, %v859_v6  ;;  %v757_v21 = vpack.c.bf16 (!%p170_p3), %v307_v20, %v306_v19  ;;  %v308_v22 = vld [vmem:[%s1189_s1 + $0x60] sm:$0xff] (!%p170_p3)  ;;  %v309_v23 = vld [vmem:[%s1189_s1 + $0x68] sm:$0xff] (!%p170_p3) }
   0xc   : > { %240 = vst.msk [vmem:[#allocation2 + $0x40] sm:$0xff] (!%p170_p3), %vm231_vm0, %v859_v6  ;;  %241 = vst.msk [vmem:[#allocation2 + $0x48] sm:$0xff] (!%p170_p3), %vm231_vm0, %v859_v6  ;;  %v760_v24 = vpack.c.bf16 (!%p170_p3), %v309_v23, %v308_v22  ;;  %v310_v25 = vld [vmem:[%s1189_s1 + $0x70] sm:$0xff] (!%p170_p3)  ;;  %v311_v26 = vld [vmem:[%s1189_s1 + $0x78] sm:$0xff] (!%p170_p3) }
   0xd   : > { %242 = vst.msk [vmem:[#allocation2 + $0x50] sm:$0xff] (!%p170_p3), %vm231_vm0, %v859_v6  ;;  %243 = vst.msk [vmem:[#allocation2 + $0x58] sm:$0xff] (!%p170_p3), %vm231_vm0, %v859_v6  ;;  %746 = vmatpush1.bf16.msra.mxu0 (!%p170_p3), %v745_v7  ;;  %795 = vmatpush1.bf16.msra.mxu1 (!%p170_p3), %v745_v7  ;;  %v763_v27 = vpack.c.bf16 (!%p170_p3), %v311_v26, %v310_v25  ;;  %v312_v28 = vld [vmem:[%s1189_s1 + $0x80] sm:$0xff] (!%p170_p3)  ;;  %v313_v29 = vld [vmem:[%s1189_s1 + $0x88] sm:$0xff] (!%p170_p3) }
   0xe   : > { %244 = vst.msk [vmem:[#allocation2 + $0x60] sm:$0xff] %vm231_vm0, %v859_v6  ;;  %245 = vst.msk [vmem:[#allocation2 + $0x68] sm:$0xff] %vm231_vm0, %v859_v6  ;;  %s1198_s22 = smov (!%p915_p4, %s716_s22), 63  ;;  %747 = vmatprep.subr.bf16.mxu0 %v858_v3  ;;  %782 = vmatprep.subr.bf16.mxu1 %v858_v3  ;;  %v766_v30 = vpack.c.bf16 %v313_v29, %v312_v28  ;;  %v314_v31 = vld [vmem:[%s1189_s1 + $0x90] sm:$0xff]  ;;  %v315_v32 = vld [vmem:[%s1189_s1 + $0x98] sm:$0xff] }
   0xf   : > { %246 = vst.msk [vmem:[#allocation2 + $0x70] sm:$0xff] %vm231_vm0, %v859_v6  ;;  %247 = vst.msk [vmem:[#allocation2 + $0x78] sm:$0xff] %vm231_vm0, %v859_v6  ;;  %s740_s30 = sshll.u32 %s1198_s22, 4  ;;  %v769_v33 = vpack.c.bf16 %v315_v32, %v314_v31  ;;  %v316_v34 = vld [vmem:[%s1189_s1 + $0xa0] sm:$0xff]  ;;  %v317_v35 = vld [vmem:[%s1189_s1 + $0xa8] sm:$0xff]  ;;  %s720_s5 = sshll.u32 %s1198_s22, 3 }
  0x10   : > { %s967_s6 = scalar_lea.vmem %s1188_s0, %s740_s30  ;;  %v772_v36 = vpack.c.bf16 %v317_v35, %v316_v34  ;;  %v318_v37 = vld [vmem:[%s1189_s1 + $0xb0] sm:$0xff]  ;;  %v319_v38 = vld [vmem:[%s1189_s1 + $0xb8] sm:$0xff]  ;;  %v320_v40 = vld [vmem:[%s1189_s1 + $0xc0] sm:$0xff]  ;;  %s1121_s22 = scalar_lea.vmem %s1191_s3, %s720_s5 }
  0x11   : > { %v265_v13 = vld [vmem:[%s967_s6 + $0x8] sm:$0xff]  ;;  %749 = vmatpush1.bf16.msra.mxu0 %v748_v10  ;;  %796 = vmatpush1.bf16.msra.mxu1 %v748_v10  ;;  %v775_v39 = vpack.c.bf16 %v319_v38, %v318_v37  ;;  %v322_v43 = vld [vmem:[%s1189_s1 + $0xd0] sm:$0xff]  ;;  %v264_v44 = vld [vmem:[%s967_s6] sm:$0xff] }
  0x12   : > { %v281_v14 = vld [vmem:[%s967_s6 + $0x88] sm:$0xff]  ;;  %721 = vmatprep.mubr.msk.f32.mxu0 %vm323_vm1, %v265_v13  ;;  %750 = vmatprep.subr.bf16.mxu0 %v858_v3  ;;  %v280_v45 = vld [vmem:[%s967_s6 + $0x80] sm:$0xff]  ;;  %v267_v46 = vld [vmem:[%s967_s6 + $0x18] sm:$0xff] }
  0x13   : > { %729 = vmatprep.mubr.msk.f32.mxu1 %vm323_vm1, %v281_v14  ;;  %783 = vmatprep.subr.bf16.mxu1 %v858_v3  ;;  %v321_v41 = vld [vmem:[%s1189_s1 + $0xc8] sm:$0xff]  ;;  %v283_v47 = vld [vmem:[%s967_s6 + $0x98] sm:$0xff]  ;;  %v266_v48 = vld [vmem:[%s967_s6 + $0x10] sm:$0xff] }
  0x14   : > { %v778_v42 = vpack.c.bf16 %v321_v41, %v320_v40  ;;  %v282_v49 = vld [vmem:[%s967_s6 + $0x90] sm:$0xff]  ;;  %v269_v50 = vld [vmem:[%s967_s6 + $0x28] sm:$0xff]  ;;  %v268_v52 = vld [vmem:[%s967_s6 + $0x20] sm:$0xff] }
  0x15   : > { %752 = vmatpush1.bf16.msra.mxu0 %v751_v15  ;;  %797 = vmatpush1.bf16.msra.mxu1 %v751_v15  ;;  %v285_v51 = vld [vmem:[%s967_s6 + $0xa8] sm:$0xff]  ;;  %v284_v53 = vld [vmem:[%s967_s6 + $0xa0] sm:$0xff]  ;;  %v271_v54 = vld [vmem:[%s967_s6 + $0x38] sm:$0xff] }
  0x16   : > { %753 = vmatprep.subr.bf16.mxu0 %v858_v3  ;;  %784 = vmatprep.subr.bf16.mxu1 %v858_v3  ;;  %v287_v55 = vld [vmem:[%s967_s6 + $0xb8] sm:$0xff]  ;;  %v270_v56 = vld [vmem:[%s967_s6 + $0x30] sm:$0xff]  ;;  %v273_v58 = vld [vmem:[%s967_s6 + $0x48] sm:$0xff] }
  0x17   : > { %v286_v57 = vld [vmem:[%s967_s6 + $0xb0] sm:$0xff]  ;;  %v289_v59 = vld [vmem:[%s967_s6 + $0xc8] sm:$0xff]  ;;  %v272_v60 = vld [vmem:[%s967_s6 + $0x40] sm:$0xff] }
  0x18   : > { %v288_v61 = vld [vmem:[%s967_s6 + $0xc0] sm:$0xff]  ;;  %v275_v62 = vld [vmem:[%s967_s6 + $0x58] sm:$0xff]  ;;  %v274_v0 = vld [vmem:[%s967_s6 + $0x50] sm:$0xff] }
  0x19   : > { %755 = vmatpush1.bf16.msra.mxu0 %v754_v18  ;;  %798 = vmatpush1.bf16.msra.mxu1 %v754_v18  ;;  %v291_v63 = vld [vmem:[%s967_s6 + $0xd8] sm:$0xff]  ;;  %v290_v1 = vld [vmem:[%s967_s6 + $0xd0] sm:$0xff]  ;;  %v277_v2 = vld [vmem:[%s967_s6 + $0x68] sm:$0xff] }
  0x1a   : > { %756 = vmatprep.subr.bf16.mxu0 %v858_v3  ;;  %785 = vmatprep.subr.bf16.mxu1 %v858_v3  ;;  %v276_v4 = vld [vmem:[%s967_s6 + $0x60] sm:$0xff]  ;;  %v295_v7 = vld [vmem:[%s967_s6 + $0xf8] sm:$0xff]  ;;  %v278_v8 = vld [vmem:[%s967_s6 + $0x70] sm:$0xff] }
  0x1b   : > { %v292_v5 = vld [vmem:[%s967_s6 + $0xe0] sm:$0xff]  ;;  %v294_v9 = vld [vmem:[%s967_s6 + $0xf0] sm:$0xff]  ;;  %v249_v18 = vld [vmem:[#allocation2 + $0x8] sm:$0xff] }
  0x1c   : > { %v248_v10 = vld [vmem:[#allocation2] sm:$0xff]  ;;  %v257_v19 = vld [vmem:[#allocation2 + $0x48] sm:$0xff]  ;;  %v250_v26 = vld [vmem:[#allocation2 + $0x10] sm:$0xff] }
  0x1d   : > { %758 = vmatpush1.bf16.msra.mxu0 %v757_v21  ;;  %799 = vmatpush1.bf16.msra.mxu1 %v757_v21  ;;  %v256_v11 = vld [vmem:[#allocation2 + $0x40] sm:$0xff]  ;;  %v251_v35 = vld [vmem:[#allocation2 + $0x18] sm:$0xff] }
  0x1e   : > { %759 = vmatprep.subr.bf16.mxu0 %v858_v3  ;;  %786 = vmatprep.subr.bf16.mxu1 %v858_v3  ;;  %v1111_v28 = vld [vmem:[%s1190_s2] ss:$0 sm:$0xff]  ;;  %v259_v38 = vld [vmem:[#allocation2 + $0x58] sm:$0xff] }
  0x21   : > { %761 = vmatpush1.bf16.msra.mxu0 %v760_v24  ;;  %800 = vmatpush1.bf16.msra.mxu1 %v760_v24 }
  0x22   : > { %762 = vmatprep.subr.bf16.mxu0 %v858_v3  ;;  %787 = vmatprep.subr.bf16.mxu1 %v858_v3 }
  0x25   : > { %764 = vmatpush1.bf16.msra.mxu0 %v763_v27  ;;  %801 = vmatpush1.bf16.msra.mxu1 %v763_v27  ;;  %v258_v27 = vld [vmem:[#allocation2 + $0x50] sm:$0xff] }
  0x26   : > { %765 = vmatprep.subr.bf16.mxu0 %v858_v3  ;;  %788 = vmatprep.subr.bf16.mxu1 %v858_v3 }
  0x29   : > { %767 = vmatpush1.bf16.msra.mxu0 %v766_v30  ;;  %802 = vmatpush1.bf16.msra.mxu1 %v766_v30 }
  0x2a   : > { %768 = vmatprep.subr.bf16.mxu0 %v858_v3  ;;  %789 = vmatprep.subr.bf16.mxu1 %v858_v3 }
  0x2d   : > { %770 = vmatpush1.bf16.msra.mxu0 %v769_v33  ;;  %803 = vmatpush1.bf16.msra.mxu1 %v769_v33 }
  0x2e   : > { %771 = vmatprep.subr.bf16.mxu0 %v858_v3  ;;  %790 = vmatprep.subr.bf16.mxu1 %v858_v3 }
  0x31   : > { %773 = vmatpush1.bf16.msra.mxu0 %v772_v36  ;;  %804 = vmatpush1.bf16.msra.mxu1 %v772_v36 }
  0x32   : > { %774 = vmatprep.subr.bf16.mxu0 %v858_v3  ;;  %791 = vmatprep.subr.bf16.mxu1 %v858_v3 }
  0x35   : > { %776 = vmatpush1.bf16.msra.mxu0 %v775_v39  ;;  %805 = vmatpush1.bf16.msra.mxu1 %v775_v39 }
  0x36   : > { %777 = vmatprep.subr.bf16.mxu0 %v858_v3  ;;  %792 = vmatprep.subr.bf16.mxu1 %v858_v3  ;;  %v293_v3 = vld [vmem:[%s967_s6 + $0xe8] sm:$0xff] }
  0x39   : > { %779 = vmatpush1.bf16.msra.mxu0 %v778_v42  ;;  %806 = vmatpush1.bf16.msra.mxu1 %v778_v42 }
  0x3a   : > { %424 = vmatprep.subr.mxu0 %v859_v6  ;;  %793 = vmatprep.subr.mxu1 %v859_v6  ;;  %v279_v6 = vld [vmem:[%s967_s6 + $0x78] sm:$0xff] }
  0x3d   : > { %425 = vmatpush1.msra.mxu0 %v322_v43  ;;  %807 = vmatpush1.msra.mxu1 %v322_v43 }
  0x3e   : > { %437 = vmatmul.mubr.f32.vlgmr.msra.gmra.mrb[0].mxu0 %v264_v44  ;;  %477 = vmatmul.mubr.f32.vlgmr.msra.gmra.mrb[0].mxu1 %v280_v45 }
  0x3f   : > { %722 = vmatprep.mubr.msk.f32.mxu0 %vm323_vm1, %v267_v46  ;;  %730 = vmatprep.mubr.msk.f32.mxu1 %vm323_vm1, %v283_v47 }
  0x42   : > { %442 = vmatmul.mubr.f32.gmra.mrb[2].mxu0 %v266_v48  ;;  %482 = vmatmul.mubr.f32.gmra.mrb[2].mxu1 %v282_v49  ;;  %v252_v49 = vld [vmem:[#allocation2 + $0x20] sm:$0xff] }
  0x43   : > { %723 = vmatprep.mubr.msk.f32.mxu0 %vm323_vm1, %v269_v50  ;;  %731 = vmatprep.mubr.msk.f32.mxu1 %vm323_vm1, %v285_v51 }
  0x46   : > { %447 = vmatmul.mubr.f32.gmra.mrb[4].mxu0 %v268_v52  ;;  %487 = vmatmul.mubr.f32.gmra.mrb[4].mxu1 %v284_v53  ;;  %v260_v52 = vld [vmem:[#allocation2 + $0x60] sm:$0xff] }
  0x47   : > { %724 = vmatprep.mubr.msk.f32.mxu0 %vm323_vm1, %v271_v54  ;;  %732 = vmatprep.mubr.msk.f32.mxu1 %vm323_vm1, %v287_v55 }
  0x4a   : > { %452 = vmatmul.mubr.f32.gmra.mrb[6].mxu0 %v270_v56  ;;  %492 = vmatmul.mubr.f32.gmra.mrb[6].mxu1 %v286_v57 }
  0x4b   : > { %725 = vmatprep.mubr.msk.f32.mxu0 %vm323_vm1, %v273_v58  ;;  %733 = vmatprep.mubr.msk.f32.mxu1 %vm323_vm1, %v289_v59 }
  0x4e   : > { %457 = vmatmul.mubr.f32.gmra.mrb[8].mxu0 %v272_v60  ;;  %497 = vmatmul.mubr.f32.gmra.mrb[8].mxu1 %v288_v61 }
  0x4f   : > { %726 = vmatprep.mubr.msk.f32.mxu0 %vm323_vm1, %v275_v62  ;;  %734 = vmatprep.mubr.msk.f32.mxu1 %vm323_vm1, %v291_v63  ;;  %v253_v63 = vld [vmem:[#allocation2 + $0x28] sm:$0xff] }
  0x52   : > { %462 = vmatmul.mubr.f32.gmra.mrb[10].mxu0 %v274_v0  ;;  %502 = vmatmul.mubr.f32.gmra.mrb[10].mxu1 %v290_v1 }
  0x53   : > { %727 = vmatprep.mubr.msk.f32.mxu0 %vm323_vm1, %v277_v2  ;;  %735 = vmatprep.mubr.msk.f32.mxu1 %vm323_vm1, %v293_v3  ;;  %v261_v2 = vld [vmem:[#allocation2 + $0x68] sm:$0xff] }
  0x56   : > { %467 = vmatmul.mubr.f32.gmra.mrb[12].mxu0 %v276_v4  ;;  %507 = vmatmul.mubr.f32.gmra.mrb[12].mxu1 %v292_v5 }
  0x57   : > { %728 = vmatprep.mubr.msk.f32.mxu0 %vm323_vm1, %v279_v6  ;;  %736 = vmatprep.mubr.msk.f32.mxu1 %vm323_vm1, %v295_v7 }
  0x5a   : > { %472 = vmatmul.mubr.f32.gmra.mrb[14].mxu0 %v278_v8  ;;  %512 = vmatmul.mubr.f32.gmra.mrb[14].mxu1 %v294_v9 }
 0x111   : > { %v438_v12 = vpop.f32.mrb[0].mxu0  ;;  %v478_v13 = vpop.f32.mrb[0].mxu1 }
 0x112   : > { %v517_v14 = vadd.f32 %v438_v12, %v248_v10  ;;  %v525_v15 = vadd.f32 %v478_v13, %v256_v11  ;;  %v440_v16 = vpop.f32.mrb[1].mxu0  ;;  %v480_v17 = vpop.f32.mrb[1].mxu1  ;;  %v254_v13 = vld [vmem:[#allocation2 + $0x30] sm:$0xff] }
 0x113   : > { %v262_v16 = vld [vmem:[#allocation2 + $0x70] sm:$0xff] }
 0x114   : > { %534 = vst.msk [vmem:[#allocation2] sm:$0xff] %vm231_vm0, %v517_v14  ;;  %542 = vst.msk [vmem:[#allocation2 + $0x40] sm:$0xff] %vm231_vm0, %v525_v15 }
 0x115   : > { %v443_v20 = vpop.f32.mrb[2].mxu0  ;;  %v483_v21 = vpop.f32.mrb[2].mxu1 }
 0x116   : > { %v518_v22 = vadd.f32 %v443_v20, %v249_v18  ;;  %v526_v23 = vadd.f32 %v483_v21, %v257_v19  ;;  %v445_v24 = vpop.f32.mrb[3].mxu0  ;;  %v485_v25 = vpop.f32.mrb[3].mxu1 }
 0x118   : > { %535 = vst.msk [vmem:[#allocation2 + $0x8] sm:$0xff] %vm231_vm0, %v518_v22  ;;  %543 = vst.msk [vmem:[#allocation2 + $0x48] sm:$0xff] %vm231_vm0, %v526_v23 }
 0x119   : > { %v448_v29 = vpop.f32.mrb[4].mxu0  ;;  %v488_v30 = vpop.f32.mrb[4].mxu1 }
 0x11a   : > { %v519_v31 = vadd.f32 %v448_v29, %v250_v26  ;;  %v527_v32 = vadd.f32 %v488_v30, %v258_v27  ;;  %v450_v33 = vpop.f32.mrb[5].mxu0  ;;  %v490_v34 = vpop.f32.mrb[5].mxu1  ;;  %v255_v27 = vld [vmem:[#allocation2 + $0x38] sm:$0xff] }
 0x11b   : > { %v553_v36 = vld [vmem:[#allocation2] sm:$0xff] }
 0x11c   : > { %v561_v37 = vld [vmem:[#allocation2 + $0x40] sm:$0xff]  ;;  %v576_v39 = vadd.f32 %v1111_v28, %v553_v36  ;;  %536 = vst.msk [vmem:[#allocation2 + $0x10] sm:$0xff] %vm231_vm0, %v519_v31  ;;  %544 = vst.msk [vmem:[#allocation2 + $0x50] sm:$0xff] %vm231_vm0, %v527_v32  ;;  %v263_v31 = vld [vmem:[#allocation2 + $0x78] sm:$0xff] }
 0x11d   : > { %v584_v40 = vadd.f32 %v1111_v28, %v561_v37  ;;  %v453_v41 = vpop.f32.mrb[6].mxu0  ;;  %v493_v42 = vpop.f32.mrb[6].mxu1 }
 0x11e   : > { %v592_v43 = vmax.f32 %v576_v39, 0.0  ;;  %v520_v45 = vadd.f32 %v453_v41, %v251_v35  ;;  %v528_v46 = vadd.f32 %v493_v42, %v259_v38  ;;  %v455_v47 = vpop.f32.mrb[7].mxu0  ;;  %v495_v48 = vpop.f32.mrb[7].mxu1 }
 0x11f   : > { %v600_v44 = vmax.f32 %v584_v40, 0.0  ;;  %v554_v50 = vld [vmem:[#allocation2 + $0x8] sm:$0xff] }
 0x120   : > { %v562_v51 = vld [vmem:[#allocation2 + $0x48] sm:$0xff]  ;;  %608 = vst.msk [vmem:[%s1121_s22] sm:$0xff] %vm231_vm0, %v592_v43  ;;  %v577_v53 = vadd.f32 %v1111_v28, %v554_v50  ;;  %537 = vst.msk [vmem:[#allocation2 + $0x18] sm:$0xff] %vm231_vm0, %v520_v45 }
 0x121   : > { %616 = vst.msk [vmem:[%s1121_s22 + $0x40] sm:$0xff] %vm231_vm0, %v600_v44  ;;  %v585_v54 = vadd.f32 %v1111_v28, %v562_v51  ;;  %545 = vst.msk [vmem:[#allocation2 + $0x58] sm:$0xff] %vm231_vm0, %v528_v46  ;;  %v458_v55 = vpop.f32.mrb[8].mxu0  ;;  %v498_v56 = vpop.f32.mrb[8].mxu1 }
 0x122   : > { %v593_v57 = vmax.f32 %v577_v53, 0.0  ;;  %v521_v59 = vadd.f32 %v458_v55, %v252_v49  ;;  %v529_v60 = vadd.f32 %v498_v56, %v260_v52  ;;  %v460_v61 = vpop.f32.mrb[9].mxu0  ;;  %v500_v62 = vpop.f32.mrb[9].mxu1 }
 0x123   : > { %v601_v58 = vmax.f32 %v585_v54, 0.0  ;;  %v555_v0 = vld [vmem:[#allocation2 + $0x10] sm:$0xff] }
 0x124   : > { %v563_v1 = vld [vmem:[#allocation2 + $0x50] sm:$0xff]  ;;  %609 = vst.msk [vmem:[%s1121_s22 + $0x8] sm:$0xff] %vm231_vm0, %v593_v57  ;;  %v578_v3 = vadd.f32 %v1111_v28, %v555_v0  ;;  %538 = vst.msk [vmem:[#allocation2 + $0x20] sm:$0xff] %vm231_vm0, %v521_v59 }
 0x125   : > { %617 = vst.msk [vmem:[%s1121_s22 + $0x48] sm:$0xff] %vm231_vm0, %v601_v58  ;;  %v586_v4 = vadd.f32 %v1111_v28, %v563_v1  ;;  %546 = vst.msk [vmem:[#allocation2 + $0x60] sm:$0xff] %vm231_vm0, %v529_v60  ;;  %v463_v5 = vpop.f32.mrb[10].mxu0  ;;  %v503_v6 = vpop.f32.mrb[10].mxu1 }
 0x126   : > { %v594_v7 = vmax.f32 %v578_v3, 0.0  ;;  %v522_v9 = vadd.f32 %v463_v5, %v253_v63  ;;  %v530_v10 = vadd.f32 %v503_v6, %v261_v2  ;;  %v465_v11 = vpop.f32.mrb[11].mxu0  ;;  %v505_v12 = vpop.f32.mrb[11].mxu1 }
 0x127   : > { %v602_v8 = vmax.f32 %v586_v4, 0.0  ;;  %v556_v14 = vld [vmem:[#allocation2 + $0x18] sm:$0xff] }
 0x128   : > { %v564_v15 = vld [vmem:[#allocation2 + $0x58] sm:$0xff]  ;;  %610 = vst.msk [vmem:[%s1121_s22 + $0x10] sm:$0xff] %vm231_vm0, %v594_v7  ;;  %v579_v17 = vadd.f32 %v1111_v28, %v556_v14  ;;  %539 = vst.msk [vmem:[#allocation2 + $0x28] sm:$0xff] %vm231_vm0, %v522_v9 }
 0x129   : > { %618 = vst.msk [vmem:[%s1121_s22 + $0x50] sm:$0xff] %vm231_vm0, %v602_v8  ;;  %v587_v18 = vadd.f32 %v1111_v28, %v564_v15  ;;  %547 = vst.msk [vmem:[#allocation2 + $0x68] sm:$0xff] %vm231_vm0, %v530_v10  ;;  %v468_v19 = vpop.f32.mrb[12].mxu0  ;;  %v508_v20 = vpop.f32.mrb[12].mxu1 }
 0x12a   : > { %v595_v21 = vmax.f32 %v579_v17, 0.0  ;;  %v523_v23 = vadd.f32 %v468_v19, %v254_v13  ;;  %v531_v24 = vadd.f32 %v508_v20, %v262_v16  ;;  %v470_v25 = vpop.f32.mrb[13].mxu0  ;;  %v510_v26 = vpop.f32.mrb[13].mxu1 }
 0x12b   : > { %v603_v22 = vmax.f32 %v587_v18, 0.0  ;;  %v557_v29 = vld [vmem:[#allocation2 + $0x20] sm:$0xff] }
 0x12c   : > { %v565_v30 = vld [vmem:[#allocation2 + $0x60] sm:$0xff]  ;;  %611 = vst.msk [vmem:[%s1121_s22 + $0x18] sm:$0xff] %vm231_vm0, %v595_v21  ;;  %v580_v32 = vadd.f32 %v1111_v28, %v557_v29  ;;  %540 = vst.msk [vmem:[#allocation2 + $0x30] sm:$0xff] %vm231_vm0, %v523_v23 }
 0x12d   : > { %619 = vst.msk [vmem:[%s1121_s22 + $0x58] sm:$0xff] %vm231_vm0, %v603_v22  ;;  %v588_v33 = vadd.f32 %v1111_v28, %v565_v30  ;;  %548 = vst.msk [vmem:[#allocation2 + $0x70] sm:$0xff] %vm231_vm0, %v531_v24  ;;  %v473_v34 = vpop.f32.mrb[14].mxu0  ;;  %v513_v35 = vpop.f32.mrb[14].mxu1 }
 0x12e   : > { %v596_v36 = vmax.f32 %v580_v32, 0.0  ;;  %v524_v38 = vadd.f32 %v473_v34, %v255_v27  ;;  %v532_v39 = vadd.f32 %v513_v35, %v263_v31  ;;  %v475_v40 = vpop.f32.mrb[15].mxu0  ;;  %v515_v41 = vpop.f32.mrb[15].mxu1 }
 0x12f   : > { %v604_v37 = vmax.f32 %v588_v33, 0.0  ;;  %v558_v42 = vld [vmem:[#allocation2 + $0x28] sm:$0xff] }
 0x130   : > { %v566_v43 = vld [vmem:[#allocation2 + $0x68] sm:$0xff]  ;;  %612 = vst.msk [vmem:[%s1121_s22 + $0x20] sm:$0xff] %vm231_vm0, %v596_v36  ;;  %v581_v44 = vadd.f32 %v1111_v28, %v558_v42  ;;  %541 = vst.msk [vmem:[#allocation2 + $0x38] sm:$0xff] %vm231_vm0, %v524_v38 }
 0x131   : > { %620 = vst.msk [vmem:[%s1121_s22 + $0x60] sm:$0xff] %vm231_vm0, %v604_v37  ;;  %v589_v45 = vadd.f32 %v1111_v28, %v566_v43  ;;  %549 = vst.msk [vmem:[#allocation2 + $0x78] sm:$0xff] %vm231_vm0, %v532_v39 }
 0x132   : > { %v597_v46 = vmax.f32 %v581_v44, 0.0 }
 0x133   : > { %v605_v47 = vmax.f32 %v589_v45, 0.0  ;;  %v559_v48 = vld [vmem:[#allocation2 + $0x30] sm:$0xff] }
 0x134   : > { %v567_v49 = vld [vmem:[#allocation2 + $0x70] sm:$0xff]  ;;  %613 = vst.msk [vmem:[%s1121_s22 + $0x28] sm:$0xff] %vm231_vm0, %v597_v46  ;;  %v582_v50 = vadd.f32 %v1111_v28, %v559_v48 }
 0x135   : > { %621 = vst.msk [vmem:[%s1121_s22 + $0x68] sm:$0xff] %vm231_vm0, %v605_v47  ;;  %v590_v51 = vadd.f32 %v1111_v28, %v567_v49 }
 0x136   : > { %v598_v52 = vmax.f32 %v582_v50, 0.0 }
 0x137   : > { %v606_v53 = vmax.f32 %v590_v51, 0.0  ;;  %v560_v54 = vld [vmem:[#allocation2 + $0x38] sm:$0xff] }
 0x138   : > { %v568_v55 = vld [vmem:[#allocation2 + $0x78] sm:$0xff]  ;;  %614 = vst.msk [vmem:[%s1121_s22 + $0x30] sm:$0xff] %vm231_vm0, %v598_v52  ;;  %v583_v56 = vadd.f32 %v1111_v28, %v560_v54 }
 0x139   : > { %622 = vst.msk [vmem:[%s1121_s22 + $0x70] sm:$0xff] %vm231_vm0, %v606_v53  ;;  %v591_v57 = vadd.f32 %v1111_v28, %v568_v55 }
 0x13a   : > { %v599_v58 = vmax.f32 %v583_v56, 0.0 }
 0x13b   : > { %v607_v59 = vmax.f32 %v591_v57, 0.0 }
 0x13c   : > { %615 = vst.msk [vmem:[%s1121_s22 + $0x38] sm:$0xff] %vm231_vm0, %v599_v58 }
 0x13d   : > { %623 = vst.msk [vmem:[%s1121_s22 + $0x78] sm:$0xff] %vm231_vm0, %v607_v59 }
 0x13e PF: > { %s13_s14 = sadd.s32 1, %s856_s14   ;;  %s1193_s12 = smov %s852_s13 }
 0x13f   : > { %p10_p5 = scmp.ge.s32.totalorder %s13_s14, 6   ;;  %s1194_s13 = smov %s1196_s15 }
 0x141   :  { %12 = sbr.rel (!%p10_p5) target bundleno = 2 (0x2), region = 73 }

// kernel: i2a_forward.9
= control target key start
LH: loop header
LB: loop body
LE: loop exit
PB: predicated region body
PF: predicated region fallthrough
CT: control target
= control target key end

     0   :  { %s794_s12 = smov 0   ;;  %s796_s13 = smov 0   ;;  %s958_s0 = inlined_call_operand.vmem [shape: f32[64,512], index: 0, kind: input, shape index: {}]   ;;  %s959_s1 = inlined_call_operand.vmem [shape: f32[512,128], index: 1, kind: input, shape index: {}]   ;;  %s960_s2 = inlined_call_operand.vmem [shape: f32[1,128], index: 2, kind: input, shape index: {}]   ;;  %s961_s3 = inlined_call_operand.vmem [shape: f32[64,128], index: 3, kind: output, shape index: {}]  }
   0x1   :  { %s798_s14 = smov 0   ;;  %s800_s15 = smov 0  }
   0x2   :  { %s802_s16 = smov 0  }
   0x3 LB: > { %s22_s17 = sadd.s32 1, %s767_s15  ;;  %p41_p1 = scmp.ne.s32.totalorder %s759_s13, %s755_s12  ;;  %s771_s16 = sphi %s802_s16, %s13_s16   ;;  %s767_s15 = sphi %s800_s15, %s965_s15   ;;  %s763_s14 = sphi %s798_s14, %s964_s14   ;;  %s759_s13 = sphi %s796_s13, %s963_s13   ;;  %s755_s12 = sphi %s794_s12, %s962_s12  }
   0x4   : > { %p23_p0 = scmp.ge.s32.totalorder %s22_s17, 2  ;;  %p42_p2 = scmp.eq.s32.totalorder %s771_s16, 0 }
   0x5   : > { %s34_s19 = sadd.s32 1, %s759_s13  ;;  %p572_p5 = scmp.ge.s32.totalorder %s771_s16, 2 }
   0x6   : > { %s967_s17 = smov (%p23_p0, %s22_s17), 0  ;;  %p43_p3 = por %p42_p2, %p41_p1 }
   0x7   : > { %s30_s18 = ssub.s32 %s767_s15, %s967_s17  ;;  %143 = sbr.rel (%p572_p5) target bundleno = 26 (0x1a), region = 20 }
   0x8   : > { %p32_p4 = scmp.eq.s32.totalorder %s30_s18, 0 }
   0xa   : > { %s829_s20 = scalar_select %p32_p4, %s759_s13, %s34_s19  }
   0xe   : > { %146 = sbr.rel (!%p43_p3) target bundleno = 26 (0x1a), region = 24  ;;  %s148_s21 = sand.u32 (%p43_p3), 1, %s759_s13  }
   0xf   : > { %s587_s22 = sshll.u32 (%p43_p3), %s767_s15, 4  ;;  %s573_s23 = sshll.u32 (%p43_p3), %s148_s21, 7 }
  0x10   : > { %s837_s26 = scalar_lea.vmem (%p43_p3), %s958_s0, %s587_s22  ;;  %s150_s27 = scalar_lea.vmem (%p43_p3), [#allocation3], %s573_s23 }
  0x11   : > { %v169_v0 = vld [vmem:[%s837_s26] sm:$0xff] (%p43_p3)  ;;  %v171_v1 = vld [vmem:[%s837_s26 + $0x8] sm:$0xff] (%p43_p3) }
  0x12   : > { %v173_v2 = vld [vmem:[%s837_s26 + $0x20] sm:$0xff] (%p43_p3)  ;;  %170 = vst [vmem:[%s150_s27] sm:$0xff] (%p43_p3), %v169_v0  ;;  %172 = vst [vmem:[%s150_s27 + $0x8] sm:$0xff] (%p43_p3), %v171_v1  ;;  %v175_v3 = vld [vmem:[%s837_s26 + $0x28] sm:$0xff] (%p43_p3) }
  0x13   : > { %174 = vst [vmem:[%s150_s27 + $0x10] sm:$0xff] (%p43_p3), %v173_v2  ;;  %v177_v4 = vld [vmem:[%s837_s26 + $0x40] sm:$0xff] (%p43_p3)  ;;  %v179_v5 = vld [vmem:[%s837_s26 + $0x48] sm:$0xff] (%p43_p3)  ;;  %176 = vst [vmem:[%s150_s27 + $0x18] sm:$0xff] (%p43_p3), %v175_v3 }
  0x14   : > { %178 = vst [vmem:[%s150_s27 + $0x20] sm:$0xff] (%p43_p3), %v177_v4  ;;  %180 = vst [vmem:[%s150_s27 + $0x28] sm:$0xff] (%p43_p3), %v179_v5  ;;  %v181_v6 = vld [vmem:[%s837_s26 + $0x60] sm:$0xff] (%p43_p3)  ;;  %v183_v7 = vld [vmem:[%s837_s26 + $0x68] sm:$0xff] (%p43_p3) }
  0x15   : > { %v185_v8 = vld [vmem:[%s837_s26 + $0x80] sm:$0xff]  ;;  %182 = vst [vmem:[%s150_s27 + $0x30] sm:$0xff] %v181_v6  ;;  %184 = vst [vmem:[%s150_s27 + $0x38] sm:$0xff] %v183_v7  ;;  %v187_v9 = vld [vmem:[%s837_s26 + $0x88] sm:$0xff] }
  0x16   : > { %186 = vst [vmem:[%s150_s27 + $0x40] sm:$0xff] %v185_v8  ;;  %v189_v10 = vld [vmem:[%s837_s26 + $0xa0] sm:$0xff]  ;;  %v191_v11 = vld [vmem:[%s837_s26 + $0xa8] sm:$0xff]  ;;  %188 = vst [vmem:[%s150_s27 + $0x48] sm:$0xff] %v187_v9 }
  0x17   : > { %190 = vst [vmem:[%s150_s27 + $0x50] sm:$0xff] %v189_v10  ;;  %192 = vst [vmem:[%s150_s27 + $0x58] sm:$0xff] %v191_v11  ;;  %v193_v12 = vld [vmem:[%s837_s26 + $0xc0] sm:$0xff]  ;;  %v195_v13 = vld [vmem:[%s837_s26 + $0xc8] sm:$0xff] }
  0x18   : > { %v197_v14 = vld [vmem:[%s837_s26 + $0xe0] sm:$0xff]  ;;  %194 = vst [vmem:[%s150_s27 + $0x60] sm:$0xff] %v193_v12  ;;  %196 = vst [vmem:[%s150_s27 + $0x68] sm:$0xff] %v195_v13  ;;  %v199_v15 = vld [vmem:[%s837_s26 + $0xe8] sm:$0xff] }
  0x19   : > { %198 = vst [vmem:[%s150_s27 + $0x70] sm:$0xff] %v197_v14  ;;  %200 = vst [vmem:[%s150_s27 + $0x78] sm:$0xff] %v199_v15 }
  0x1a PF: > { %p576_p6 = scmp.ge.s32.totalorder %s771_s16, 1  ;;  %p214_p7 = scmp.lt.s32.totalorder %s771_s16, 3 }
  0x1c   : > { %p215_p8 = pnand %p576_p6, %p214_p7 }
  0x1d   : > { %s221_s28 = sand.u32 (!%p215_p8), 1, %s755_s12   ;;  %s578_s29 = sshll.u32 (!%p215_p8), %s763_s14, 5 }
  0x1e   : > { %218 = sbr.rel (%p215_p8) target bundleno = 320 (0x140), region = 51  ;;  %s577_s30 = sshll.u32 (!%p215_p8), %s221_s28, 7 }
  0x1f   : > { %p252_p9 = scmp.lt.s32.totalorder (!%p215_p8), %s578_s29, 63  ;;  %s864_s8 = scalar_lea.vmem (!%p215_p8), [#allocation3], %s577_s30 }
  0x20   : > { %p580_p10 = scmp.ne.s32.totalorder (!%p215_p8), %s763_s14, 0 }
  0x25   : > { %s969_s29 = smov (!%p252_p9, %s578_s29), 63  ;;  %266 = sbr.rel (%p580_p10) target bundleno = 44 (0x2c), region = 59 }
  0x26   : > { %s579_s4 = sshll.u32 %s969_s29, 3  ;;  %v773_v16 = vmov (!%p580_p10), 0.0  }
  0x27   : > { %s862_s7 = scalar_lea.vmem %s959_s1, %s579_s4  ;;  %267 = vst [vmem:[#allocation2] sm:$0xff] (!%p580_p10), %v773_v16  ;;  %268 = vst [vmem:[#allocation2 + $0x8] sm:$0xff] (!%p580_p10), %v773_v16 }
  0x28   : > { %269 = vst [vmem:[#allocation2 + $0x10] sm:$0xff] (!%p580_p10), %v773_v16  ;;  %270 = vst [vmem:[#allocation2 + $0x18] sm:$0xff] (!%p580_p10), %v773_v16 }
  0x29   : > { %271 = vst [vmem:[#allocation2 + $0x20] sm:$0xff] (!%p580_p10), %v773_v16  ;;  %272 = vst [vmem:[#allocation2 + $0x28] sm:$0xff] (!%p580_p10), %v773_v16 }
  0x2a   : > { %273 = vst [vmem:[#allocation2 + $0x30] sm:$0xff] (!%p580_p10), %v773_v16  ;;  %274 = vst [vmem:[#allocation2 + $0x38] sm:$0xff] (!%p580_p10), %v773_v16 }
  0x2c PF: > { %v315_v17 = vld [vmem:[%s862_s7 + $0x80] sm:$0xff]  ;;  %v316_v18 = vld [vmem:[%s862_s7 + $0x88] sm:$0xff]  ;;  %v317_v22 = vld [vmem:[%s862_s7 + $0x90] sm:$0xff]  ;;  %p581_p11 = scmp.ne.s32.totalorder %s763_s14, 1 }
  0x2d   : > { %v299_v19 = vld [vmem:[%s862_s7] sm:$0xff]  ;;  %v644_v20 = vpack.c.bf16 %v316_v18, %v315_v17  ;;  %v300_v21 = vld [vmem:[%s862_s7 + $0x8] sm:$0xff]  ;;  %v318_v23 = vld [vmem:[%s862_s7 + $0x98] sm:$0xff] }
  0x2e   : > { %v646_v24 = vpack.c.bf16 %v300_v21, %v299_v19  ;;  %v648_v25 = vpack.c.bf16 %v318_v23, %v317_v22  ;;  %v301_v26 = vld [vmem:[%s862_s7 + $0x10] sm:$0xff]  ;;  %v302_v27 = vld [vmem:[%s862_s7 + $0x18] sm:$0xff]  ;;  %v319_v28 = vld [vmem:[%s862_s7 + $0xa0] sm:$0xff] }
  0x2f   : > { %645 = vmatprep.subr.bf16.mxu0 %v644_v20  ;;  %676 = vmatprep.subr.bf16.mxu1 %v644_v20  ;;  %v320_v29 = vld [vmem:[%s862_s7 + $0xa8] sm:$0xff]  ;;  %v650_v30 = vpack.c.bf16 %v302_v27, %v301_v26  ;;  %v303_v32 = vld [vmem:[%s862_s7 + $0x20] sm:$0xff]  ;;  %v321_v34 = vld [vmem:[%s862_s7 + $0xb0] sm:$0xff] }
  0x30   : > { %647 = vmatpush3.bf16.msra.mxu0 %v646_v24  ;;  %684 = vmatpush3.bf16.msra.mxu1 %v646_v24  ;;  %v652_v31 = vpack.c.bf16 %v320_v29, %v319_v28  ;;  %v304_v33 = vld [vmem:[%s862_s7 + $0x28] sm:$0xff]  ;;  %v322_v35 = vld [vmem:[%s862_s7 + $0xb8] sm:$0xff]  ;;  %v305_v38 = vld [vmem:[%s862_s7 + $0x30] sm:$0xff] }
  0x31   : > { %649 = vmatprep.subr.bf16.mxu0 %v648_v25  ;;  %677 = vmatprep.subr.bf16.mxu1 %v648_v25  ;;  %v654_v36 = vpack.c.bf16 %v304_v33, %v303_v32  ;;  %v656_v37 = vpack.c.bf16 %v322_v35, %v321_v34  ;;  %v306_v39 = vld [vmem:[%s862_s7 + $0x38] sm:$0xff]  ;;  %v323_v40 = vld [vmem:[%s862_s7 + $0xc0] sm:$0xff]  ;;  %v324_v41 = vld [vmem:[%s862_s7 + $0xc8] sm:$0xff] }
  0x32   : > { %v284_v42 = vld [vmem:[%s864_s8 + $0x8] sm:$0xff]  ;;  %v658_v44 = vpack.c.bf16 %v306_v39, %v305_v38  ;;  %v660_v45 = vpack.c.bf16 %v324_v41, %v323_v40  ;;  %v307_v46 = vld [vmem:[%s862_s7 + $0x40] sm:$0xff]  ;;  %v325_v48 = vld [vmem:[%s862_s7 + $0xd0] sm:$0xff] }
  0x33   : > { %395 = vmatprep.mubr.f32.mxu0 %v284_v42  ;;  %v292_v43 = vld [vmem:[%s864_s8 + $0x48] sm:$0xff]  ;;  %v326_v49 = vld [vmem:[%s862_s7 + $0xd8] sm:$0xff]  ;;  %v309_v52 = vld [vmem:[%s862_s7 + $0x50] sm:$0xff] }
  0x34   : > { %651 = vmatpush3.bf16.msra.mxu0 %v650_v30  ;;  %685 = vmatpush3.bf16.msra.mxu1 %v650_v30  ;;  %v308_v47 = vld [vmem:[%s862_s7 + $0x48] sm:$0xff]  ;;  %v664_v51 = vpack.c.bf16 %v326_v49, %v325_v48  ;;  %v310_v53 = vld [vmem:[%s862_s7 + $0x58] sm:$0xff]  ;;  %v327_v54 = vld [vmem:[%s862_s7 + $0xe0] sm:$0xff] }
  0x35   : > { %653 = vmatprep.subr.bf16.mxu0 %v652_v31  ;;  %678 = vmatprep.subr.bf16.mxu1 %v652_v31  ;;  %v662_v50 = vpack.c.bf16 %v308_v47, %v307_v46  ;;  %v328_v55 = vld [vmem:[%s862_s7 + $0xe8] sm:$0xff]  ;;  %v666_v56 = vpack.c.bf16 %v310_v53, %v309_v52  ;;  %v311_v58 = vld [vmem:[%s862_s7 + $0x60] sm:$0xff]  ;;  %v329_v60 = vld [vmem:[%s862_s7 + $0xf0] sm:$0xff] }
  0x36   : > { %415 = vmatprep.mubr.f32.mxu1 %v292_v43  ;;  %v668_v57 = vpack.c.bf16 %v328_v55, %v327_v54  ;;  %v312_v59 = vld [vmem:[%s862_s7 + $0x68] sm:$0xff]  ;;  %v330_v61 = vld [vmem:[%s862_s7 + $0xf8] sm:$0xff]  ;;  %v313_v0 = vld [vmem:[%s862_s7 + $0x70] sm:$0xff] }
  0x37   : > { %v670_v62 = vpack.c.bf16 %v312_v59, %v311_v58  ;;  %v672_v63 = vpack.c.bf16 %v330_v61, %v329_v60  ;;  %v314_v1 = vld [vmem:[%s862_s7 + $0x78] sm:$0xff]  ;;  %v283_v3 = vld [vmem:[%s864_s8] sm:$0xff]  ;;  %v285_v7 = vld [vmem:[%s864_s8 + $0x10] sm:$0xff] }
  0x38   : > { %655 = vmatpush3.bf16.msra.mxu0 %v654_v36  ;;  %686 = vmatpush3.bf16.msra.mxu1 %v654_v36  ;;  %v674_v2 = vpack.c.bf16 %v314_v1, %v313_v0  ;;  %v291_v4 = vld [vmem:[%s864_s8 + $0x40] sm:$0xff]  ;;  %v286_v5 = vld [vmem:[%s864_s8 + $0x18] sm:$0xff]  ;;  %v293_v8 = vld [vmem:[%s864_s8 + $0x50] sm:$0xff] }
  0x39   : > { %657 = vmatprep.subr.bf16.mxu0 %v656_v37  ;;  %679 = vmatprep.subr.bf16.mxu1 %v656_v37  ;;  %v294_v6 = vld [vmem:[%s864_s8 + $0x58] sm:$0xff]  ;;  %v288_v9 = vld [vmem:[%s864_s8 + $0x28] sm:$0xff]  ;;  %v287_v11 = vld [vmem:[%s864_s8 + $0x20] sm:$0xff] }
  0x3a   : > { %v296_v10 = vld [vmem:[%s864_s8 + $0x68] sm:$0xff]  ;;  %v295_v12 = vld [vmem:[%s864_s8 + $0x60] sm:$0xff]  ;;  %v290_v13 = vld [vmem:[%s864_s8 + $0x38] sm:$0xff] }
  0x3b   : > { %v298_v14 = vld [vmem:[%s864_s8 + $0x78] sm:$0xff]  ;;  %v289_v15 = vld [vmem:[%s864_s8 + $0x30] sm:$0xff]  ;;  %v275_v19 = vld [vmem:[#allocation2] sm:$0xff] }
  0x3c   : > { %659 = vmatpush3.bf16.msra.mxu0 %v658_v44  ;;  %687 = vmatpush3.bf16.msra.mxu1 %v658_v44  ;;  %v297_v16 = vld [vmem:[%s864_s8 + $0x70] sm:$0xff]  ;;  %v279_v21 = vld [vmem:[#allocation2 + $0x20] sm:$0xff]  ;;  %v276_v29 = vld [vmem:[#allocation2 + $0x8] sm:$0xff] }
  0x3d   : > { %661 = vmatprep.subr.bf16.mxu0 %v660_v45  ;;  %680 = vmatprep.subr.bf16.mxu1 %v660_v45  ;;  %v280_v31 = vld [vmem:[#allocation2 + $0x28] sm:$0xff]  ;;  %v277_v39 = vld [vmem:[#allocation2 + $0x10] sm:$0xff]  ;;  %v278_v49 = vld [vmem:[#allocation2 + $0x18] sm:$0xff] }
  0x3e   : > { %v281_v41 = vld [vmem:[#allocation2 + $0x30] sm:$0xff]  ;;  %v582_v58 = vld [vmem:[%s960_s2] ss:$0 sm:$0xff] (!%p581_p11) }
  0x40   : > { %663 = vmatpush3.bf16.msra.mxu0 %v662_v50  ;;  %688 = vmatpush3.bf16.msra.mxu1 %v662_v50 }
  0x41   : > { %665 = vmatprep.subr.bf16.mxu0 %v664_v51  ;;  %681 = vmatprep.subr.bf16.mxu1 %v664_v51  ;;  %v282_v51 = vld [vmem:[#allocation2 + $0x38] sm:$0xff] }
  0x44   : > { %667 = vmatpush3.bf16.msra.mxu0 %v666_v56  ;;  %689 = vmatpush3.bf16.msra.mxu1 %v666_v56 }
  0x45   : > { %669 = vmatprep.subr.bf16.mxu0 %v668_v57  ;;  %682 = vmatprep.subr.bf16.mxu1 %v668_v57 }
  0x48   : > { %671 = vmatpush3.bf16.msra.mxu0 %v670_v62  ;;  %690 = vmatpush3.bf16.msra.mxu1 %v670_v62 }
  0x49   : > { %673 = vmatprep.subr.bf16.mxu0 %v672_v63  ;;  %683 = vmatprep.subr.bf16.mxu1 %v672_v63 }
  0x4c   : > { %675 = vmatpush3.bf16.msra.mxu0 %v674_v2  ;;  %691 = vmatpush3.bf16.msra.mxu1 %v674_v2 }
  0x4f   : > { %396 = vmatmul.mubr.f32.vlgmr.msra.gmra.mrb[0].mxu0 %v283_v3  ;;  %416 = vmatmul.mubr.f32.vlgmr.msra.gmra.mrb[0].mxu1 %v291_v4 }
  0x50   : > { %400 = vmatprep.mubr.f32.mxu0 %v286_v5  ;;  %420 = vmatprep.mubr.f32.mxu1 %v294_v6 }
  0x53   : > { %401 = vmatmul.mubr.f32.gmra.mrb[2].mxu0 %v285_v7  ;;  %421 = vmatmul.mubr.f32.gmra.mrb[2].mxu1 %v293_v8 }
  0x54   : > { %405 = vmatprep.mubr.f32.mxu0 %v288_v9  ;;  %425 = vmatprep.mubr.f32.mxu1 %v296_v10 }
  0x57   : > { %406 = vmatmul.mubr.f32.gmra.mrb[4].mxu0 %v287_v11  ;;  %426 = vmatmul.mubr.f32.gmra.mrb[4].mxu1 %v295_v12 }
  0x58   : > { %410 = vmatprep.mubr.f32.mxu0 %v290_v13  ;;  %430 = vmatprep.mubr.f32.mxu1 %v298_v14 }
  0x5b   : > { %411 = vmatmul.mubr.f32.gmra.mrb[6].mxu0 %v289_v15  ;;  %431 = vmatmul.mubr.f32.gmra.mrb[6].mxu1 %v297_v16 }
 0x122   : > { %v620_v17 = vpop.f32.mrb[0].mxu0  ;;  %v632_v18 = vpop.f32.mrb[0].mxu1 }
 0x123   : > { %v621_v20 = vpop.f32.mrb[1].mxu0  ;;  %v633_v22 = vpop.f32.mrb[1].mxu1 }
 0x124   : > { %v622_v23 = vadd.f32 %v621_v20, %v620_v17  ;;  %v634_v24 = vadd.f32 %v633_v22, %v632_v18 }
 0x126   : > { %v436_v25 = vadd.f32 %v622_v23, %v275_v19  ;;  %v440_v26 = vadd.f32 %v634_v24, %v279_v21  ;;  %v623_v27 = vpop.f32.mrb[2].mxu0  ;;  %v635_v28 = vpop.f32.mrb[2].mxu1 }
 0x127   : > { %v624_v30 = vpop.f32.mrb[3].mxu0  ;;  %v636_v32 = vpop.f32.mrb[3].mxu1 }
 0x128   : > { %444 = vst [vmem:[#allocation2] sm:$0xff] %v436_v25  ;;  %448 = vst [vmem:[#allocation2 + $0x20] sm:$0xff] %v440_v26  ;;  %v625_v33 = vadd.f32 %v624_v30, %v623_v27  ;;  %v637_v34 = vadd.f32 %v636_v32, %v635_v28 }
 0x12a   : > { %v437_v35 = vadd.f32 %v625_v33, %v276_v29  ;;  %v441_v36 = vadd.f32 %v637_v34, %v280_v31  ;;  %v626_v37 = vpop.f32.mrb[4].mxu0  ;;  %v638_v38 = vpop.f32.mrb[4].mxu1 }
 0x12b   : > { %v627_v40 = vpop.f32.mrb[5].mxu0  ;;  %v639_v42 = vpop.f32.mrb[5].mxu1 }
 0x12c   : > { %445 = vst [vmem:[#allocation2 + $0x8] sm:$0xff] %v437_v35  ;;  %449 = vst [vmem:[#allocation2 + $0x28] sm:$0xff] %v441_v36  ;;  %v628_v43 = vadd.f32 %v627_v40, %v626_v37  ;;  %v640_v44 = vadd.f32 %v639_v42, %v638_v38 }
 0x12e   : > { %v438_v45 = vadd.f32 %v628_v43, %v277_v39  ;;  %v442_v46 = vadd.f32 %v640_v44, %v281_v41  ;;  %v629_v47 = vpop.f32.mrb[6].mxu0  ;;  %v641_v48 = vpop.f32.mrb[6].mxu1  ;;  %455 = sbr.rel (%p581_p11) target bundleno = 320 (0x140), region = 63 }
 0x12f   : > { %v630_v50 = vpop.f32.mrb[7].mxu0  ;;  %v642_v52 = vpop.f32.mrb[7].mxu1  ;;  %v456_v57 = vld [vmem:[#allocation2] sm:$0xff] (!%p581_p11) }
 0x130   : > { %446 = vst [vmem:[#allocation2 + $0x10] sm:$0xff] %v438_v45  ;;  %450 = vst [vmem:[#allocation2 + $0x30] sm:$0xff] %v442_v46  ;;  %v631_v53 = vadd.f32 %v630_v50, %v629_v47  ;;  %v643_v54 = vadd.f32 %v642_v52, %v641_v48  ;;  %v471_v60 = vadd.f32 (!%p581_p11), %v582_v58, %v456_v57  ;;  %v460_v0 = vld [vmem:[#allocation2 + $0x20] sm:$0xff] (!%p581_p11) }
 0x131   : > { %v475_v3 = vadd.f32 (!%p581_p11), %v582_v58, %v460_v0 }
 0x132   : > { %v439_v55 = vadd.f32 %v631_v53, %v278_v49  ;;  %v443_v56 = vadd.f32 %v643_v54, %v282_v51  ;;  %479 = vst [vmem:[%s961_s3] sm:$0xff] (!%p581_p11), %v471_v60 }
 0x133   : > { %v457_v59 = vld [vmem:[#allocation2 + $0x8] sm:$0xff] (!%p581_p11)  ;;  %483 = vst [vmem:[%s961_s3 + $0x20] sm:$0xff] (!%p581_p11), %v475_v3 }
 0x134   : > { %447 = vst [vmem:[#allocation2 + $0x18] sm:$0xff] %v439_v55  ;;  %451 = vst [vmem:[#allocation2 + $0x38] sm:$0xff] %v443_v56  ;;  %v472_v61 = vadd.f32 (!%p581_p11), %v582_v58, %v457_v59  ;;  %v461_v4 = vld [vmem:[#allocation2 + $0x28] sm:$0xff] (!%p581_p11) }
 0x135   : > { %v476_v7 = vadd.f32 %v582_v58, %v461_v4 }
 0x136   : > { %480 = vst [vmem:[%s961_s3 + $0x8] sm:$0xff] %v472_v61 }
 0x137   : > { %v458_v62 = vld [vmem:[#allocation2 + $0x10] sm:$0xff]  ;;  %484 = vst [vmem:[%s961_s3 + $0x28] sm:$0xff] %v476_v7 }
 0x138   : > { %v473_v1 = vadd.f32 %v582_v58, %v458_v62  ;;  %v462_v5 = vld [vmem:[#allocation2 + $0x30] sm:$0xff] }
 0x139   : > { %v477_v8 = vadd.f32 %v582_v58, %v462_v5 }
 0x13a   : > { %481 = vst [vmem:[%s961_s3 + $0x10] sm:$0xff] %v473_v1 }
 0x13b   : > { %v459_v63 = vld [vmem:[#allocation2 + $0x18] sm:$0xff]  ;;  %485 = vst [vmem:[%s961_s3 + $0x30] sm:$0xff] %v477_v8 }
 0x13c   : > { %v474_v2 = vadd.f32 %v582_v58, %v459_v63  ;;  %v463_v6 = vld [vmem:[#allocation2 + $0x38] sm:$0xff] }
 0x13d   : > { %v478_v9 = vadd.f32 %v582_v58, %v463_v6 }
 0x13e   : > { %482 = vst [vmem:[%s961_s3 + $0x18] sm:$0xff] %v474_v2 }
 0x13f   : > { %486 = vst [vmem:[%s961_s3 + $0x38] sm:$0xff] %v478_v9 }
 0x140 PF: > { %s13_s16 = sadd.s32 1, %s771_s16   ;;  %s962_s12 = smov %s759_s13 }
 0x141   : > { %p10_p12 = scmp.ge.s32.totalorder %s13_s16, 4   ;;  %s963_s13 = smov %s829_s20 }
 0x142   : > { %s964_s14 = smov %s767_s15  ;;  %s965_s15 = smov %s967_s17 }
 0x143   :  { %12 = sbr.rel (!%p10_p12) target bundleno = 3 (0x3), region = 101 }

// kernel: mul.8
= control target key start
LH: loop header
LB: loop body
LE: loop exit
PB: predicated region body
PF: predicated region fallthrough
CT: control target
= control target key end

     0   :  { %s67_s10 = smov 56   ;;  %s68_s11 = smov 40   ;;  %vm3_vm0 = vcmask 64512   ;;  %vm9_vm1 = vcmask 523712   ;;  %vm15_vm2 = vcmask 458112   ;;  %vm21_vm3 = vcmask 392512   ;;  %s111_s0 = inlined_call_operand.vmem [shape: f32[8,8], index: 0, kind: input, shape index: {}]   ;;  %s112_s1 = inlined_call_operand.vmem [shape: f32[64], index: 1, kind: output, shape index: {}]  }
   0x1   :  { %v53_v0 = vld [vmem:[%s111_s0 + $0x7] sm:$0x1]   ;;  %v55_v1 = vld [vmem:[%s111_s0 + $0x5] sm:$0x1]   ;;  %v54_v2 = vld [vmem:[%s111_s0 + $0x6] sm:$0x1]  }
   0x2   :  { %7 = vrot.lane.b32.xlu0 %v53_v0, %s67_s10  ;;  %19 = vrot.lane.b32.xlu1 %v55_v1, %s68_s11  ;;  %v56_v3 = vld [vmem:[%s111_s0 + $0x4] sm:$0x1]   ;;  %v2_v4 = vld [vmem:[%s111_s0] sm:$0x1]   ;;  %s69_s18 = smov 48   ;;  %s70_s19 = smov 32  }
   0x3   :  { %4 = vst.msk [vmem:[#allocation0] sm:$0x1] %vm3_vm0, %v2_v4   ;;  %v57_v5 = vld [vmem:[%s111_s0 + $0x3] sm:$0x1]   ;;  %v58_v6 = vld [vmem:[%s111_s0 + $0x2] sm:$0x1]  }
   0x4   :  { %s71_s24 = smov 24   ;;  %s72_s25 = smov 16   ;;  %v59_v7 = vld [vmem:[%s111_s0 + $0x1] sm:$0x1]   ;;  %vm27_vm4 = vcmask 326912   ;;  %vm33_vm5 = vcmask 261312  }
   0x5   :  { %s73_s0 = smov 8   ;;  %vm39_vm6 = vcmask 195712   ;;  %vm45_vm7 = vcmask 130112  }
   0x6   :  { %13 = vrot.lane.b32.xlu0 %v54_v2, %s69_s18  ;;  %25 = vrot.lane.b32.xlu1 %v56_v3, %s70_s19 }
   0xa   :  { %31 = vrot.lane.b32.xlu0 %v57_v5, %s71_s24  ;;  %37 = vrot.lane.b32.xlu1 %v58_v6, %s72_s25 }
   0xe   :  { %43 = vrot.lane.b32.xlu0 %v59_v7, %s73_s0 }
  0x74   :  { %v8_v8 = vpop.permute.xlu0 %7   ;;  %v20_v9 = vpop.permute.xlu1 %19  }
  0x75   :  { %10 = vst.msk [vmem:[#allocation0] sm:$0x1] %vm9_vm1, %v8_v8  }
  0x78   :  { %v14_v10 = vpop.permute.xlu0 %13   ;;  %v26_v11 = vpop.permute.xlu1 %25  }
  0x79   :  { %16 = vst.msk [vmem:[#allocation0] sm:$0x1] %vm15_vm2, %v14_v10  }
  0x7a   :  { %22 = vst.msk [vmem:[#allocation0] sm:$0x1] %vm21_vm3, %v20_v9  }
  0x7b   :  { %28 = vst.msk [vmem:[#allocation0] sm:$0x1] %vm27_vm4, %v26_v11  }
  0x7c   :  { %v32_v12 = vpop.permute.xlu0 %31   ;;  %v38_v13 = vpop.permute.xlu1 %37  }
  0x7d   :  { %34 = vst.msk [vmem:[#allocation0] sm:$0x1] %vm33_vm5, %v32_v12  }
  0x7e   :  { %40 = vst.msk [vmem:[#allocation0] sm:$0x1] %vm39_vm6, %v38_v13  }
  0x80   :  { %v44_v14 = vpop.permute.xlu0 %43  }
  0x81   :  { %46 = vst.msk [vmem:[#allocation0] sm:$0x1] %vm45_vm7, %v44_v14  }
  0x88   :  { %v50_v15 = vld [vmem:[#allocation0] sm:$0x1] }
  0x89   :  { %52 = vst [vmem:[%s112_s1] sm:$0x1] %v50_v15 }

// kernel: i2a_forward.10
= control target key start
LH: loop header
LB: loop body
LE: loop exit
PB: predicated region body
PF: predicated region fallthrough
CT: control target
= control target key end

     0   :  { %s367_s9 = smov 0   ;;  %s400_s0 = inlined_call_operand.vmem [shape: f32[8,8,128], index: 0, kind: input, shape index: {}]   ;;  %s401_s1 = inlined_call_operand.vmem [shape: f32[32,128], index: 1, kind: input, shape index: {}]   ;;  %s402_s2 = inlined_call_operand.vmem [shape: f32[8,32], index: 2, kind: output, shape index: {}]  }
   0x1 LB: > { %s282_s10 = sadd.s32 4294967295, %s343_s9   ;;  %p285_p0 = scmp.ge.s32.totalorder %s343_s9, 1  ;;  %s343_s9 = sphi %s367_s9, %s12_s9  }
   0x2   : > { %p106_p1 = scmp.lt.s32.totalorder %s343_s9, 9 }
   0x4   : > { %p107_p2 = pnand %p285_p0, %p106_p1 }
   0x5   : > { %p122_p3 = scmp.lt.s32.totalorder (!%p107_p2), %s282_s10, 7  ;;  %p287_p4 = scmp.ne.s32.totalorder (!%p107_p2), %s282_s10, 0 }
   0x6   : > { %110 = sbr.rel (%p107_p2) target bundleno = 734 (0x2de), region = 28 }
   0xd   : > { %s123_s11 = scalar_select %p122_p3, %s282_s10, 7 }
   0xe   : > { %129 = sbr.rel (%p287_p4) target bundleno = 21 (0x15), region = 32  ;;  %vm130_vm0 = vcmask (!%p287_p4), 261120   ;;  %v345_v0 = vmov (!%p287_p4), 0.0  }
   0xf   : > { %s286_s12 = sshll.u32 %s123_s11, 3  ;;  %131 = vst.msk [vmem:[#allocation2] sm:$0xff] (!%p287_p4), %vm130_vm0, %v345_v0  ;;  %132 = vst.msk [vmem:[#allocation3] sm:$0xff] (!%p287_p4), %vm130_vm0, %v345_v0 }
  0x10   : > { %s125_s15 = scalar_lea.vmem %s400_s0, %s286_s12 }
  0x15 PF: > { %v135_v1 = vld [vmem:[%s401_s1] sm:$0xff]  ;;  %v136_v2 = vld [vmem:[%s401_s1 + $0x8] sm:$0xff]  ;;  %v137_v3 = vld [vmem:[%s401_s1 + $0x10] sm:$0xff]  ;;  %v346_v4 = vmov 0.0|0.0   ;;  %vm347_vm1 = vmmov 0   ;;  %v348_v7 = vmov 0.0  }
  0x16   : > { %308 = vmatprep.subr.bf16.mxu0 %v346_v4  ;;  %v309_v5 = vpack.c.bf16 %v136_v2, %v135_v1  ;;  %v138_v6 = vld [vmem:[%s401_s1 + $0x18] sm:$0xff]  ;;  %305 = vmatprep.mubr.msk.f32.mxu0 %vm347_vm1, %v348_v7  ;;  %v134_v9 = vld [vmem:[#allocation2] sm:$0xff]  ;;  %vm139_vm2 = vcmask 261120   ;;  %s349_s24 = smov 64   ;;  %v221_v15 = vld [vmem:[#allocation3] sm:$0xff]  ;;  %s350_s25 = smov 32  }
  0x17   : > { %v312_v8 = vpack.c.bf16 %v138_v6, %v137_v3  ;;  %v133_v10 = vld [vmem:[%s125_s15] sm:$0xff]  ;;  %s351_s26 = smov 96  }
  0x18   : > { %310 = vmatpush3.bf16.msra.mxu0 %v309_v5 }
  0x19   : > { %311 = vmatprep.subr.bf16.mxu0 %v346_v4 }
  0x1c   : > { %313 = vmatpush3.bf16.msra.mxu0 %v312_v8 }
  0x1f   : > { %306 = vmatmul.mubr.msk.f32.vlgmr.msra.gmra.mrb[0].mxu0 %vm139_vm2, %v134_v9 }
  0xf2   : > { %v209_v11 = vpop.f32.mrb[0].mxu0 }
  0xf3   : > { %v213_v12 = vadd.f32 %v209_v11, %v133_v10  ;;  %v307_v13 = vpop.f32.mrb[1].mxu0 }
  0xf5   : > { %329 = vtanh.f32 %v213_v12  ;;  %v289_v16 = vmul.f32 -1.442695, %v213_v12 }
  0xf7   : > { %331 = vpow2.f32 %v289_v16 }
  0xff   : > { %v330_v14 = vpop.eup %329 }
 0x100   : > { %228 = vrot.lane.b32.xlu0 %v330_v14, %s349_s24 }
 0x101   : > { %v332_v17 = vpop.eup %331 }
 0x102   : > { %v217_v18 = vadd.f32 1.0, %v332_v17 }
 0x104   : > { %223 = vrot.lane.b32.xlu0 %v221_v15, %s350_s25  ;;  %333 = vrcp.f32 %v217_v18 }
 0x10e   : > { %v334_v19 = vpop.eup %333 }
 0x172   : > { %v229_v20 = vpop.permute.xlu0 %228 }
 0x173   : > { %v231_v21 = vmul.f32 %v334_v19, %v229_v20 }
 0x175   : > { %233 = vrot.lane.b32.xlu1 %v231_v21, %s350_s25 }
 0x176   : > { %v224_v22 = vpop.permute.xlu0 %223 }
 0x177   : > { %v226_v23 = vmul.f32 %v334_v19, %v224_v22 }
 0x1e7   : > { %v234_v24 = vpop.permute.xlu1 %233 }
 0x1e8   : > { %v236_v25 = vadd.f32 %v234_v24, %v226_v23 }
 0x1ea   : > { %335 = vtanh.f32 %v236_v25  ;;  %244 = vrot.lane.b32.xlu0 %v236_v25, %s351_s26 }
 0x1f4   : > { %v336_v26 = vpop.eup %335 }
 0x1f5   : > { %239 = vrot.lane.b32.xlu1 %v336_v26, %s349_s24 }
 0x25c   : > { %v245_v27 = vpop.permute.xlu0 %244 }
 0x25d   : > { %247 = vst.msk [vmem:[#allocation3] sm:$0xff] %vm139_vm2, %v245_v27 }
 0x267   : > { %v240_v28 = vpop.permute.xlu1 %239 }
 0x268   : > { %v242_v29 = vmul.f32 %v334_v19, %v240_v28 }
 0x26a   : > { %249 = vrot.lane.b32.xlu1 %v242_v29, %s350_s25 }
 0x2dc   : > { %v250_v30 = vpop.permute.xlu1 %249 }
 0x2dd   : > { %252 = vst.msk [vmem:[#allocation2] sm:$0xff] %vm139_vm2, %v250_v30  ;;  %253 = vst.msk [vmem:[%s402_s2] sm:$0xff] %vm139_vm2, %v250_v30 }
 0x2de PF: > { %s12_s9 = sadd.s32 1, %s343_s9  }
 0x2df   : > { %p9_p5 = scmp.ge.s32.totalorder %s12_s9, 10  }
 0x2e1   :  { %11 = sbr.rel (!%p9_p5) target bundleno = 1 (0x1), region = 58 }

// kernel: i2a_forward.6
= control target key start
LH: loop header
LB: loop body
LE: loop exit
PB: predicated region body
PF: predicated region fallthrough
CT: control target
= control target key end

     0   :  { %vm96_vm0 = vcmask 719872   ;;  %s586_s1 = inlined_call_operand.vmem [shape: f32[216,256], index: 1, kind: input, shape index: {}]   ;;  %s587_s0 = inlined_call_operand.vmem [shape: f32[32,216], index: 0, kind: input, shape index: {}]   ;;  %s588_s2 = inlined_call_operand.vmem [shape: f32[1,256], index: 2, kind: input, shape index: {}]   ;;  %s589_s3 = inlined_call_operand.vmem [shape: f32[32,256], index: 3, kind: output, shape index: {}]  }
   0x1   :  { %v43_v0 = vld [vmem:[%s586_s1 + $0x8] sm:$0xff]  ;;  %v45_v1 = vld [vmem:[%s586_s1 + $0x18] sm:$0xff]  ;;  %v42_v2 = vld [vmem:[%s586_s1] sm:$0xff] }
   0x2   :  { %v269_v3 = vpack.c.bf16 %v45_v1, %v43_v0  ;;  %v44_v4 = vld [vmem:[%s586_s1 + $0x10] sm:$0xff]  ;;  %v47_v5 = vld [vmem:[%s586_s1 + $0x28] sm:$0xff]  ;;  %v49_v6 = vld [vmem:[%s586_s1 + $0x38] sm:$0xff] }
   0x3   :  { %v271_v7 = vpack.c.bf16 %v44_v4, %v42_v2  ;;  %v273_v8 = vpack.c.bf16 %v49_v6, %v47_v5  ;;  %v46_v9 = vld [vmem:[%s586_s1 + $0x20] sm:$0xff]  ;;  %v48_v10 = vld [vmem:[%s586_s1 + $0x30] sm:$0xff]  ;;  %v51_v11 = vld [vmem:[%s586_s1 + $0x48] sm:$0xff] }
   0x4   :  { %270 = vmatprep.subr.bf16.mxu0 %v269_v3  ;;  %321 = vmatprep.subr.bf16.mxu1 %v269_v3  ;;  %v53_v12 = vld [vmem:[%s586_s1 + $0x58] sm:$0xff]  ;;  %v275_v13 = vpack.c.bf16 %v48_v10, %v46_v9  ;;  %v50_v15 = vld [vmem:[%s586_s1 + $0x40] sm:$0xff]  ;;  %v52_v16 = vld [vmem:[%s586_s1 + $0x50] sm:$0xff] }
   0x5   :  { %272 = vmatpush1.bf16.msra.mxu0 %v271_v7  ;;  %335 = vmatpush1.bf16.msra.mxu1 %v271_v7  ;;  %v277_v14 = vpack.c.bf16 %v53_v12, %v51_v11  ;;  %v55_v17 = vld [vmem:[%s586_s1 + $0x68] sm:$0xff]  ;;  %v57_v18 = vld [vmem:[%s586_s1 + $0x78] sm:$0xff]  ;;  %v279_v19 = vpack.c.bf16 %v52_v16, %v50_v15  ;;  %v54_v21 = vld [vmem:[%s586_s1 + $0x60] sm:$0xff] }
   0x6   :  { %274 = vmatprep.subr.bf16.mxu0 %v273_v8  ;;  %322 = vmatprep.subr.bf16.mxu1 %v273_v8  ;;  %v281_v20 = vpack.c.bf16 %v57_v18, %v55_v17  ;;  %v56_v22 = vld [vmem:[%s586_s1 + $0x70] sm:$0xff]  ;;  %v59_v23 = vld [vmem:[%s586_s1 + $0x88] sm:$0xff]  ;;  %v61_v24 = vld [vmem:[%s586_s1 + $0x98] sm:$0xff] }
   0x7   :  { %v283_v25 = vpack.c.bf16 %v56_v22, %v54_v21  ;;  %v285_v26 = vpack.c.bf16 %v61_v24, %v59_v23  ;;  %v58_v27 = vld [vmem:[%s586_s1 + $0x80] sm:$0xff]  ;;  %v60_v28 = vld [vmem:[%s586_s1 + $0x90] sm:$0xff]  ;;  %v63_v29 = vld [vmem:[%s586_s1 + $0xa8] sm:$0xff]  ;;  %v227_v24 = vlaneseq }
   0x8   :  { %v65_v30 = vld [vmem:[%s586_s1 + $0xb8] sm:$0xff]  ;;  %v287_v31 = vpack.c.bf16 %v60_v28, %v58_v27  ;;  %v62_v33 = vld [vmem:[%s586_s1 + $0xa0] sm:$0xff]  ;;  %v64_v34 = vld [vmem:[%s586_s1 + $0xb0] sm:$0xff] }
   0x9   :  { %276 = vmatpush1.bf16.msra.mxu0 %v275_v13  ;;  %336 = vmatpush1.bf16.msra.mxu1 %v275_v13  ;;  %v289_v32 = vpack.c.bf16 %v65_v30, %v63_v29  ;;  %v67_v35 = vld [vmem:[%s586_s1 + $0xc8] sm:$0xff]  ;;  %v69_v36 = vld [vmem:[%s586_s1 + $0xd8] sm:$0xff]  ;;  %v291_v39 = vpack.c.bf16 %v64_v34, %v62_v33  ;;  %v66_v41 = vld [vmem:[%s586_s1 + $0xc0] sm:$0xff] }
   0xa   :  { %278 = vmatprep.subr.bf16.mxu0 %v277_v14  ;;  %323 = vmatprep.subr.bf16.mxu1 %v277_v14  ;;  %v35_v37 = vld [vmem:[%s587_s0 + $0x8] sm:$0xff]  ;;  %v293_v40 = vpack.c.bf16 %v69_v36, %v67_v35  ;;  %v68_v42 = vld [vmem:[%s586_s1 + $0xd0] sm:$0xff]  ;;  %v73_v44 = vld [vmem:[%s586_s1 + $0xf8] sm:$0xff] }
   0xb   :  { %v39_v38 = vld [vmem:[%s587_s0 + $0x28] sm:$0xff]  ;;  %265 = vmatprep.mubr.msk.f32.mxu0 %vm96_vm0, %v35_v37  ;;  %v295_v45 = vpack.c.bf16 %v68_v42, %v66_v41  ;;  %v70_v47 = vld [vmem:[%s586_s1 + $0xe0] sm:$0xff]  ;;  %v72_v48 = vld [vmem:[%s586_s1 + $0xf0] sm:$0xff] }
   0xc   :  { %267 = vmatprep.mubr.msk.f32.mxu1 %vm96_vm0, %v39_v38  ;;  %v71_v43 = vld [vmem:[%s586_s1 + $0xe8] sm:$0xff]  ;;  %v77_v50 = vld [vmem:[%s586_s1 + $0x118] sm:$0xff]  ;;  %v299_v51 = vpack.c.bf16 %v72_v48, %v70_v47  ;;  %v74_v53 = vld [vmem:[%s586_s1 + $0x100] sm:$0xff] }
   0xd   :  { %280 = vmatpush1.bf16.msra.mxu0 %v279_v19  ;;  %337 = vmatpush1.bf16.msra.mxu1 %v279_v19  ;;  %v297_v46 = vpack.c.bf16 %v73_v44, %v71_v43  ;;  %v75_v49 = vld [vmem:[%s586_s1 + $0x108] sm:$0xff]  ;;  %v76_v54 = vld [vmem:[%s586_s1 + $0x110] sm:$0xff]  ;;  %v81_v56 = vld [vmem:[%s586_s1 + $0x138] sm:$0xff] }
   0xe   :  { %282 = vmatprep.subr.bf16.mxu0 %v281_v20  ;;  %324 = vmatprep.subr.bf16.mxu1 %v281_v20  ;;  %v301_v52 = vpack.c.bf16 %v77_v50, %v75_v49  ;;  %v79_v55 = vld [vmem:[%s586_s1 + $0x128] sm:$0xff]  ;;  %v303_v57 = vpack.c.bf16 %v76_v54, %v74_v53  ;;  %v78_v59 = vld [vmem:[%s586_s1 + $0x120] sm:$0xff]  ;;  %v80_v60 = vld [vmem:[%s586_s1 + $0x130] sm:$0xff] }
   0xf   :  { %v305_v58 = vpack.c.bf16 %v81_v56, %v79_v55  ;;  %v83_v61 = vld [vmem:[%s586_s1 + $0x148] sm:$0xff]  ;;  %v85_v62 = vld [vmem:[%s586_s1 + $0x158] sm:$0xff]  ;;  %v307_v63 = vpack.c.bf16 %v80_v60, %v78_v59  ;;  %v82_v1 = vld [vmem:[%s586_s1 + $0x140] sm:$0xff] }
  0x10   :  { %v309_v0 = vpack.c.bf16 %v85_v62, %v83_v61  ;;  %v84_v2 = vld [vmem:[%s586_s1 + $0x150] sm:$0xff]  ;;  %v87_v3 = vld [vmem:[%s586_s1 + $0x168] sm:$0xff]  ;;  %v89_v4 = vld [vmem:[%s586_s1 + $0x178] sm:$0xff] }
  0x11   :  { %284 = vmatpush1.bf16.msra.mxu0 %v283_v25  ;;  %338 = vmatpush1.bf16.msra.mxu1 %v283_v25  ;;  %v311_v5 = vpack.c.bf16 %v84_v2, %v82_v1  ;;  %v313_v6 = vpack.c.bf16 %v89_v4, %v87_v3  ;;  %v86_v7 = vld [vmem:[%s586_s1 + $0x160] sm:$0xff]  ;;  %v88_v8 = vld [vmem:[%s586_s1 + $0x170] sm:$0xff]  ;;  %v91_v9 = vld [vmem:[%s586_s1 + $0x188] sm:$0xff]  ;;  %v228_v25 = vshrl.u32 %v227_v24, 7 }
  0x12   :  { %286 = vmatprep.subr.bf16.mxu0 %v285_v26  ;;  %325 = vmatprep.subr.bf16.mxu1 %v285_v26  ;;  %v93_v10 = vld [vmem:[%s586_s1 + $0x198] sm:$0xff]  ;;  %v315_v11 = vpack.c.bf16 %v88_v8, %v86_v7  ;;  %v90_v13 = vld [vmem:[%s586_s1 + $0x180] sm:$0xff]  ;;  %v92_v14 = vld [vmem:[%s586_s1 + $0x190] sm:$0xff] }
  0x13   :  { %v317_v12 = vpack.c.bf16 %v93_v10, %v91_v9  ;;  %v319_v15 = vpack.c.bf16 %v92_v14, %v90_v13  ;;  %v95_v16 = vld [vmem:[%s586_s1 + $0x1a8] sm:$0xff]  ;;  %v94_v17 = vld [vmem:[%s586_s1 + $0x1a0] sm:$0xff]  ;;  %v37_v20 = vld [vmem:[%s587_s0 + $0x18] sm:$0xff]  ;;  %v229_v26 = vsub.s32 0, %v228_v25  ;;  %v233_v28 = vsub.s32 1, %v228_v25 }
  0x14   :  { %v34_v18 = vld [vmem:[%s587_s0] sm:$0xff]  ;;  %v41_v21 = vld [vmem:[%s587_s0 + $0x38] sm:$0xff]  ;;  %v36_v22 = vld [vmem:[%s587_s0 + $0x10] sm:$0xff] }
  0x15   :  { %288 = vmatpush1.bf16.msra.mxu0 %v287_v31  ;;  %339 = vmatpush1.bf16.msra.mxu1 %v287_v31  ;;  %v38_v19 = vld [vmem:[%s587_s0 + $0x20] sm:$0xff]  ;;  %v40_v23 = vld [vmem:[%s587_s0 + $0x30] sm:$0xff] }
  0x16   :  { %290 = vmatprep.subr.bf16.mxu0 %v289_v32  ;;  %326 = vmatprep.subr.bf16.mxu1 %v289_v32  ;;  %v225_v27 = vld [vmem:[%s588_s2] sm:$0x3] }
  0x17   :  { %v230_v29 = vrot.slane %v225_v27, %v229_v26  ;;  %v234_v30 = vrot.slane %v225_v27, %v233_v28 }
  0x19   :  { %292 = vmatpush1.bf16.msra.mxu0 %v291_v39  ;;  %340 = vmatpush1.bf16.msra.mxu1 %v291_v39 }
  0x1a   :  { %294 = vmatprep.subr.bf16.mxu0 %v293_v40  ;;  %327 = vmatprep.subr.bf16.mxu1 %v293_v40 }
  0x1d   :  { %296 = vmatpush1.bf16.msra.mxu0 %v295_v45  ;;  %341 = vmatpush1.bf16.msra.mxu1 %v295_v45 }
  0x1e   :  { %298 = vmatprep.subr.bf16.mxu0 %v297_v46  ;;  %328 = vmatprep.subr.bf16.mxu1 %v297_v46 }
  0x21   :  { %300 = vmatpush1.bf16.msra.mxu0 %v299_v51  ;;  %342 = vmatpush1.bf16.msra.mxu1 %v299_v51 }
  0x22   :  { %302 = vmatprep.subr.bf16.mxu0 %v301_v52  ;;  %329 = vmatprep.subr.bf16.mxu1 %v301_v52 }
  0x25   :  { %304 = vmatpush1.bf16.msra.mxu0 %v303_v57  ;;  %343 = vmatpush1.bf16.msra.mxu1 %v303_v57 }
  0x26   :  { %306 = vmatprep.subr.bf16.mxu0 %v305_v58  ;;  %330 = vmatprep.subr.bf16.mxu1 %v305_v58 }
  0x29   :  { %308 = vmatpush1.bf16.msra.mxu0 %v307_v63  ;;  %344 = vmatpush1.bf16.msra.mxu1 %v307_v63 }
  0x2a   :  { %310 = vmatprep.subr.bf16.mxu0 %v309_v0  ;;  %331 = vmatprep.subr.bf16.mxu1 %v309_v0 }
  0x2d   :  { %312 = vmatpush1.bf16.msra.mxu0 %v311_v5  ;;  %345 = vmatpush1.bf16.msra.mxu1 %v311_v5 }
  0x2e   :  { %314 = vmatprep.subr.bf16.mxu0 %v313_v6  ;;  %332 = vmatprep.subr.bf16.mxu1 %v313_v6 }
  0x31   :  { %316 = vmatpush1.bf16.msra.mxu0 %v315_v11  ;;  %346 = vmatpush1.bf16.msra.mxu1 %v315_v11 }
  0x32   :  { %318 = vmatprep.subr.bf16.mxu0 %v317_v12  ;;  %333 = vmatprep.subr.bf16.mxu1 %v317_v12 }
  0x35   :  { %320 = vmatpush1.bf16.msra.mxu0 %v319_v15  ;;  %347 = vmatpush1.bf16.msra.mxu1 %v319_v15 }
  0x36   :  { %161 = vmatprep.subr.mxu0 %v95_v16  ;;  %334 = vmatprep.subr.mxu1 %v95_v16 }
  0x39   :  { %162 = vmatpush1.msra.mxu0 %v94_v17  ;;  %348 = vmatpush1.msra.mxu1 %v94_v17 }
  0x3a   :  { %174 = vmatmul.mubr.f32.vlgmr.msra.gmra.mrb[0].mxu0 %v34_v18  ;;  %186 = vmatmul.mubr.f32.vlgmr.msra.gmra.mrb[0].mxu1 %v38_v19 }
  0x3b   :  { %266 = vmatprep.mubr.msk.f32.mxu0 %vm96_vm0, %v37_v20  ;;  %268 = vmatprep.mubr.msk.f32.mxu1 %vm96_vm0, %v41_v21 }
  0x3e   :  { %180 = vmatmul.mubr.f32.gmra.mrb[2].mxu0 %v36_v22  ;;  %192 = vmatmul.mubr.f32.gmra.mrb[2].mxu1 %v40_v23 }
 0x10d   :  { %v175_v31 = vpop.f32.mrb[0].mxu0  ;;  %v187_v32 = vpop.f32.mrb[0].mxu1 }
 0x10e   :  { %v237_v33 = vadd.f32 %v230_v29, %v175_v31  ;;  %v241_v34 = vadd.f32 %v230_v29, %v187_v32  ;;  %v177_v35 = vpop.f32.mrb[1].mxu0  ;;  %v189_v36 = vpop.f32.mrb[1].mxu1 }
 0x10f   :  { %v238_v37 = vadd.f32 %v234_v30, %v177_v35  ;;  %v242_v38 = vadd.f32 %v234_v30, %v189_v36 }
 0x110   :  { %v245_v39 = vmax.f32 %v237_v33, 0.0  ;;  %v249_v40 = vmax.f32 %v241_v34, 0.0 }
 0x111   :  { %v246_v41 = vmax.f32 %v238_v37, 0.0  ;;  %v250_v42 = vmax.f32 %v242_v38, 0.0  ;;  %v181_v43 = vpop.f32.mrb[2].mxu0  ;;  %v193_v44 = vpop.f32.mrb[2].mxu1 }
 0x112   :  { %253 = vst [vmem:[%s589_s3] sm:$0xff] %v245_v39  ;;  %257 = vst [vmem:[%s589_s3 + $0x20] sm:$0xff] %v249_v40  ;;  %v239_v45 = vadd.f32 %v230_v29, %v181_v43  ;;  %v243_v46 = vadd.f32 %v230_v29, %v193_v44  ;;  %v183_v47 = vpop.f32.mrb[3].mxu0  ;;  %v195_v48 = vpop.f32.mrb[3].mxu1 }
 0x113   :  { %254 = vst [vmem:[%s589_s3 + $0x8] sm:$0xff] %v246_v41  ;;  %258 = vst [vmem:[%s589_s3 + $0x28] sm:$0xff] %v250_v42  ;;  %v240_v49 = vadd.f32 %v234_v30, %v183_v47  ;;  %v244_v50 = vadd.f32 %v234_v30, %v195_v48 }
 0x114   :  { %v247_v51 = vmax.f32 %v239_v45, 0.0  ;;  %v251_v52 = vmax.f32 %v243_v46, 0.0 }
 0x115   :  { %v248_v53 = vmax.f32 %v240_v49, 0.0  ;;  %v252_v54 = vmax.f32 %v244_v50, 0.0 }
 0x116   :  { %255 = vst [vmem:[%s589_s3 + $0x10] sm:$0xff] %v247_v51  ;;  %259 = vst [vmem:[%s589_s3 + $0x30] sm:$0xff] %v251_v52 }
 0x117   :  { %256 = vst [vmem:[%s589_s3 + $0x18] sm:$0xff] %v248_v53  ;;  %260 = vst [vmem:[%s589_s3 + $0x38] sm:$0xff] %v252_v54 }

// kernel: i2a_forward.7
= control target key start
LH: loop header
LB: loop body
LE: loop exit
PB: predicated region body
PF: predicated region fallthrough
CT: control target
= control target key end

     0   :  { %vm144_vm0 = vcmask 785408   ;;  %s1152_s1 = inlined_call_operand.vmem [shape: f32[864,128], index: 1, kind: input, shape index: {}]   ;;  %s1153_s0 = inlined_call_operand.vmem [shape: f32[16,864], index: 0, kind: input, shape index: {}]   ;;  %s1154_s2 = inlined_call_operand.vmem [shape: f32[1,128], index: 2, kind: input, shape index: {}]   ;;  %s1155_s3 = inlined_call_operand.vmem [shape: f32[16,128], index: 3, kind: output, shape index: {}]  }
   0x1   :  { %v52_v0 = vld [vmem:[%s1152_s1 + $0x80] sm:$0xff]  ;;  %v53_v1 = vld [vmem:[%s1152_s1 + $0x88] sm:$0xff]  ;;  %v54_v11 = vld [vmem:[%s1152_s1 + $0x90] sm:$0xff] }
   0x2   :  { %v84_v2 = vld [vmem:[%s1152_s1 + $0x180] sm:$0xff]  ;;  %v635_v3 = vpack.c.bf16 %v53_v1, %v52_v0  ;;  %v85_v4 = vld [vmem:[%s1152_s1 + $0x188] sm:$0xff]  ;;  %v55_v13 = vld [vmem:[%s1152_s1 + $0x98] sm:$0xff] }
   0x3   :  { %v36_v5 = vld [vmem:[%s1152_s1] sm:$0xff]  ;;  %v37_v6 = vld [vmem:[%s1152_s1 + $0x8] sm:$0xff]  ;;  %v667_v7 = vpack.c.bf16 %v85_v4, %v84_v2  ;;  %v86_v14 = vld [vmem:[%s1152_s1 + $0x190] sm:$0xff]  ;;  %v639_v16 = vpack.c.bf16 %v55_v13, %v54_v11 }
   0x4   :  { %v637_v8 = vpack.c.bf16 %v37_v6, %v36_v5  ;;  %v68_v9 = vld [vmem:[%s1152_s1 + $0x100] sm:$0xff]  ;;  %v69_v10 = vld [vmem:[%s1152_s1 + $0x108] sm:$0xff]  ;;  %636 = vmatprep.subr.bf16.mxu0 %v635_v3  ;;  %v87_v15 = vld [vmem:[%s1152_s1 + $0x198] sm:$0xff] }
   0x5   :  { %v669_v12 = vpack.c.bf16 %v69_v10, %v68_v9  ;;  %668 = vmatprep.subr.bf16.mxu1 %v667_v7  ;;  %v671_v17 = vpack.c.bf16 %v87_v15, %v86_v14  ;;  %v38_v18 = vld [vmem:[%s1152_s1 + $0x10] sm:$0xff]  ;;  %v39_v19 = vld [vmem:[%s1152_s1 + $0x18] sm:$0xff]  ;;  %v56_v23 = vld [vmem:[%s1152_s1 + $0xa0] sm:$0xff] }
   0x6   :  { %638 = vmatpush3.bf16.msra.mxu0 %v637_v8  ;;  %v70_v20 = vld [vmem:[%s1152_s1 + $0x110] sm:$0xff]  ;;  %v641_v21 = vpack.c.bf16 %v39_v19, %v38_v18  ;;  %v71_v22 = vld [vmem:[%s1152_s1 + $0x118] sm:$0xff]  ;;  %v57_v24 = vld [vmem:[%s1152_s1 + $0xa8] sm:$0xff] }
   0x7   :  { %670 = vmatpush3.bf16.msra.mxu1 %v669_v12  ;;  %640 = vmatprep.subr.bf16.mxu0 %v639_v16  ;;  %v673_v25 = vpack.c.bf16 %v71_v22, %v70_v20  ;;  %v643_v26 = vpack.c.bf16 %v57_v24, %v56_v23  ;;  %v88_v27 = vld [vmem:[%s1152_s1 + $0x1a0] sm:$0xff]  ;;  %v89_v28 = vld [vmem:[%s1152_s1 + $0x1a8] sm:$0xff]  ;;  %v58_v35 = vld [vmem:[%s1152_s1 + $0xb0] sm:$0xff] }
   0x8   :  { %672 = vmatprep.subr.bf16.mxu1 %v671_v17  ;;  %v40_v29 = vld [vmem:[%s1152_s1 + $0x20] sm:$0xff]  ;;  %v675_v30 = vpack.c.bf16 %v89_v28, %v88_v27  ;;  %v41_v31 = vld [vmem:[%s1152_s1 + $0x28] sm:$0xff]  ;;  %v59_v36 = vld [vmem:[%s1152_s1 + $0xb8] sm:$0xff] }
   0x9   :  { %v72_v32 = vld [vmem:[%s1152_s1 + $0x120] sm:$0xff]  ;;  %v73_v33 = vld [vmem:[%s1152_s1 + $0x128] sm:$0xff]  ;;  %v645_v34 = vpack.c.bf16 %v41_v31, %v40_v29  ;;  %v90_v37 = vld [vmem:[%s1152_s1 + $0x1b0] sm:$0xff]  ;;  %v647_v39 = vpack.c.bf16 %v59_v36, %v58_v35 }
   0xa   :  { %642 = vmatpush3.bf16.msra.mxu0 %v641_v21  ;;  %v677_v38 = vpack.c.bf16 %v73_v33, %v72_v32  ;;  %v91_v40 = vld [vmem:[%s1152_s1 + $0x1b8] sm:$0xff]  ;;  %v42_v41 = vld [vmem:[%s1152_s1 + $0x30] sm:$0xff]  ;;  %v60_v46 = vld [vmem:[%s1152_s1 + $0xc0] sm:$0xff] }
   0xb   :  { %674 = vmatpush3.bf16.msra.mxu1 %v673_v25  ;;  %644 = vmatprep.subr.bf16.mxu0 %v643_v26  ;;  %v43_v42 = vld [vmem:[%s1152_s1 + $0x38] sm:$0xff]  ;;  %v679_v43 = vpack.c.bf16 %v91_v40, %v90_v37  ;;  %v74_v44 = vld [vmem:[%s1152_s1 + $0x130] sm:$0xff]  ;;  %v61_v47 = vld [vmem:[%s1152_s1 + $0xc8] sm:$0xff] }
   0xc   :  { %676 = vmatprep.subr.bf16.mxu1 %v675_v30  ;;  %v75_v45 = vld [vmem:[%s1152_s1 + $0x138] sm:$0xff]  ;;  %v92_v48 = vld [vmem:[%s1152_s1 + $0x1c0] sm:$0xff]  ;;  %v93_v49 = vld [vmem:[%s1152_s1 + $0x1c8] sm:$0xff]  ;;  %v649_v50 = vpack.c.bf16 %v43_v42, %v42_v41  ;;  %v651_v52 = vpack.c.bf16 %v61_v47, %v60_v46 }
   0xd   :  { %v681_v51 = vpack.c.bf16 %v75_v45, %v74_v44  ;;  %v44_v53 = vld [vmem:[%s1152_s1 + $0x40] sm:$0xff]  ;;  %v45_v54 = vld [vmem:[%s1152_s1 + $0x48] sm:$0xff]  ;;  %v683_v56 = vpack.c.bf16 %v93_v49, %v92_v48  ;;  %v62_v58 = vld [vmem:[%s1152_s1 + $0xd0] sm:$0xff] }
   0xe   :  { %646 = vmatpush3.bf16.msra.mxu0 %v645_v34  ;;  %v76_v55 = vld [vmem:[%s1152_s1 + $0x140] sm:$0xff]  ;;  %v77_v57 = vld [vmem:[%s1152_s1 + $0x148] sm:$0xff]  ;;  %v63_v59 = vld [vmem:[%s1152_s1 + $0xd8] sm:$0xff]  ;;  %v653_v62 = vpack.c.bf16 %v45_v54, %v44_v53 }
   0xf   :  { %678 = vmatpush3.bf16.msra.mxu1 %v677_v38  ;;  %648 = vmatprep.subr.bf16.mxu0 %v647_v39  ;;  %v94_v60 = vld [vmem:[%s1152_s1 + $0x1d0] sm:$0xff]  ;;  %v95_v61 = vld [vmem:[%s1152_s1 + $0x1d8] sm:$0xff]  ;;  %v685_v63 = vpack.c.bf16 %v77_v57, %v76_v55  ;;  %v655_v0 = vpack.c.bf16 %v63_v59, %v62_v58  ;;  %v64_v6 = vld [vmem:[%s1152_s1 + $0xe0] sm:$0xff] }
  0x10   :  { %680 = vmatprep.subr.bf16.mxu1 %v679_v43  ;;  %v46_v1 = vld [vmem:[%s1152_s1 + $0x50] sm:$0xff]  ;;  %v47_v2 = vld [vmem:[%s1152_s1 + $0x58] sm:$0xff]  ;;  %v687_v4 = vpack.c.bf16 %v95_v61, %v94_v60  ;;  %v65_v7 = vld [vmem:[%s1152_s1 + $0xe8] sm:$0xff] }
  0x11   :  { %v78_v3 = vld [vmem:[%s1152_s1 + $0x150] sm:$0xff]  ;;  %v79_v5 = vld [vmem:[%s1152_s1 + $0x158] sm:$0xff]  ;;  %v96_v8 = vld [vmem:[%s1152_s1 + $0x1e0] sm:$0xff]  ;;  %v657_v10 = vpack.c.bf16 %v47_v2, %v46_v1  ;;  %v659_v14 = vpack.c.bf16 %v65_v7, %v64_v6 }
  0x12   :  { %650 = vmatpush3.bf16.msra.mxu0 %v649_v50  ;;  %v97_v9 = vld [vmem:[%s1152_s1 + $0x1e8] sm:$0xff]  ;;  %v48_v11 = vld [vmem:[%s1152_s1 + $0x60] sm:$0xff]  ;;  %v689_v13 = vpack.c.bf16 %v79_v5, %v78_v3  ;;  %v25_v17 = vld [vmem:[%s1153_s0 + $0x18] sm:$0xff] }
  0x13   :  { %682 = vmatpush3.bf16.msra.mxu1 %v681_v51  ;;  %652 = vmatprep.subr.bf16.mxu0 %v651_v52  ;;  %v49_v12 = vld [vmem:[%s1152_s1 + $0x68] sm:$0xff]  ;;  %v80_v15 = vld [vmem:[%s1152_s1 + $0x160] sm:$0xff]  ;;  %v691_v18 = vpack.c.bf16 %v97_v9, %v96_v8  ;;  %v66_v20 = vld [vmem:[%s1152_s1 + $0xf0] sm:$0xff] }
  0x14   :  { %684 = vmatprep.subr.bf16.mxu1 %v683_v56  ;;  %v23_v16 = vld [vmem:[%s1153_s0 + $0x8] sm:$0xff]  ;;  %v67_v21 = vld [vmem:[%s1152_s1 + $0xf8] sm:$0xff]  ;;  %v98_v22 = vld [vmem:[%s1152_s1 + $0x1f0] sm:$0xff]  ;;  %290 = vmatprep.mubr.f32.mxu1 %v25_v17  ;;  %v661_v24 = vpack.c.bf16 %v49_v12, %v48_v11 }
  0x15   :  { %v81_v19 = vld [vmem:[%s1152_s1 + $0x168] sm:$0xff]  ;;  %215 = vmatprep.mubr.f32.mxu0 %v23_v16  ;;  %v99_v23 = vld [vmem:[%s1152_s1 + $0x1f8] sm:$0xff]  ;;  %v663_v26 = vpack.c.bf16 %v67_v21, %v66_v20  ;;  %v50_v27 = vld [vmem:[%s1152_s1 + $0x70] sm:$0xff] }
  0x16   :  { %654 = vmatpush3.bf16.msra.mxu0 %v653_v62  ;;  %v693_v25 = vpack.c.bf16 %v81_v19, %v80_v15  ;;  %v51_v28 = vld [vmem:[%s1152_s1 + $0x78] sm:$0xff]  ;;  %v82_v29 = vld [vmem:[%s1152_s1 + $0x170] sm:$0xff]  ;;  %v695_v30 = vpack.c.bf16 %v99_v23, %v98_v22  ;;  %v116_v32 = vld [vmem:[%s1152_s1 + $0x280] sm:$0xff] }
  0x17   :  { %686 = vmatpush3.bf16.msra.mxu1 %v685_v63  ;;  %656 = vmatprep.subr.bf16.mxu0 %v655_v0  ;;  %v83_v31 = vld [vmem:[%s1152_s1 + $0x178] sm:$0xff]  ;;  %v117_v33 = vld [vmem:[%s1152_s1 + $0x288] sm:$0xff]  ;;  %v132_v34 = vld [vmem:[%s1152_s1 + $0x300] sm:$0xff]  ;;  %v665_v36 = vpack.c.bf16 %v51_v28, %v50_v27 }
  0x18   :  { %688 = vmatprep.subr.bf16.mxu1 %v687_v4  ;;  %v133_v35 = vld [vmem:[%s1152_s1 + $0x308] sm:$0xff]  ;;  %v697_v37 = vpack.c.bf16 %v83_v31, %v82_v29  ;;  %v699_v38 = vpack.c.bf16 %v117_v33, %v116_v32  ;;  %v100_v39 = vld [vmem:[%s1152_s1 + $0x200] sm:$0xff]  ;;  %v118_v41 = vld [vmem:[%s1152_s1 + $0x290] sm:$0xff] }
  0x19   :  { %v101_v40 = vld [vmem:[%s1152_s1 + $0x208] sm:$0xff]  ;;  %v119_v42 = vld [vmem:[%s1152_s1 + $0x298] sm:$0xff]  ;;  %v731_v43 = vpack.c.bf16 %v133_v35, %v132_v34  ;;  %v134_v44 = vld [vmem:[%s1152_s1 + $0x310] sm:$0xff] }
  0x1a   :  { %658 = vmatpush3.bf16.msra.mxu0 %v657_v10  ;;  %v135_v45 = vld [vmem:[%s1152_s1 + $0x318] sm:$0xff]  ;;  %v22_v46 = vld [vmem:[%s1153_s0] sm:$0xff]  ;;  %v701_v47 = vpack.c.bf16 %v101_v40, %v100_v39  ;;  %v24_v48 = vld [vmem:[%s1153_s0 + $0x10] sm:$0xff]  ;;  %v703_v49 = vpack.c.bf16 %v119_v42, %v118_v41 }
  0x1b   :  { %690 = vmatpush3.bf16.msra.mxu1 %v689_v13  ;;  %660 = vmatprep.subr.bf16.mxu0 %v659_v14  ;;  %v102_v50 = vld [vmem:[%s1152_s1 + $0x210] sm:$0xff]  ;;  %v103_v51 = vld [vmem:[%s1152_s1 + $0x218] sm:$0xff]  ;;  %v120_v52 = vld [vmem:[%s1152_s1 + $0x2a0] sm:$0xff]  ;;  %v735_v54 = vpack.c.bf16 %v135_v45, %v134_v44 }
  0x1c   :  { %692 = vmatprep.subr.bf16.mxu1 %v691_v18  ;;  %v121_v53 = vld [vmem:[%s1152_s1 + $0x2a8] sm:$0xff]  ;;  %v136_v55 = vld [vmem:[%s1152_s1 + $0x320] sm:$0xff]  ;;  %v705_v58 = vpack.c.bf16 %v103_v51, %v102_v50  ;;  %v32_v59 = vld [vmem:[%s1153_s0 + $0x50] sm:$0xff] }
  0x1d   :  { %v137_v56 = vld [vmem:[%s1152_s1 + $0x328] sm:$0xff]  ;;  %v30_v57 = vld [vmem:[%s1153_s0 + $0x40] sm:$0xff]  ;;  %v29_v60 = vld [vmem:[%s1153_s0 + $0x38] sm:$0xff]  ;;  %v707_v61 = vpack.c.bf16 %v121_v53, %v120_v52 }
  0x1e   :  { %662 = vmatpush3.bf16.msra.mxu0 %v661_v24  ;;  %v104_v62 = vld [vmem:[%s1152_s1 + $0x220] sm:$0xff]  ;;  %v105_v63 = vld [vmem:[%s1152_s1 + $0x228] sm:$0xff]  ;;  %v122_v1 = vld [vmem:[%s1152_s1 + $0x2b0] sm:$0xff]  ;;  %v739_v3 = vpack.c.bf16 %v137_v56, %v136_v55 }
  0x1f   :  { %694 = vmatpush3.bf16.msra.mxu1 %v693_v25  ;;  %664 = vmatprep.subr.bf16.mxu0 %v663_v26  ;;  %v31_v0 = vld [vmem:[%s1153_s0 + $0x48] sm:$0xff]  ;;  %v123_v2 = vld [vmem:[%s1152_s1 + $0x2b8] sm:$0xff]  ;;  %v138_v4 = vld [vmem:[%s1152_s1 + $0x330] sm:$0xff]  ;;  %v709_v7 = vpack.c.bf16 %v105_v63, %v104_v62 }
  0x20   :  { %696 = vmatprep.subr.bf16.mxu1 %v695_v30  ;;  %v139_v5 = vld [vmem:[%s1152_s1 + $0x338] sm:$0xff]  ;;  %v27_v6 = vld [vmem:[%s1153_s0 + $0x28] sm:$0xff]  ;;  %v28_v8 = vld [vmem:[%s1153_s0 + $0x30] sm:$0xff]  ;;  %v711_v9 = vpack.c.bf16 %v123_v2, %v122_v1 }
  0x21   :  { %v106_v10 = vld [vmem:[%s1152_s1 + $0x230] sm:$0xff]  ;;  %v107_v11 = vld [vmem:[%s1152_s1 + $0x238] sm:$0xff]  ;;  %v124_v12 = vld [vmem:[%s1152_s1 + $0x2c0] sm:$0xff]  ;;  %v743_v14 = vpack.c.bf16 %v139_v5, %v138_v4 }
  0x22   :  { %666 = vmatpush3.bf16.msra.mxu0 %v665_v36  ;;  %v125_v13 = vld [vmem:[%s1152_s1 + $0x2c8] sm:$0xff]  ;;  %v140_v15 = vld [vmem:[%s1152_s1 + $0x340] sm:$0xff]  ;;  %v713_v17 = vpack.c.bf16 %v107_v11, %v106_v10  ;;  %v126_v21 = vld [vmem:[%s1152_s1 + $0x2d0] sm:$0xff] }
  0x23   :  { %698 = vmatpush3.bf16.msra.mxu1 %v697_v37  ;;  %700 = vmatprep.subr.bf16.mxu0 %v699_v38  ;;  %v141_v16 = vld [vmem:[%s1152_s1 + $0x348] sm:$0xff]  ;;  %v715_v18 = vpack.c.bf16 %v125_v13, %v124_v12  ;;  %v108_v19 = vld [vmem:[%s1152_s1 + $0x240] sm:$0xff]  ;;  %v127_v22 = vld [vmem:[%s1152_s1 + $0x2d8] sm:$0xff] }
  0x24   :  { %732 = vmatprep.subr.bf16.mxu1 %v731_v43  ;;  %v109_v20 = vld [vmem:[%s1152_s1 + $0x248] sm:$0xff]  ;;  %v747_v23 = vpack.c.bf16 %v141_v16, %v140_v15  ;;  %v142_v24 = vld [vmem:[%s1152_s1 + $0x350] sm:$0xff]  ;;  %v143_v25 = vld [vmem:[%s1152_s1 + $0x358] sm:$0xff]  ;;  %v719_v27 = vpack.c.bf16 %v127_v22, %v126_v21 }
  0x25   :  { %216 = vmatmul.mubr.f32.vlgmr.msra.gmra.mrb[0].mxu0 %v22_v46  ;;  %v717_v26 = vpack.c.bf16 %v109_v20, %v108_v19  ;;  %v110_v28 = vld [vmem:[%s1152_s1 + $0x250] sm:$0xff]  ;;  %v111_v29 = vld [vmem:[%s1152_s1 + $0x258] sm:$0xff]  ;;  %v128_v30 = vld [vmem:[%s1152_s1 + $0x2e0] sm:$0xff]  ;;  %v751_v32 = vpack.c.bf16 %v143_v25, %v142_v24 }
  0x26   :  { %291 = vmatmul.mubr.f32.vlgmr.msra.gmra.mrb[0].mxu1 %v24_v48  ;;  %702 = vmatpush3.bf16.msra.mxu0 %v701_v47  ;;  %v129_v31 = vld [vmem:[%s1152_s1 + $0x2e8] sm:$0xff]  ;;  %v721_v33 = vpack.c.bf16 %v111_v29, %v110_v28  ;;  %v112_v35 = vld [vmem:[%s1152_s1 + $0x260] sm:$0xff]  ;;  %v130_v37 = vld [vmem:[%s1152_s1 + $0x2f0] sm:$0xff] }
  0x27   :  { %704 = vmatprep.subr.bf16.mxu0 %v703_v49  ;;  %734 = vmatpush3.bf16.msra.mxu1 %v731_v43  ;;  %v723_v34 = vpack.c.bf16 %v129_v31, %v128_v30  ;;  %v113_v36 = vld [vmem:[%s1152_s1 + $0x268] sm:$0xff]  ;;  %v131_v38 = vld [vmem:[%s1152_s1 + $0x2f8] sm:$0xff]  ;;  %v114_v41 = vld [vmem:[%s1152_s1 + $0x270] sm:$0xff] }
  0x28   :  { %736 = vmatprep.subr.bf16.mxu1 %v735_v54  ;;  %220 = vmatprep.mubr.f32.mxu0 %v30_v57  ;;  %v725_v39 = vpack.c.bf16 %v113_v36, %v112_v35  ;;  %v727_v40 = vpack.c.bf16 %v131_v38, %v130_v37  ;;  %v115_v42 = vld [vmem:[%s1152_s1 + $0x278] sm:$0xff]  ;;  %v35_v43 = vld [vmem:[%s1153_s0 + $0x68] sm:$0xff]  ;;  %v26_v45 = vld [vmem:[%s1153_s0 + $0x20] sm:$0xff] }
  0x29   :  { %295 = vmatprep.mubr.f32.mxu1 %v32_v59  ;;  %221 = vmatmul.mubr.f32.gmra.mrb[2].mxu0 %v29_v60  ;;  %v729_v44 = vpack.c.bf16 %v115_v42, %v114_v41  ;;  %v34_v46 = vld [vmem:[%s1153_s0 + $0x60] sm:$0xff]  ;;  %v33_v47 = vld [vmem:[%s1153_s0 + $0x58] sm:$0xff] }
  0x2a   :  { %706 = vmatpush3.bf16.msra.mxu0 %v705_v58  ;;  %296 = vmatmul.mubr.f32.gmra.mrb[2].mxu1 %v31_v0 }
  0x2b   :  { %708 = vmatprep.subr.bf16.mxu0 %v707_v61  ;;  %738 = vmatpush3.bf16.msra.mxu1 %v735_v54 }
  0x2c   :  { %740 = vmatprep.subr.bf16.mxu1 %v739_v3  ;;  %365 = vmatprep.mubr.f32.mxu0 %v27_v6  ;;  %v479_v6 = vld [vmem:[%s1154_s2] ss:$0 sm:$0xff] }
  0x2d   :  { %632 = vmatprep.mubr.msk.f32.mxu1 %vm144_vm0, %v28_v8 }
  0x2e   :  { %710 = vmatpush3.bf16.msra.mxu0 %v709_v7 }
  0x2f   :  { %712 = vmatprep.subr.bf16.mxu0 %v711_v9  ;;  %742 = vmatpush3.bf16.msra.mxu1 %v739_v3 }
  0x30   :  { %744 = vmatprep.subr.bf16.mxu1 %v743_v14 }
  0x32   :  { %714 = vmatpush3.bf16.msra.mxu0 %v713_v17 }
  0x33   :  { %716 = vmatprep.subr.bf16.mxu0 %v715_v18  ;;  %746 = vmatpush3.bf16.msra.mxu1 %v743_v14 }
  0x34   :  { %748 = vmatprep.subr.bf16.mxu1 %v747_v23 }
  0x36   :  { %718 = vmatpush3.bf16.msra.mxu0 %v717_v26 }
  0x37   :  { %720 = vmatprep.subr.bf16.mxu0 %v719_v27  ;;  %750 = vmatpush3.bf16.msra.mxu1 %v747_v23 }
  0x38   :  { %752 = vmatprep.subr.bf16.mxu1 %v751_v32 }
  0x3a   :  { %722 = vmatpush3.bf16.msra.mxu0 %v721_v33 }
  0x3b   :  { %724 = vmatprep.subr.bf16.mxu0 %v723_v34  ;;  %754 = vmatpush3.bf16.msra.mxu1 %v751_v32 }
  0x3e   :  { %726 = vmatpush3.bf16.msra.mxu0 %v725_v39  ;;  %633 = vmatmul.mubr.msk.f32.vlgmr.msra.gmra.mrb[4].mxu1 %vm144_vm0, %v35_v43 }
  0x3f   :  { %728 = vmatprep.subr.bf16.mxu0 %v727_v40 }
  0x42   :  { %730 = vmatpush3.bf16.msra.mxu0 %v729_v44 }
  0x45   :  { %366 = vmatmul.mubr.f32.vlgmr.msra.gmra.mrb[4].mxu0 %v26_v45 }
  0x46   :  { %370 = vmatprep.mubr.f32.mxu0 %v34_v46 }
  0x49   :  { %371 = vmatmul.mubr.f32.gmra.mrb[6].mxu0 %v33_v47 }
  0xf8   :  { %v512_v48 = vpop.f32.mrb[0].mxu0 }
  0xf9   :  { %v550_v49 = vpop.f32.mrb[0].mxu1  ;;  %v513_v50 = vpop.f32.mrb[1].mxu0 }
  0xfa   :  { %v514_v51 = vadd.f32 %v513_v50, %v512_v48  ;;  %v551_v52 = vpop.f32.mrb[1].mxu1 }
  0xfb   :  { %v552_v53 = vadd.f32 %v551_v52, %v550_v49 }
  0xfc   :  { %v515_v54 = vpop.f32.mrb[2].mxu0 }
  0xfd   :  { %v293_v55 = vadd.f32 %v552_v53, %v514_v51  ;;  %v553_v56 = vpop.f32.mrb[2].mxu1  ;;  %v516_v57 = vpop.f32.mrb[3].mxu0 }
  0xfe   :  { %v517_v58 = vadd.f32 %v516_v57, %v515_v54  ;;  %v554_v59 = vpop.f32.mrb[3].mxu1 }
  0xff   :  { %v555_v60 = vadd.f32 %v554_v59, %v553_v56 }
 0x101   :  { %v298_v61 = vadd.f32 %v555_v60, %v517_v58 }
 0x111   :  { %v634_v62 = vpop.f32.mrb[4].mxu1 }
 0x112   :  { %v442_v63 = vpop.f32.mrb[5].mxu1 }
 0x118   :  { %v588_v0 = vpop.f32.mrb[4].mxu0 }
 0x119   :  { %v589_v1 = vpop.f32.mrb[5].mxu0 }
 0x11a   :  { %v590_v2 = vadd.f32 %v589_v1, %v588_v0 }
 0x11c   :  { %v591_v3 = vpop.f32.mrb[6].mxu0  ;;  %v368_v4 = vadd.f32 %v590_v2, %v293_v55 }
 0x11d   :  { %v592_v5 = vpop.f32.mrb[7].mxu0 }
 0x11e   :  { %v593_v7 = vadd.f32 %v592_v5, %v591_v3  ;;  %v443_v8 = vadd.f32 %v442_v63, %v368_v4 }
 0x120   :  { %v373_v9 = vadd.f32 %v593_v7, %v298_v61  ;;  %v467_v10 = vadd.f32 %v479_v6, %v443_v8 }
 0x122   :  { %v448_v11 = vadd.f32 %v634_v62, %v373_v9  ;;  %v469_v12 = vmax.f32 %v467_v10, 0.0 }
 0x124   :  { %v468_v13 = vadd.f32 %v479_v6, %v448_v11  ;;  %471 = vst [vmem:[%s1155_s3] sm:$0xff] %v469_v12 }
 0x126   :  { %v470_v14 = vmax.f32 %v468_v13, 0.0 }
 0x128   :  { %472 = vst [vmem:[%s1155_s3 + $0x8] sm:$0xff] %v470_v14 }

// kernel: i2a_forward.11
= control target key start
LH: loop header
LB: loop body
LE: loop exit
PB: predicated region body
PF: predicated region fallthrough
CT: control target
= control target key end

     0   :  { %v1142_v43 = vmov 1983009808   ;;  %v182_v45 = vlaneseq  ;;  %s1716_s0 = inlined_call_operand.vmem [shape: f32[2,1152], index: 0, kind: input, shape index: {}]   ;;  %s1717_s1 = inlined_call_operand.vmem [shape: f32[1152,128], index: 1, kind: input, shape index: {}]   ;;  %s1718_s2 = inlined_call_operand.vmem [shape: f32[1,128], index: 2, kind: input, shape index: {}]   ;;  %s1719_s3 = inlined_call_operand.vmem [shape: f32[128,4], index: 3, kind: input, shape index: {}]   ;;  %s1720_s4 = inlined_call_operand.vmem [shape: f32[1,4], index: 4, kind: input, shape index: {}]   ;;  %s1721_s5 = inlined_call_operand.hbm [shape: f32[2,4], index: 5, kind: output, shape index: {}]  }
   0x1   :  { %v40_v0 = vld [vmem:[%s1717_s1 + $0x80] sm:$0xff]  ;;  %v41_v1 = vld [vmem:[%s1717_s1 + $0x88] sm:$0xff]  ;;  %v42_v11 = vld [vmem:[%s1717_s1 + $0x90] sm:$0xff]  ;;  %v180_v44 = vunpack.c.l.s4 %v1142_v43 }
   0x2   :  { %v24_v2 = vld [vmem:[%s1717_s1] sm:$0xff]  ;;  %v935_v3 = vpack.c.bf16 %v41_v1, %v40_v0  ;;  %v25_v4 = vld [vmem:[%s1717_s1 + $0x8] sm:$0xff]  ;;  %v43_v13 = vld [vmem:[%s1717_s1 + $0x98] sm:$0xff]  ;;  %v183_v60 = vshrl.u32 %v182_v45, 7 }
   0x3   :  { %v72_v5 = vld [vmem:[%s1717_s1 + $0x180] sm:$0xff]  ;;  %v73_v6 = vld [vmem:[%s1717_s1 + $0x188] sm:$0xff]  ;;  %v937_v7 = vpack.c.bf16 %v25_v4, %v24_v2  ;;  %v26_v14 = vld [vmem:[%s1717_s1 + $0x10] sm:$0xff]  ;;  %v939_v16 = vpack.c.bf16 %v43_v13, %v42_v11  ;;  %v181_v59 = vunpack.c.0.s8 %v180_v44 }
   0x4   :  { %v967_v8 = vpack.c.bf16 %v73_v6, %v72_v5  ;;  %v56_v9 = vld [vmem:[%s1717_s1 + $0x100] sm:$0xff]  ;;  %v57_v10 = vld [vmem:[%s1717_s1 + $0x108] sm:$0xff]  ;;  %936 = vmatprep.subr.bf16.mxu0 %v935_v3  ;;  %v27_v15 = vld [vmem:[%s1717_s1 + $0x18] sm:$0xff] }
   0x5   :  { %v969_v12 = vpack.c.bf16 %v57_v10, %v56_v9  ;;  %938 = vmatpush3.bf16.msra.mxu0 %v937_v7  ;;  %v941_v17 = vpack.c.bf16 %v27_v15, %v26_v14  ;;  %v74_v18 = vld [vmem:[%s1717_s1 + $0x190] sm:$0xff]  ;;  %v75_v19 = vld [vmem:[%s1717_s1 + $0x198] sm:$0xff]  ;;  %v44_v23 = vld [vmem:[%s1717_s1 + $0xa0] sm:$0xff]  ;;  %v1321_v10 = vsub.s32 %v181_v59, %v183_v60 }
   0x6   :  { %968 = vmatprep.subr.bf16.mxu1 %v967_v8  ;;  %v58_v20 = vld [vmem:[%s1717_s1 + $0x110] sm:$0xff]  ;;  %v971_v21 = vpack.c.bf16 %v75_v19, %v74_v18  ;;  %v59_v22 = vld [vmem:[%s1717_s1 + $0x118] sm:$0xff]  ;;  %v45_v24 = vld [vmem:[%s1717_s1 + $0xa8] sm:$0xff]  ;;  %940 = vmatprep.subr.bf16.mxu0 %v939_v16 }
   0x7   :  { %970 = vmatpush3.bf16.msra.mxu1 %v969_v12  ;;  %v973_v25 = vpack.c.bf16 %v59_v22, %v58_v20  ;;  %v943_v26 = vpack.c.bf16 %v45_v24, %v44_v23  ;;  %v28_v27 = vld [vmem:[%s1717_s1 + $0x20] sm:$0xff]  ;;  %v29_v28 = vld [vmem:[%s1717_s1 + $0x28] sm:$0xff]  ;;  %v46_v35 = vld [vmem:[%s1717_s1 + $0xb0] sm:$0xff] }
   0x8   :  { %v76_v29 = vld [vmem:[%s1717_s1 + $0x1a0] sm:$0xff]  ;;  %972 = vmatprep.subr.bf16.mxu1 %v971_v21  ;;  %v77_v30 = vld [vmem:[%s1717_s1 + $0x1a8] sm:$0xff]  ;;  %v945_v33 = vpack.c.bf16 %v29_v28, %v28_v27  ;;  %v47_v36 = vld [vmem:[%s1717_s1 + $0xb8] sm:$0xff] }
   0x9   :  { %v60_v31 = vld [vmem:[%s1717_s1 + $0x120] sm:$0xff]  ;;  %v61_v32 = vld [vmem:[%s1717_s1 + $0x128] sm:$0xff]  ;;  %942 = vmatpush3.bf16.msra.mxu0 %v941_v17  ;;  %v975_v34 = vpack.c.bf16 %v77_v30, %v76_v29  ;;  %v30_v37 = vld [vmem:[%s1717_s1 + $0x30] sm:$0xff]  ;;  %v947_v39 = vpack.c.bf16 %v47_v36, %v46_v35 }
   0xa   :  { %944 = vmatprep.subr.bf16.mxu0 %v943_v26  ;;  %v977_v38 = vpack.c.bf16 %v61_v32, %v60_v31  ;;  %v31_v40 = vld [vmem:[%s1717_s1 + $0x38] sm:$0xff]  ;;  %v78_v41 = vld [vmem:[%s1717_s1 + $0x1b0] sm:$0xff]  ;;  %v48_v49 = vld [vmem:[%s1717_s1 + $0xc0] sm:$0xff] }
   0xb   :  { %974 = vmatpush3.bf16.msra.mxu1 %v973_v25  ;;  %v79_v42 = vld [vmem:[%s1717_s1 + $0x1b8] sm:$0xff]  ;;  %v62_v47 = vld [vmem:[%s1717_s1 + $0x130] sm:$0xff]  ;;  %v49_v50 = vld [vmem:[%s1717_s1 + $0xc8] sm:$0xff]  ;;  %v949_v51 = vpack.c.bf16 %v31_v40, %v30_v37 }
   0xc   :  { %976 = vmatprep.subr.bf16.mxu1 %v975_v34  ;;  %v979_v46 = vpack.c.bf16 %v79_v42, %v78_v41  ;;  %v63_v48 = vld [vmem:[%s1717_s1 + $0x138] sm:$0xff]  ;;  %v80_v52 = vld [vmem:[%s1717_s1 + $0x1c0] sm:$0xff]  ;;  %v81_v53 = vld [vmem:[%s1717_s1 + $0x1c8] sm:$0xff]  ;;  %v951_v55 = vpack.c.bf16 %v49_v50, %v48_v49 }
   0xd   :  { %946 = vmatpush3.bf16.msra.mxu0 %v945_v33  ;;  %v981_v54 = vpack.c.bf16 %v63_v48, %v62_v47  ;;  %v32_v56 = vld [vmem:[%s1717_s1 + $0x40] sm:$0xff]  ;;  %v33_v57 = vld [vmem:[%s1717_s1 + $0x48] sm:$0xff]  ;;  %v983_v61 = vpack.c.bf16 %v81_v53, %v80_v52  ;;  %v50_v63 = vld [vmem:[%s1717_s1 + $0xd0] sm:$0xff] }
   0xe   :  { %948 = vmatprep.subr.bf16.mxu0 %v947_v39  ;;  %v64_v58 = vld [vmem:[%s1717_s1 + $0x140] sm:$0xff]  ;;  %v65_v62 = vld [vmem:[%s1717_s1 + $0x148] sm:$0xff]  ;;  %v51_v0 = vld [vmem:[%s1717_s1 + $0xd8] sm:$0xff]  ;;  %v953_v3 = vpack.c.bf16 %v33_v57, %v32_v56 }
   0xf   :  { %978 = vmatpush3.bf16.msra.mxu1 %v977_v38  ;;  %v82_v1 = vld [vmem:[%s1717_s1 + $0x1d0] sm:$0xff]  ;;  %v83_v2 = vld [vmem:[%s1717_s1 + $0x1d8] sm:$0xff]  ;;  %v985_v5 = vpack.c.bf16 %v65_v62, %v64_v58  ;;  %v955_v6 = vpack.c.bf16 %v51_v0, %v50_v63  ;;  %v52_v12 = vld [vmem:[%s1717_s1 + $0xe0] sm:$0xff] }
  0x10   :  { %980 = vmatprep.subr.bf16.mxu1 %v979_v46  ;;  %v34_v4 = vld [vmem:[%s1717_s1 + $0x50] sm:$0xff]  ;;  %v35_v7 = vld [vmem:[%s1717_s1 + $0x58] sm:$0xff]  ;;  %v987_v11 = vpack.c.bf16 %v83_v2, %v82_v1  ;;  %v53_v13 = vld [vmem:[%s1717_s1 + $0xe8] sm:$0xff] }
  0x11   :  { %950 = vmatpush3.bf16.msra.mxu0 %v949_v51  ;;  %v66_v8 = vld [vmem:[%s1717_s1 + $0x150] sm:$0xff]  ;;  %v67_v9 = vld [vmem:[%s1717_s1 + $0x158] sm:$0xff]  ;;  %v84_v14 = vld [vmem:[%s1717_s1 + $0x1e0] sm:$0xff]  ;;  %v957_v16 = vpack.c.bf16 %v35_v7, %v34_v4  ;;  %v959_v19 = vpack.c.bf16 %v53_v13, %v52_v12 }
  0x12   :  { %952 = vmatprep.subr.bf16.mxu0 %v951_v55  ;;  %v85_v15 = vld [vmem:[%s1717_s1 + $0x1e8] sm:$0xff]  ;;  %v989_v17 = vpack.c.bf16 %v67_v9, %v66_v8  ;;  %v21_v18 = vld [vmem:[%s1716_s0] sm:$0xff]  ;;  %v54_v27 = vld [vmem:[%s1717_s1 + $0xf0] sm:$0xff] }
  0x13   :  { %982 = vmatpush3.bf16.msra.mxu1 %v981_v54  ;;  %v36_v20 = vld [vmem:[%s1717_s1 + $0x60] sm:$0xff]  ;;  %v37_v21 = vld [vmem:[%s1717_s1 + $0x68] sm:$0xff]  ;;  %v185_v23 = vrot.slane %v21_v18, %v1321_v10  ;;  %v178_v24 = vcombine.high %v21_v18, %v21_v18  ;;  %v991_v25 = vpack.c.bf16 %v85_v15, %v84_v14  ;;  %v55_v28 = vld [vmem:[%s1717_s1 + $0xf8] sm:$0xff] }
  0x14   :  { %984 = vmatprep.subr.bf16.mxu1 %v983_v61  ;;  %v68_v22 = vld [vmem:[%s1717_s1 + $0x160] sm:$0xff]  ;;  %v69_v26 = vld [vmem:[%s1717_s1 + $0x168] sm:$0xff]  ;;  %v86_v29 = vld [vmem:[%s1717_s1 + $0x1f0] sm:$0xff]  ;;  %v961_v33 = vpack.c.bf16 %v37_v21, %v36_v20  ;;  %v963_v35 = vpack.c.bf16 %v55_v28, %v54_v27 }
  0x15   :  { %954 = vmatpush3.bf16.msra.mxu0 %v953_v3  ;;  %v87_v30 = vld [vmem:[%s1717_s1 + $0x1f8] sm:$0xff]  ;;  %v193_v31 = vcombine.high %v185_v23, %v185_v23  ;;  %v192_v32 = vrot.slane %v178_v24, %v1321_v10  ;;  %v993_v34 = vpack.c.bf16 %v69_v26, %v68_v22  ;;  %v38_v36 = vld [vmem:[%s1717_s1 + $0x70] sm:$0xff]  ;;  %v104_v42 = vld [vmem:[%s1717_s1 + $0x280] sm:$0xff] }
  0x16   :  { %956 = vmatprep.subr.bf16.mxu0 %v955_v6  ;;  %v39_v37 = vld [vmem:[%s1717_s1 + $0x78] sm:$0xff]  ;;  %v70_v38 = vld [vmem:[%s1717_s1 + $0x170] sm:$0xff]  ;;  %v995_v40 = vpack.c.bf16 %v87_v30, %v86_v29  ;;  %v105_v43 = vld [vmem:[%s1717_s1 + $0x288] sm:$0xff] }
  0x17   :  { %986 = vmatpush3.bf16.msra.mxu1 %v985_v5  ;;  %v194_v39 = vcombine.high %v192_v32, %v192_v32  ;;  %292 = vmatprep.mubr.f32.mxu0 %v193_v31  ;;  %v71_v41 = vld [vmem:[%s1717_s1 + $0x178] sm:$0xff]  ;;  %v136_v44 = vld [vmem:[%s1717_s1 + $0x380] sm:$0xff]  ;;  %v137_v45 = vld [vmem:[%s1717_s1 + $0x388] sm:$0xff]  ;;  %v965_v46 = vpack.c.bf16 %v39_v37, %v38_v36  ;;  %v999_v48 = vpack.c.bf16 %v105_v43, %v104_v42 }
  0x18   :  { %988 = vmatprep.subr.bf16.mxu1 %v987_v11  ;;  %v997_v47 = vpack.c.bf16 %v71_v41, %v70_v38  ;;  %v88_v49 = vld [vmem:[%s1717_s1 + $0x200] sm:$0xff]  ;;  %v89_v50 = vld [vmem:[%s1717_s1 + $0x208] sm:$0xff]  ;;  %v1031_v52 = vpack.c.bf16 %v137_v45, %v136_v44  ;;  %v106_v54 = vld [vmem:[%s1717_s1 + $0x290] sm:$0xff] }
  0x19   :  { %958 = vmatpush3.bf16.msra.mxu0 %v957_v16  ;;  %362 = vmatprep.mubr.f32.mxu1 %v194_v39  ;;  %v120_v51 = vld [vmem:[%s1717_s1 + $0x300] sm:$0xff]  ;;  %v121_v53 = vld [vmem:[%s1717_s1 + $0x308] sm:$0xff]  ;;  %v107_v55 = vld [vmem:[%s1717_s1 + $0x298] sm:$0xff]  ;;  %v1001_v58 = vpack.c.bf16 %v89_v50, %v88_v49 }
  0x1a   :  { %960 = vmatprep.subr.bf16.mxu0 %v959_v19  ;;  %v138_v56 = vld [vmem:[%s1717_s1 + $0x390] sm:$0xff]  ;;  %v139_v57 = vld [vmem:[%s1717_s1 + $0x398] sm:$0xff]  ;;  %v1033_v59 = vpack.c.bf16 %v121_v53, %v120_v51  ;;  %v1003_v60 = vpack.c.bf16 %v107_v55, %v106_v54  ;;  %v108_v2 = vld [vmem:[%s1717_s1 + $0x2a0] sm:$0xff] }
  0x1b   :  { %990 = vmatpush3.bf16.msra.mxu1 %v989_v17  ;;  %v90_v61 = vld [vmem:[%s1717_s1 + $0x210] sm:$0xff]  ;;  %v91_v62 = vld [vmem:[%s1717_s1 + $0x218] sm:$0xff]  ;;  %v1035_v0 = vpack.c.bf16 %v139_v57, %v138_v56  ;;  %v109_v3 = vld [vmem:[%s1717_s1 + $0x2a8] sm:$0xff] }
  0x1c   :  { %992 = vmatprep.subr.bf16.mxu1 %v991_v25  ;;  %v122_v63 = vld [vmem:[%s1717_s1 + $0x310] sm:$0xff]  ;;  %v123_v1 = vld [vmem:[%s1717_s1 + $0x318] sm:$0xff]  ;;  %v140_v4 = vld [vmem:[%s1717_s1 + $0x3a0] sm:$0xff]  ;;  %v1005_v6 = vpack.c.bf16 %v91_v62, %v90_v61  ;;  %v1007_v8 = vpack.c.bf16 %v109_v3, %v108_v2 }
  0x1d   :  { %962 = vmatpush3.bf16.msra.mxu0 %v961_v33  ;;  %v141_v5 = vld [vmem:[%s1717_s1 + $0x3a8] sm:$0xff]  ;;  %v1037_v7 = vpack.c.bf16 %v123_v1, %v122_v63  ;;  %v92_v9 = vld [vmem:[%s1717_s1 + $0x220] sm:$0xff]  ;;  %v110_v15 = vld [vmem:[%s1717_s1 + $0x2b0] sm:$0xff] }
  0x1e   :  { %964 = vmatprep.subr.bf16.mxu0 %v963_v35  ;;  %v93_v11 = vld [vmem:[%s1717_s1 + $0x228] sm:$0xff]  ;;  %v124_v12 = vld [vmem:[%s1717_s1 + $0x320] sm:$0xff]  ;;  %v1039_v13 = vpack.c.bf16 %v141_v5, %v140_v4  ;;  %v111_v16 = vld [vmem:[%s1717_s1 + $0x2b8] sm:$0xff] }
  0x1f   :  { %994 = vmatpush3.bf16.msra.mxu1 %v993_v34  ;;  %v125_v14 = vld [vmem:[%s1717_s1 + $0x328] sm:$0xff]  ;;  %v142_v17 = vld [vmem:[%s1717_s1 + $0x3b0] sm:$0xff]  ;;  %v143_v18 = vld [vmem:[%s1717_s1 + $0x3b8] sm:$0xff]  ;;  %v1009_v19 = vpack.c.bf16 %v93_v11, %v92_v9  ;;  %v1011_v22 = vpack.c.bf16 %v111_v16, %v110_v15 }
  0x20   :  { %996 = vmatprep.subr.bf16.mxu1 %v995_v40  ;;  %v94_v20 = vld [vmem:[%s1717_s1 + $0x230] sm:$0xff]  ;;  %v1041_v21 = vpack.c.bf16 %v125_v14, %v124_v12  ;;  %v127_v25 = vld [vmem:[%s1717_s1 + $0x338] sm:$0xff]  ;;  %v1043_v26 = vpack.c.bf16 %v143_v18, %v142_v17  ;;  %v112_v27 = vld [vmem:[%s1717_s1 + $0x2c0] sm:$0xff] }
  0x21   :  { %966 = vmatpush3.bf16.msra.mxu0 %v965_v46  ;;  %v126_v24 = vld [vmem:[%s1717_s1 + $0x330] sm:$0xff]  ;;  %v113_v28 = vld [vmem:[%s1717_s1 + $0x2c8] sm:$0xff]  ;;  %v144_v30 = vld [vmem:[%s1717_s1 + $0x3c0] sm:$0xff] }
  0x22   :  { %1000 = vmatprep.subr.bf16.mxu0 %v999_v48  ;;  %v22_v29 = vld [vmem:[%s1716_s0 + $0x8] sm:$0xff]  ;;  %v1045_v35 = vpack.c.bf16 %v127_v25, %v126_v24  ;;  %v1015_v36 = vpack.c.bf16 %v113_v28, %v112_v27  ;;  %v96_v37 = vld [vmem:[%s1717_s1 + $0x240] sm:$0xff]  ;;  %v114_v44 = vld [vmem:[%s1717_s1 + $0x2d0] sm:$0xff] }
  0x23   :  { %998 = vmatpush3.bf16.msra.mxu1 %v997_v47  ;;  %v145_v31 = vld [vmem:[%s1717_s1 + $0x3c8] sm:$0xff]  ;;  %v195_v33 = vcombine.high %v22_v29, %v22_v29  ;;  %v128_v39 = vld [vmem:[%s1717_s1 + $0x340] sm:$0xff]  ;;  %v115_v45 = vld [vmem:[%s1717_s1 + $0x2d8] sm:$0xff] }
  0x24   :  { %1032 = vmatprep.subr.bf16.mxu1 %v1031_v52  ;;  %293 = vmatmul.mubr.f32.vlgmr.msra.gmra.mrb[0].mxu0 %v185_v23  ;;  %v95_v23 = vld [vmem:[%s1717_s1 + $0x238] sm:$0xff]  ;;  %v97_v38 = vld [vmem:[%s1717_s1 + $0x248] sm:$0xff]  ;;  %v1047_v42 = vpack.c.bf16 %v145_v31, %v144_v30  ;;  %v146_v46 = vld [vmem:[%s1717_s1 + $0x3d0] sm:$0xff]  ;;  %v1019_v51 = vpack.c.bf16 %v115_v45, %v114_v44 }
  0x25   :  { %1002 = vmatpush3.bf16.msra.mxu0 %v1001_v58  ;;  %v1013_v34 = vpack.c.bf16 %v95_v23, %v94_v20  ;;  %v1502_v41 = vrot.slane %v195_v33, %v1321_v10  ;;  %v129_v43 = vld [vmem:[%s1717_s1 + $0x348] sm:$0xff]  ;;  %v1017_v48 = vpack.c.bf16 %v97_v38, %v96_v37  ;;  %v98_v49 = vld [vmem:[%s1717_s1 + $0x250] sm:$0xff]  ;;  %v99_v52 = vld [vmem:[%s1717_s1 + $0x258] sm:$0xff] }
  0x26   :  { %363 = vmatmul.mubr.f32.vlgmr.msra.gmra.mrb[0].mxu1 %v192_v32  ;;  %1004 = vmatprep.subr.bf16.mxu0 %v1003_v60  ;;  %v1488_v32 = vrot.slane %v22_v29, %v1321_v10  ;;  %v147_v10 = vld [vmem:[%s1717_s1 + $0x3d8] sm:$0xff]  ;;  %v1049_v50 = vpack.c.bf16 %v129_v43, %v128_v39  ;;  %v130_v53 = vld [vmem:[%s1717_s1 + $0x350] sm:$0xff] }
  0x27   :  { %1034 = vmatpush3.bf16.msra.mxu1 %v1033_v59  ;;  %v211_v47 = vcombine.high %v1502_v41, %v1502_v41 }
  0x28   :  { %1036 = vmatprep.subr.bf16.mxu1 %v1035_v0  ;;  %v210_v40 = vcombine.high %v1488_v32, %v1488_v32 }
  0x29   :  { %1006 = vmatpush3.bf16.msra.mxu0 %v1005_v6 }
  0x2a   :  { %1008 = vmatprep.subr.bf16.mxu0 %v1007_v8  ;;  %432 = vmatprep.mubr.f32.mxu0 %v210_v40 }
  0x2b   :  { %1038 = vmatpush3.bf16.msra.mxu1 %v1037_v7 }
  0x2c   :  { %1040 = vmatprep.subr.bf16.mxu1 %v1039_v13 }
  0x2d   :  { %1010 = vmatpush3.bf16.msra.mxu0 %v1009_v19 }
  0x2e   :  { %1012 = vmatprep.subr.bf16.mxu0 %v1011_v22 }
  0x2f   :  { %1042 = vmatpush3.bf16.msra.mxu1 %v1041_v21 }
  0x30   :  { %1044 = vmatprep.subr.bf16.mxu1 %v1043_v26 }
  0x31   :  { %1014 = vmatpush3.bf16.msra.mxu0 %v1013_v34 }
  0x32   :  { %1016 = vmatprep.subr.bf16.mxu0 %v1015_v36 }
  0x33   :  { %1046 = vmatpush3.bf16.msra.mxu1 %v1045_v35 }
  0x34   :  { %10 = vsyncpa [#allocation3], 0  ;;  %1048 = vmatprep.subr.bf16.mxu1 %v1047_v42  ;;  %v1051_v54 = vpack.c.bf16 %v147_v10, %v146_v46  ;;  %v131_v55 = vld [vmem:[%s1717_s1 + $0x358] sm:$0xff]  ;;  %v116_v56 = vld [vmem:[%s1717_s1 + $0x2e0] sm:$0xff]  ;;  %502 = vmatprep.mubr.f32.mxu1 %v211_v47  ;;  %v1021_v60 = vpack.c.bf16 %v99_v52, %v98_v49  ;;  %v1143_v22 = vmov 0.0|0.0   ;;  %vm1144_vm0 = vmmov 0  }
  0x35   :  { %v117_v57 = vld [vmem:[%s1717_s1 + $0x2e8] sm:$0xff]  ;;  %v148_v58 = vld [vmem:[%s1717_s1 + $0x3e0] sm:$0xff]  ;;  %1018 = vmatpush3.bf16.msra.mxu0 %v1017_v48  ;;  %v1053_v61 = vpack.c.bf16 %v131_v55, %v130_v53  ;;  %v118_v4 = vld [vmem:[%s1717_s1 + $0x2f0] sm:$0xff]  ;;  %v1145_v28 = vmov 0.0   ;;  %s1146_s18 = smov [#allocation2]   ;;  %vm672_vm1 = vcmask 25600  }
  0x36   :  { %v149_v59 = vld [vmem:[%s1717_s1 + $0x3e8] sm:$0xff]  ;;  %1020 = vmatprep.subr.bf16.mxu0 %v1019_v51  ;;  %v1023_v62 = vpack.c.bf16 %v117_v57, %v116_v56  ;;  %v100_v63 = vld [vmem:[%s1717_s1 + $0x260] sm:$0xff]  ;;  %v119_v5 = vld [vmem:[%s1717_s1 + $0x2f8] sm:$0xff] }
  0x37   :  { %1050 = vmatpush3.bf16.msra.mxu1 %v1049_v50  ;;  %v101_v0 = vld [vmem:[%s1717_s1 + $0x268] sm:$0xff]  ;;  %v132_v1 = vld [vmem:[%s1717_s1 + $0x360] sm:$0xff]  ;;  %v1055_v2 = vpack.c.bf16 %v149_v59, %v148_v58  ;;  %v150_v6 = vld [vmem:[%s1717_s1 + $0x3f0] sm:$0xff]  ;;  %v1027_v11 = vpack.c.bf16 %v119_v5, %v118_v4 }
  0x38   :  { %1052 = vmatprep.subr.bf16.mxu1 %v1051_v54  ;;  %v133_v3 = vld [vmem:[%s1717_s1 + $0x368] sm:$0xff]  ;;  %v151_v7 = vld [vmem:[%s1717_s1 + $0x3f8] sm:$0xff]  ;;  %v1025_v8 = vpack.c.bf16 %v101_v0, %v100_v63  ;;  %v102_v12 = vld [vmem:[%s1717_s1 + $0x270] sm:$0xff] }
  0x39   :  { %1022 = vmatpush3.bf16.msra.mxu0 %v1021_v60  ;;  %v1057_v9 = vpack.c.bf16 %v133_v3, %v132_v1  ;;  %v103_v13 = vld [vmem:[%s1717_s1 + $0x278] sm:$0xff]  ;;  %v1059_v14 = vpack.c.bf16 %v151_v7, %v150_v6  ;;  %v134_v15 = vld [vmem:[%s1717_s1 + $0x370] sm:$0xff]  ;;  %v152_v19 = vld [vmem:[%s1717_s1 + $0x400] sm:$0xff] }
  0x3a   :  { %1024 = vmatprep.subr.bf16.mxu0 %v1023_v62  ;;  %v135_v16 = vld [vmem:[%s1717_s1 + $0x378] sm:$0xff]  ;;  %v1029_v17 = vpack.c.bf16 %v103_v13, %v102_v12  ;;  %v153_v20 = vld [vmem:[%s1717_s1 + $0x408] sm:$0xff]  ;;  %v154_v23 = vld [vmem:[%s1717_s1 + $0x410] sm:$0xff] }
  0x3b   :  { %1054 = vmatpush3.bf16.msra.mxu1 %v1053_v61  ;;  %v1061_v18 = vpack.c.bf16 %v135_v16, %v134_v15  ;;  %v1064_v21 = vpack.c.bf16 %v153_v20, %v152_v19  ;;  %v155_v24 = vld [vmem:[%s1717_s1 + $0x418] sm:$0xff]  ;;  %v156_v26 = vld [vmem:[%s1717_s1 + $0x420] sm:$0xff]  ;;  %v157_v27 = vld [vmem:[%s1717_s1 + $0x428] sm:$0xff] }
  0x3c   :  { %1056 = vmatprep.subr.bf16.mxu1 %v1055_v2  ;;  %v1067_v25 = vpack.c.bf16 %v155_v24, %v154_v23  ;;  %v1070_v29 = vpack.c.bf16 %v157_v27, %v156_v26  ;;  %v158_v30 = vld [vmem:[%s1717_s1 + $0x430] sm:$0xff]  ;;  %v159_v31 = vld [vmem:[%s1717_s1 + $0x438] sm:$0xff]  ;;  %v160_v33 = vld [vmem:[%s1717_s1 + $0x440] sm:$0xff] }
  0x3d   :  { %1026 = vmatpush3.bf16.msra.mxu0 %v1025_v8  ;;  %v161_v34 = vld [vmem:[%s1717_s1 + $0x448] sm:$0xff]  ;;  %v162_v36 = vld [vmem:[%s1717_s1 + $0x450] sm:$0xff]  ;;  %v163_v37 = vld [vmem:[%s1717_s1 + $0x458] sm:$0xff] }
  0x3e   :  { %1028 = vmatprep.subr.bf16.mxu0 %v1027_v11  ;;  %v1076_v35 = vpack.c.bf16 %v161_v34, %v160_v33  ;;  %v1079_v38 = vpack.c.bf16 %v163_v37, %v162_v36  ;;  %v164_v39 = vld [vmem:[%s1717_s1 + $0x460] sm:$0xff]  ;;  %v165_v40 = vld [vmem:[%s1717_s1 + $0x468] sm:$0xff]  ;;  %v166_v42 = vld [vmem:[%s1717_s1 + $0x470] sm:$0xff] }
  0x3f   :  { %1058 = vmatpush3.bf16.msra.mxu1 %v1057_v9  ;;  %v167_v43 = vld [vmem:[%s1717_s1 + $0x478] sm:$0xff]  ;;  %v689_v45 = vld.sshfl [vmem:[%s1716_s0 + $0x10] sm:$0x3 pattern:$0x76325410]  ;;  %v579_v46 = vld [vmem:[%s1719_s3] sm:$0xff] }
  0x40   :  { %1060 = vmatprep.subr.bf16.mxu1 %v1059_v14  ;;  %v1085_v44 = vpack.c.bf16 %v167_v43, %v166_v42  ;;  %v580_v10 = vld [vmem:[%s1719_s3 + $0x8] sm:$0xff]  ;;  %v581_v48 = vld [vmem:[%s1719_s3 + $0x10] sm:$0xff]  ;;  %v582_v49 = vld [vmem:[%s1719_s3 + $0x18] sm:$0xff]  ;;  %s680_s0 = sshll.u32 %s1146_s18, 4  ;;  %s681_s0 = int_to_ptr.vmem [resolvable:$true] %s680_s0 }
  0x41   :  { %1030 = vmatpush3.bf16.msra.mxu0 %v1029_v17  ;;  %v1088_v47 = vpack.c.bf16 %v580_v10, %v579_v46  ;;  %v1091_v50 = vpack.c.bf16 %v582_v49, %v581_v48  ;;  %v583_v51 = vld [vmem:[%s1719_s3 + $0x20] sm:$0xff]  ;;  %v584_v52 = vld [vmem:[%s1719_s3 + $0x28] sm:$0xff]  ;;  %v585_v54 = vld [vmem:[%s1719_s3 + $0x30] sm:$0xff]  ;;  %s1118_s19 = scalar_lea.vmem %s681_s0, 32  ;;  %p1123_p1 = scmp.lt.s32.totalorder %s681_s0, %s681_s0 }
  0x42   :  { %1063 = vmatprep.subr.bf16.mxu0 %v1143_v22  ;;  %v1094_v53 = vpack.c.bf16 %v584_v52, %v583_v51  ;;  %v586_v55 = vld [vmem:[%s1719_s3 + $0x38] sm:$0xff]  ;;  %v587_v57 = vld [vmem:[%s1719_s3 + $0x40] sm:$0xff]  ;;  %v588_v58 = vld [vmem:[%s1719_s3 + $0x48] sm:$0xff]  ;;  %p1119_p0 = scmp.ne.s32.totalorder %s681_s0, %s1118_s19  ;;  %p1124_p2 = scmp.lt.s32.totalorder %s1118_s19, %s1118_s19 }
  0x43   :  { %1062 = vmatpush3.bf16.msra.mxu1 %v1061_v18  ;;  %v1097_v56 = vpack.c.bf16 %v586_v55, %v585_v54  ;;  %v1100_v59 = vpack.c.bf16 %v588_v58, %v587_v57  ;;  %v589_v60 = vld [vmem:[%s1719_s3 + $0x50] sm:$0xff]  ;;  %v590_v61 = vld [vmem:[%s1719_s3 + $0x58] sm:$0xff]  ;;  %v591_v63 = vld [vmem:[%s1719_s3 + $0x60] sm:$0xff] }
  0x44   :  { %1087 = vmatprep.subr.bf16.mxu1 %v1143_v22  ;;  %433 = vmatmul.mubr.f32.vlgmr.msra.gmra.mrb[2].mxu0 %v1488_v32  ;;  %v1073_v32 = vpack.c.bf16 %v159_v31, %v158_v30  ;;  %v1103_v62 = vpack.c.bf16 %v590_v61, %v589_v60  ;;  %v592_v0 = vld [vmem:[%s1719_s3 + $0x68] sm:$0xff]  ;;  %v593_v2 = vld [vmem:[%s1719_s3 + $0x70] sm:$0xff]  ;;  %v594_v3 = vld [vmem:[%s1719_s3 + $0x78] sm:$0xff]  ;;  %p1125_p3 = por %p1124_p2, %p1123_p1 }
  0x45   :  { %1065 = vmatpush3.bf16.msra.mxu0 %v1064_v21  ;;  %897 = vmatprep.mubr.msk.f32.mxu0 %vm1144_vm0, %v1145_v28  ;;  %v1106_v1 = vpack.c.bf16 %v592_v0, %v591_v63  ;;  %v1109_v4 = vpack.c.bf16 %v594_v3, %v593_v2  ;;  %v688_v6 = vld [vmem:[%s1718_s2] ss:$0 sm:$0xff] }
  0x46   :  { %503 = vmatmul.mubr.f32.vlgmr.msra.gmra.mrb[2].mxu1 %v1502_v41  ;;  %1066 = vmatprep.subr.bf16.mxu0 %v1143_v22  ;;  %v1082_v41 = vpack.c.bf16 %v165_v40, %v164_v39  ;;  %v690_v27 = vld [vmem:[%s1720_s4] ss:$0 sm:$0xff]  ;;  %p1126_p4 = pnand %p1125_p3, %p1119_p0 }
  0x47   :  { %932 = vmatprep.mubr.msk.f32.mxu1 %vm1144_vm0, %v1145_v28  ;;  %1089 = vmatpush3.bf16.msra.mxu1 %v1088_v47 }
  0x48   :  { %1090 = vmatprep.subr.bf16.mxu1 %v1143_v22 }
  0x49   :  { %1068 = vmatpush3.bf16.msra.mxu0 %v1067_v25 }
  0x4a   :  { %1069 = vmatprep.subr.bf16.mxu0 %v1143_v22 }
  0x4b   :  { %1092 = vmatpush3.bf16.msra.mxu1 %v1091_v50 }
  0x4c   :  { %1093 = vmatprep.subr.bf16.mxu1 %v1143_v22 }
  0x4d   :  { %1071 = vmatpush3.bf16.msra.mxu0 %v1070_v29 }
  0x4e   :  { %1072 = vmatprep.subr.bf16.mxu0 %v1143_v22 }
  0x4f   :  { %1095 = vmatpush3.bf16.msra.mxu1 %v1094_v53 }
  0x50   :  { %1096 = vmatprep.subr.bf16.mxu1 %v1143_v22 }
  0x51   :  { %1074 = vmatpush3.bf16.msra.mxu0 %v1073_v32 }
  0x52   :  { %1075 = vmatprep.subr.bf16.mxu0 %v1143_v22 }
  0x53   :  { %1098 = vmatpush3.bf16.msra.mxu1 %v1097_v56 }
  0x54   :  { %1099 = vmatprep.subr.bf16.mxu1 %v1143_v22 }
  0x55   :  { %1077 = vmatpush3.bf16.msra.mxu0 %v1076_v35 }
  0x56   :  { %1078 = vmatprep.subr.bf16.mxu0 %v1143_v22 }
  0x57   :  { %1101 = vmatpush3.bf16.msra.mxu1 %v1100_v59 }
  0x58   :  { %1102 = vmatprep.subr.bf16.mxu1 %v1143_v22 }
  0x59   :  { %1080 = vmatpush3.bf16.msra.mxu0 %v1079_v38 }
  0x5a   :  { %1081 = vmatprep.subr.bf16.mxu0 %v1143_v22 }
  0x5b   :  { %1104 = vmatpush3.bf16.msra.mxu1 %v1103_v62 }
  0x5c   :  { %1105 = vmatprep.subr.bf16.mxu1 %v1143_v22 }
  0x5d   :  { %1083 = vmatpush3.bf16.msra.mxu0 %v1082_v41 }
  0x5e   :  { %1084 = vmatprep.subr.bf16.mxu0 %v1143_v22 }
  0x5f   :  { %1107 = vmatpush3.bf16.msra.mxu1 %v1106_v1 }
  0x60   :  { %1108 = vmatprep.subr.bf16.mxu1 %v1143_v22 }
  0x61   :  { %1086 = vmatpush3.bf16.msra.mxu0 %v1085_v44 }
  0x63   :  { %1110 = vmatpush3.bf16.msra.mxu1 %v1109_v4 }
  0x64   :  { %898 = vmatmul.mubr.f32.vlgmr.msra.gmra.mrb[4].mxu0 %v689_v45 }
  0xf7   :  { %v723_v5 = vpop.f32.mrb[0].mxu0 }
  0xf8   :  { %v724_v7 = vpop.f32.mrb[1].mxu0 }
  0xf9   :  { %v758_v8 = vpop.f32.mrb[0].mxu1  ;;  %v725_v9 = vadd.f32 %v724_v7, %v723_v5 }
  0xfa   :  { %v759_v11 = vpop.f32.mrb[1].mxu1 }
  0xfb   :  { %v760_v12 = vadd.f32 %v759_v11, %v758_v8  ;;  %v295_v13 = vadd.f32 %v725_v9, %v688_v6 }
  0xfd   :  { %v365_v14 = vadd.f32 %v760_v12, %v295_v13 }
 0x117   :  { %v793_v15 = vpop.f32.mrb[2].mxu0 }
 0x118   :  { %v794_v16 = vpop.f32.mrb[3].mxu0 }
 0x119   :  { %v828_v17 = vpop.f32.mrb[2].mxu1  ;;  %v795_v18 = vadd.f32 %v794_v16, %v793_v15 }
 0x11a   :  { %v829_v19 = vpop.f32.mrb[3].mxu1 }
 0x11b   :  { %v830_v20 = vadd.f32 %v829_v19, %v828_v17  ;;  %v435_v21 = vadd.f32 %v795_v18, %v365_v14 }
 0x11d   :  { %v505_v22 = vadd.f32 %v830_v20, %v435_v21 }
 0x137   :  { %v574_v23 = vpop.f32.mrb[4].mxu0 }
 0x138   :  { %v575_v24 = vadd.f32 %v574_v23, %v505_v22  ;;  %v899_v25 = vpop.f32.mrb[5].mxu0 }
 0x13a   :  { %v578_v26 = vmax.f32 %v575_v24, 0.0 }
 0x13c   :  { %933 = vmatmul.mubr.f32.vlgmr.msra.gmra.mrb[4].mxu1 %v578_v26 }
 0x20f   :  { %v668_v28 = vpop.f32.mrb[4].mxu1 }
 0x210   :  { %v669_v29 = vadd.f32 %v690_v27, %v668_v28  ;;  %v934_v30 = vpop.f32.mrb[5].mxu1 }
 0x212   :  { %673 = vst.msk [vmem:[#allocation2] sm:$0x3] %vm672_vm1, %v669_v29 }
 0x213   :  { %1129 = shalt.err (!%p1126_p4)
}
 0x214   :  { %s1130_s22 = scalar_lea.hbm %s1721_s5, 32 }
 0x215   :  { %p1131_p5 = scmp.ne.s32.totalorder %s1721_s5, %s1130_s22  ;;  %p1134_p6 = scmp.lt.u32.totalorder %s1130_s22, %s1721_s5 }
 0x217   :  { %p1136_p7 = pnand %p1134_p6, %p1131_p5 }
 0x219   :  { %1139 = shalt.err (!%p1136_p7)
}
 0x21a   :  { %683 = dma.vmem_to_hbm [thread:$0]  %s681_s0, 32, %s1721_s5, [#allocation3]  }
 0x21b   :  { %1140 = dma.done.wait [#allocation3], 32  }
 0x21c   :  { %1141 = vsyncadd [#allocation3], 4294967264 }
 0x21d   :  { %687 = vsyncpa [#allocation3], 1 }

</bundles_post_ra>
